<compile_context>
chip_gen: v7x
topology: tpu7x:2x2x1
jax: 0.10.0
libtpu: 0.0.40
codegen_flags: <defaults>
</compile_context>

<pallas_src>
import jax
import jax.numpy as jnp
from jax import lax
from jax.experimental import pallas as pl
from jax.experimental.pallas import tpu as pltpu


KSIZE = 4   # Conv2d kernel size fixed by the module: Conv2d(..., 4, stride=2, padding=1)
COL0 = 8    # scratch column of the first real activation column (sublane-tile aligned);
            # column COL0-1 is the conv's left zero-pad column.


def _round_up(v, m):
    return ((v + m - 1) // m) * m


def _layer_geometry(H, W, c_in, c_out, n_layers):
    geo = []
    h, w, cin = H, W, c_in
    for _ in range(n_layers):
        oh, ow = h // 2, w // 2
        owp = max(8, _round_up(ow, 8))      # sublane-padded output width
        geo.append(dict(h=h, w=w, oh=oh, ow=ow, owp=owp, cin=cin))
        h, w, cin = oh, ow, c_out
    return geo


def _make_encoder_kernel(N, H, W, c_in, c_out, n_layers):
    """Fused [conv(k=4,s=2,p=1)]*L + LayerNorm([C,1,1]) + Flatten kernel body."""
    L = n_layers
    geo = _layer_geometry(H, W, c_in, c_out, L)

    def kernel(*refs):
        x_ref = refs[0]
        w_refs = [refs[1 + 2 * l] for l in range(L)]
        b_refs = [refs[2 + 2 * l] for l in range(L)]
        g_ref = refs[1 + 2 * L]
        bt_ref = refs[2 + 2 * L]
        o_ref = refs[3 + 2 * L]
        pad_refs = list(refs[4 + 2 * L:])

        # Zero the padded-activation scratches (their borders ARE the conv padding).
        for pr in pad_refs:
            pr[...] = jnp.zeros(pr.shape, jnp.float32)

        # Place the NHWC input into the first padded scratch's interior:
        # rows [1, H+1), cols [COL0, COL0+W).
        pad_refs[0][:, 1:H + 1, COL0:COL0 + W, :] = x_ref[...].astype(jnp.float32)

        feats = None
        for l in range(L):
            g = geo[l]
            oh, ow, owp, cin = g["oh"], g["ow"], g["owp"], g["cin"]
            m = N * oh * owp
            pr = pad_refs[l]

            # 16-tap shifted-matmul convolution, accumulated in f32.
            acc = jnp.zeros((m, c_out), jnp.float32)
            for kw in range(KSIZE):
                # Stride-2 column (sublane) selection for this kw tap:
                # slab[n, hh, s, ci] = pad[n, hh, (COL0 - 1) + kw + 2*s, ci]
                slab = pr[:, :, pl.ds(COL0 - 1 + kw, owp, 2), :]
                for kh in range(KSIZE):
                    # Stride-2 row selection via a pure leading-dim reshape
                    # (rows kh, kh+2, ..., kh + 2*(oh-1); no relayout).
                    sel = slab[:, kh:kh + 2 * oh, :, :]
                    sel = sel.reshape(N, oh, 2, owp, cin)[:, :, 0]
                    lhs = sel.reshape(m, cin)
                    acc = acc + jnp.dot(lhs, w_refs[l][kh * KSIZE + kw],
                                        preferred_element_type=jnp.float32)
            acc = acc + b_refs[l][...]

            if l + 1 < L:
                # Keep only the `ow` valid output columns; junk columns must not
                # overwrite the next layer's zero padding.
                out4 = acc.reshape(N, oh, owp, c_out)
                pad_refs[l + 1][:, 1:oh + 1, COL0:COL0 + ow, :] = out4[:, :, 0:ow, :]
            else:
                # Last layer reduces spatial to 1x1: the valid row for batch n
                # is row n*oh*owp of acc.  Gather the N valid rows -> (N, c_out).
                rows = [acc[n * oh * owp:n * oh * owp + 1, :] for n in range(N)]
                feats = rows[0] if N == 1 else jnp.concatenate(rows, axis=0)

        # --- LayerNorm([c_out, 1, 1]) + Flatten epilogue (torch semantics) ---
        mean = jnp.mean(feats, axis=-1, keepdims=True)
        cent = feats - mean
        var = jnp.mean(cent * cent, axis=-1, keepdims=True)   # biased, as torch
        y = cent * lax.rsqrt(var + 1e-5)
        o_ref[...] = (y * g_ref[...] + bt_ref[...]).astype(o_ref.dtype)

    return kernel, geo


def att_fsp_enc_forward(x, conv_params, gamma, beta):
    """x: (N, Cin, H, W); conv_params: [(w (Cout,Cin_l,4,4), b (Cout,))];
    gamma/beta: (Cout, 1, 1).  Returns (N, Cout)."""
    N, c_in, H, W = x.shape
    L = len(conv_params)
    c_out = conv_params[0][0].shape[0]
    if H != (1 << L) or W != (1 << L):
        raise ValueError("LayerNorm([C,1,1]) requires H == W == 2**conv_layers")

    kernel, geo = _make_encoder_kernel(N, H, W, c_in, c_out, L)

    # One NCHW -> NHWC transpose of the (tiny) input; channels stay on the lane
    # axis inside the kernel.
    x_nhwc = jnp.transpose(x, (0, 2, 3, 1))

    ins = [x_nhwc]
    for (w, b) in conv_params:
        cin = w.shape[1]
        # (Cout, Cin, 4, 4) -> (16, Cin, Cout); tap index t = kh*4 + kw.
        ins.append(jnp.transpose(w, (2, 3, 1, 0)).reshape(KSIZE * KSIZE, cin, c_out))
        ins.append(b.reshape(1, c_out))
    ins.append(gamma.reshape(1, c_out))
    ins.append(beta.reshape(1, c_out))

    def full_spec(a):
        nd = a.ndim
        return pl.BlockSpec(a.shape, lambda i, _nd=nd: (0,) * _nd)

    # Per-layer padded-activation scratch: rows [1, h+1) x cols [COL0, COL0+w)
    # hold the layer input, everything else stays zero (conv padding).  Width
    # covers the widest (kw=3) strided tap read; the +4 rows cover the kh=3
    # row-pair selection trick.
    scratch = [
        pltpu.VMEM((N, g["h"] + 4, _round_up(2 * g["owp"] + COL0 + 1, 8), g["cin"]),
                   jnp.float32)
        for g in geo
    ]

    return pl.pallas_call(
        kernel,
        out_shape=jax.ShapeDtypeStruct((N, c_out), x.dtype),
        grid=(1,),
        in_specs=[full_spec(a) for a in ins],
        out_specs=pl.BlockSpec((N, c_out), lambda i: (0, 0)),
        scratch_shapes=scratch,
        compiler_params=pltpu.CompilerParams(
            dimension_semantics=("arbitrary",)),
    )(*ins)


# ------------------------------- reference ---------------------------------- #

def att_fsp_enc_reference(x, conv_params, gamma, beta):
    for w, b in conv_params:
        x = lax.conv_general_dilated(
            x, w, window_strides=(2, 2), padding=((1, 1), (1, 1)),
            dimension_numbers=('NCHW', 'OIHW', 'NCHW'),
        ) + b.reshape(1, -1, 1, 1)
    N = x.shape[0]
    xf = x.reshape(N, -1)                      # (N, C) since spatial is 1x1
    mean = xf.mean(-1, keepdims=True)
    var = ((xf - mean) ** 2).mean(-1, keepdims=True)
    y = (xf - mean) / jnp.sqrt(var + 1e-5)
    return y * gamma.reshape(1, -1) + beta.reshape(1, -1)


# --------------------------------- main ------------------------------------- #

if __name__ == "__main__":
    # Module config: inout = ((channels, dim_w, dim_h), outputs), parameters = conv_layers
    N, C_IN, H, W = 2, 4, 16, 16
    C_OUT = 32
    CONV_LAYERS = 4          # 16 -> 8 -> 4 -> 2 -> 1, so LayerNorm([C_OUT,1,1]) is valid

    key = jax.random.PRNGKey(0)
    x_key, key = jax.random.split(key)
    x = jax.random.normal(x_key, (N, C_IN, H, W), dtype=jnp.float32)

    # Deterministic parameter init (Conv2d-style uniform with bound 1/sqrt(fan_in)).
    conv_params = []
    cin = C_IN
    for _ in range(CONV_LAYERS):
        wk, bk, key = jax.random.split(key, 3)
        fan_in = cin * 4 * 4
        bound = 1.0 / jnp.sqrt(fan_in)
        w = jax.random.uniform(wk, (C_OUT, cin, 4, 4), jnp.float32, -bound, bound)
        b = jax.random.uniform(bk, (C_OUT,), jnp.float32, -bound, bound)
        conv_params.append((w, b))
        cin = C_OUT

    gk, bk2 = jax.random.split(key)
    gamma = jax.random.normal(gk, (C_OUT, 1, 1), dtype=jnp.float32) * 0.1 + 1.0
    beta = jax.random.normal(bk2, (C_OUT, 1, 1), dtype=jnp.float32) * 0.1

    out = jax.block_until_ready(att_fsp_enc_forward(x, conv_params, gamma, beta))
    assert out.shape == (N, C_OUT), out.shape

    ref = jax.block_until_ready(att_fsp_enc_reference(x, conv_params, gamma, beta))
    err = float(jnp.max(jnp.abs(out - ref)))
    assert jnp.allclose(out, ref, atol=1e-4, rtol=1e-4), err

    print("KERNEL_OK")
</pallas_src>

<mosaic_0001>
module attributes {stable_mosaic.version = 11 : i64} {
  func.func @kernel(%arg0: i32, %arg1: memref<2x16x16x4xf32, #tpu.memory_space<vmem>>, %arg2: memref<16x4x32xf32, #tpu.memory_space<vmem>>, %arg3: memref<1x32xf32, #tpu.memory_space<vmem>>, %arg4: memref<16x32x32xf32, #tpu.memory_space<vmem>>, %arg5: memref<1x32xf32, #tpu.memory_space<vmem>>, %arg6: memref<16x32x32xf32, #tpu.memory_space<vmem>>, %arg7: memref<1x32xf32, #tpu.memory_space<vmem>>, %arg8: memref<16x32x32xf32, #tpu.memory_space<vmem>>, %arg9: memref<1x32xf32, #tpu.memory_space<vmem>>, %arg10: memref<1x32xf32, #tpu.memory_space<vmem>>, %arg11: memref<1x32xf32, #tpu.memory_space<vmem>>, %arg12: memref<2x32xf32, #tpu.memory_space<vmem>>, %arg13: memref<2x20x32x4xf32, #tpu.memory_space<vmem>>, %arg14: memref<2x12x32x32xf32, #tpu.memory_space<vmem>>, %arg15: memref<2x8x32x32xf32, #tpu.memory_space<vmem>>, %arg16: memref<2x6x32x32xf32, #tpu.memory_space<vmem>>) attributes {dimension_semantics = [#tpu.dimension_semantics<arbitrary>], iteration_bounds = array<i64: 1>, scalar_prefetch = 0 : i64, scratch_operands = 4 : i64, tpu.core_type = #tpu.core_type<tc>, window_params = [{pipeline_mode = #tpu.pipeline_mode<synchronous>, transform_indices = @transform_0, window_bounds = array<i64: 2, 16, 16, 4>}, {pipeline_mode = #tpu.pipeline_mode<synchronous>, transform_indices = @transform_1, window_bounds = array<i64: 16, 4, 32>}, {pipeline_mode = #tpu.pipeline_mode<synchronous>, transform_indices = @transform_2, window_bounds = array<i64: 1, 32>}, {pipeline_mode = #tpu.pipeline_mode<synchronous>, transform_indices = @transform_3, window_bounds = array<i64: 16, 32, 32>}, {pipeline_mode = #tpu.pipeline_mode<synchronous>, transform_indices = @transform_4, window_bounds = array<i64: 1, 32>}, {pipeline_mode = #tpu.pipeline_mode<synchronous>, transform_indices = @transform_5, window_bounds = array<i64: 16, 32, 32>}, {pipeline_mode = #tpu.pipeline_mode<synchronous>, transform_indices = @transform_6, window_bounds = array<i64: 1, 32>}, {pipeline_mode = #tpu.pipeline_mode<synchronous>, transform_indices = @transform_7, window_bounds = array<i64: 16, 32, 32>}, {pipeline_mode = #tpu.pipeline_mode<synchronous>, transform_indices = @transform_8, window_bounds = array<i64: 1, 32>}, {pipeline_mode = #tpu.pipeline_mode<synchronous>, transform_indices = @transform_9, window_bounds = array<i64: 1, 32>}, {pipeline_mode = #tpu.pipeline_mode<synchronous>, transform_indices = @transform_10, window_bounds = array<i64: 1, 32>}, {pipeline_mode = #tpu.pipeline_mode<synchronous>, transform_indices = @transform_11, window_bounds = array<i64: 2, 32>}]} {
    %cst = arith.constant 0.000000e+00 : f32
    %0 = vector.broadcast %cst : f32 to vector<2x20x32x4xf32>
    %c0 = arith.constant 0 : index
    %c0_0 = arith.constant 0 : index
    %c0_1 = arith.constant 0 : index
    %c0_2 = arith.constant 0 : index
    %1 = vector.load %arg13[%c0, %c0_0, %c0_1, %c0_2] : memref<2x20x32x4xf32, #tpu.memory_space<vmem>>, vector<2x20x32x4xf32>
    tpu.vector_store %arg13[%c0, %c0_0, %c0_1, %c0_2], %0 {strides = array<i32>} : memref<2x20x32x4xf32, #tpu.memory_space<vmem>>, vector<2x20x32x4xf32>,
    %cst_3 = arith.constant 0.000000e+00 : f32
    %2 = vector.broadcast %cst_3 : f32 to vector<2x12x32x32xf32>
    %c0_4 = arith.constant 0 : index
    %c0_5 = arith.constant 0 : index
    %c0_6 = arith.constant 0 : index
    %c0_7 = arith.constant 0 : index
    %3 = vector.load %arg14[%c0_4, %c0_5, %c0_6, %c0_7] : memref<2x12x32x32xf32, #tpu.memory_space<vmem>>, vector<2x12x32x32xf32>
    tpu.vector_store %arg14[%c0_4, %c0_5, %c0_6, %c0_7], %2 {strides = array<i32>} : memref<2x12x32x32xf32, #tpu.memory_space<vmem>>, vector<2x12x32x32xf32>,
    %cst_8 = arith.constant 0.000000e+00 : f32
    %4 = vector.broadcast %cst_8 : f32 to vector<2x8x32x32xf32>
    %c0_9 = arith.constant 0 : index
    %c0_10 = arith.constant 0 : index
    %c0_11 = arith.constant 0 : index
    %c0_12 = arith.constant 0 : index
    %5 = vector.load %arg15[%c0_9, %c0_10, %c0_11, %c0_12] : memref<2x8x32x32xf32, #tpu.memory_space<vmem>>, vector<2x8x32x32xf32>
    tpu.vector_store %arg15[%c0_9, %c0_10, %c0_11, %c0_12], %4 {strides = array<i32>} : memref<2x8x32x32xf32, #tpu.memory_space<vmem>>, vector<2x8x32x32xf32>,
    %cst_13 = arith.constant 0.000000e+00 : f32
    %6 = vector.broadcast %cst_13 : f32 to vector<2x6x32x32xf32>
    %c0_14 = arith.constant 0 : index
    %c0_15 = arith.constant 0 : index
    %c0_16 = arith.constant 0 : index
    %c0_17 = arith.constant 0 : index
    %7 = vector.load %arg16[%c0_14, %c0_15, %c0_16, %c0_17] : memref<2x6x32x32xf32, #tpu.memory_space<vmem>>, vector<2x6x32x32xf32>
    tpu.vector_store %arg16[%c0_14, %c0_15, %c0_16, %c0_17], %6 {strides = array<i32>} : memref<2x6x32x32xf32, #tpu.memory_space<vmem>>, vector<2x6x32x32xf32>,
    %c0_18 = arith.constant 0 : index
    %c0_19 = arith.constant 0 : index
    %c0_20 = arith.constant 0 : index
    %c0_21 = arith.constant 0 : index
    %8 = vector.load %arg1[%c0_18, %c0_19, %c0_20, %c0_21] : memref<2x16x16x4xf32, #tpu.memory_space<vmem>>, vector<2x16x16x4xf32>
    %c0_22 = arith.constant 0 : index
    %c1 = arith.constant 1 : index
    %c8 = arith.constant 8 : index
    %c0_23 = arith.constant 0 : index
    %9 = vector.load %arg13[%c0_22, %c1, %c8, %c0_23] : memref<2x20x32x4xf32, #tpu.memory_space<vmem>>, vector<2x16x16x4xf32>
    tpu.vector_store %arg13[%c0_22, %c1, %c8, %c0_23], %8 {strides = array<i32>} : memref<2x20x32x4xf32, #tpu.memory_space<vmem>>, vector<2x16x16x4xf32>,
    %cst_24 = arith.constant 0.000000e+00 : f32
    %10 = vector.broadcast %cst_24 : f32 to vector<128x32xf32>
    %c0_25 = arith.constant 0 : index
    %c0_26 = arith.constant 0 : index
    %c7 = arith.constant 7 : index
    %c0_27 = arith.constant 0 : index
    %11 = tpu.strided_load %arg13[%c0_25, %c0_26, %c7, %c0_27] {strides = array<i32: 1, 1, 2, 1>} : memref<2x20x32x4xf32, #tpu.memory_space<vmem>>, vector<2x20x8x4xf32>
    %12 = vector.extract_strided_slice %11 {offsets = [0, 0, 0, 0], sizes = [2, 16, 8, 4], strides = [1, 1, 1, 1]} : vector<2x20x8x4xf32> to vector<2x16x8x4xf32>
    %13 = vector.shape_cast %12 : vector<2x16x8x4xf32> to vector<2x8x2x8x4xf32>
    %14 = vector.extract_strided_slice %13 {offsets = [0, 0, 0, 0, 0], sizes = [2, 8, 1, 8, 4], strides = [1, 1, 1, 1, 1]} : vector<2x8x2x8x4xf32> to vector<2x8x1x8x4xf32>
    %15 = vector.shape_cast %14 : vector<2x8x1x8x4xf32> to vector<2x8x8x4xf32>
    %16 = vector.shape_cast %15 : vector<2x8x8x4xf32> to vector<128x4xf32>
    %c0_28 = arith.constant 0 : index
    %c0_29 = arith.constant 0 : index
    %c0_30 = arith.constant 0 : index
    %17 = vector.load %arg2[%c0_28, %c0_29, %c0_30] : memref<16x4x32xf32, #tpu.memory_space<vmem>>, vector<1x4x32xf32>
    %18 = vector.shape_cast %17 : vector<1x4x32xf32> to vector<4x32xf32>
    %cst_31 = arith.constant dense<0.000000e+00> : vector<128x32xf32>
    %19 = tpu.matmul %16, %18, %cst_31 {dimension_numbers = #tpu.dot_dimension_numbers<[1], [0], [0], [1], [0, 0, 1, 1], [], []>} : vector<128x4xf32>, vector<4x32xf32>, vector<128x32xf32> -> vector<128x32xf32>
    %20 = arith.addf %10, %19 : vector<128x32xf32>
    %21 = vector.extract_strided_slice %11 {offsets = [0, 1, 0, 0], sizes = [2, 16, 8, 4], strides = [1, 1, 1, 1]} : vector<2x20x8x4xf32> to vector<2x16x8x4xf32>
    %22 = vector.shape_cast %21 : vector<2x16x8x4xf32> to vector<2x8x2x8x4xf32>
    %23 = vector.extract_strided_slice %22 {offsets = [0, 0, 0, 0, 0], sizes = [2, 8, 1, 8, 4], strides = [1, 1, 1, 1, 1]} : vector<2x8x2x8x4xf32> to vector<2x8x1x8x4xf32>
    %24 = vector.shape_cast %23 : vector<2x8x1x8x4xf32> to vector<2x8x8x4xf32>
    %25 = vector.shape_cast %24 : vector<2x8x8x4xf32> to vector<128x4xf32>
    %c4 = arith.constant 4 : index
    %c0_32 = arith.constant 0 : index
    %c0_33 = arith.constant 0 : index
    %26 = vector.load %arg2[%c4, %c0_32, %c0_33] : memref<16x4x32xf32, #tpu.memory_space<vmem>>, vector<1x4x32xf32>
    %27 = vector.shape_cast %26 : vector<1x4x32xf32> to vector<4x32xf32>
    %cst_34 = arith.constant dense<0.000000e+00> : vector<128x32xf32>
    %28 = tpu.matmul %25, %27, %cst_34 {dimension_numbers = #tpu.dot_dimension_numbers<[1], [0], [0], [1], [0, 0, 1, 1], [], []>} : vector<128x4xf32>, vector<4x32xf32>, vector<128x32xf32> -> vector<128x32xf32>
    %29 = arith.addf %20, %28 : vector<128x32xf32>
    %30 = vector.extract_strided_slice %11 {offsets = [0, 2, 0, 0], sizes = [2, 16, 8, 4], strides = [1, 1, 1, 1]} : vector<2x20x8x4xf32> to vector<2x16x8x4xf32>
    %31 = vector.shape_cast %30 : vector<2x16x8x4xf32> to vector<2x8x2x8x4xf32>
    %32 = vector.extract_strided_slice %31 {offsets = [0, 0, 0, 0, 0], sizes = [2, 8, 1, 8, 4], strides = [1, 1, 1, 1, 1]} : vector<2x8x2x8x4xf32> to vector<2x8x1x8x4xf32>
    %33 = vector.shape_cast %32 : vector<2x8x1x8x4xf32> to vector<2x8x8x4xf32>
    %34 = vector.shape_cast %33 : vector<2x8x8x4xf32> to vector<128x4xf32>
    %c8_35 = arith.constant 8 : index
    %c0_36 = arith.constant 0 : index
    %c0_37 = arith.constant 0 : index
    %35 = vector.load %arg2[%c8_35, %c0_36, %c0_37] : memref<16x4x32xf32, #tpu.memory_space<vmem>>, vector<1x4x32xf32>
    %36 = vector.shape_cast %35 : vector<1x4x32xf32> to vector<4x32xf32>
    %cst_38 = arith.constant dense<0.000000e+00> : vector<128x32xf32>
    %37 = tpu.matmul %34, %36, %cst_38 {dimension_numbers = #tpu.dot_dimension_numbers<[1], [0], [0], [1], [0, 0, 1, 1], [], []>} : vector<128x4xf32>, vector<4x32xf32>, vector<128x32xf32> -> vector<128x32xf32>
    %38 = arith.addf %29, %37 : vector<128x32xf32>
    %39 = vector.extract_strided_slice %11 {offsets = [0, 3, 0, 0], sizes = [2, 16, 8, 4], strides = [1, 1, 1, 1]} : vector<2x20x8x4xf32> to vector<2x16x8x4xf32>
    %40 = vector.shape_cast %39 : vector<2x16x8x4xf32> to vector<2x8x2x8x4xf32>
    %41 = vector.extract_strided_slice %40 {offsets = [0, 0, 0, 0, 0], sizes = [2, 8, 1, 8, 4], strides = [1, 1, 1, 1, 1]} : vector<2x8x2x8x4xf32> to vector<2x8x1x8x4xf32>
    %42 = vector.shape_cast %41 : vector<2x8x1x8x4xf32> to vector<2x8x8x4xf32>
    %43 = vector.shape_cast %42 : vector<2x8x8x4xf32> to vector<128x4xf32>
    %c12 = arith.constant 12 : index
    %c0_39 = arith.constant 0 : index
    %c0_40 = arith.constant 0 : index
    %44 = vector.load %arg2[%c12, %c0_39, %c0_40] : memref<16x4x32xf32, #tpu.memory_space<vmem>>, vector<1x4x32xf32>
    %45 = vector.shape_cast %44 : vector<1x4x32xf32> to vector<4x32xf32>
    %cst_41 = arith.constant dense<0.000000e+00> : vector<128x32xf32>
    %46 = tpu.matmul %43, %45, %cst_41 {dimension_numbers = #tpu.dot_dimension_numbers<[1], [0], [0], [1], [0, 0, 1, 1], [], []>} : vector<128x4xf32>, vector<4x32xf32>, vector<128x32xf32> -> vector<128x32xf32>
    %47 = arith.addf %38, %46 : vector<128x32xf32>
    %c0_42 = arith.constant 0 : index
    %c0_43 = arith.constant 0 : index
    %c8_44 = arith.constant 8 : index
    %c0_45 = arith.constant 0 : index
    %48 = tpu.strided_load %arg13[%c0_42, %c0_43, %c8_44, %c0_45] {strides = array<i32: 1, 1, 2, 1>} : memref<2x20x32x4xf32, #tpu.memory_space<vmem>>, vector<2x20x8x4xf32>
    %49 = vector.extract_strided_slice %48 {offsets = [0, 0, 0, 0], sizes = [2, 16, 8, 4], strides = [1, 1, 1, 1]} : vector<2x20x8x4xf32> to vector<2x16x8x4xf32>
    %50 = vector.shape_cast %49 : vector<2x16x8x4xf32> to vector<2x8x2x8x4xf32>
    %51 = vector.extract_strided_slice %50 {offsets = [0, 0, 0, 0, 0], sizes = [2, 8, 1, 8, 4], strides = [1, 1, 1, 1, 1]} : vector<2x8x2x8x4xf32> to vector<2x8x1x8x4xf32>
    %52 = vector.shape_cast %51 : vector<2x8x1x8x4xf32> to vector<2x8x8x4xf32>
    %53 = vector.shape_cast %52 : vector<2x8x8x4xf32> to vector<128x4xf32>
    %c1_46 = arith.constant 1 : index
    %c0_47 = arith.constant 0 : index
    %c0_48 = arith.constant 0 : index
    %54 = vector.load %arg2[%c1_46, %c0_47, %c0_48] : memref<16x4x32xf32, #tpu.memory_space<vmem>>, vector<1x4x32xf32>
    %55 = vector.shape_cast %54 : vector<1x4x32xf32> to vector<4x32xf32>
    %cst_49 = arith.constant dense<0.000000e+00> : vector<128x32xf32>
    %56 = tpu.matmul %53, %55, %cst_49 {dimension_numbers = #tpu.dot_dimension_numbers<[1], [0], [0], [1], [0, 0, 1, 1], [], []>} : vector<128x4xf32>, vector<4x32xf32>, vector<128x32xf32> -> vector<128x32xf32>
    %57 = arith.addf %47, %56 : vector<128x32xf32>
    %58 = vector.extract_strided_slice %48 {offsets = [0, 1, 0, 0], sizes = [2, 16, 8, 4], strides = [1, 1, 1, 1]} : vector<2x20x8x4xf32> to vector<2x16x8x4xf32>
    %59 = vector.shape_cast %58 : vector<2x16x8x4xf32> to vector<2x8x2x8x4xf32>
    %60 = vector.extract_strided_slice %59 {offsets = [0, 0, 0, 0, 0], sizes = [2, 8, 1, 8, 4], strides = [1, 1, 1, 1, 1]} : vector<2x8x2x8x4xf32> to vector<2x8x1x8x4xf32>
    %61 = vector.shape_cast %60 : vector<2x8x1x8x4xf32> to vector<2x8x8x4xf32>
    %62 = vector.shape_cast %61 : vector<2x8x8x4xf32> to vector<128x4xf32>
    %c5 = arith.constant 5 : index
    %c0_50 = arith.constant 0 : index
    %c0_51 = arith.constant 0 : index
    %63 = vector.load %arg2[%c5, %c0_50, %c0_51] : memref<16x4x32xf32, #tpu.memory_space<vmem>>, vector<1x4x32xf32>
    %64 = vector.shape_cast %63 : vector<1x4x32xf32> to vector<4x32xf32>
    %cst_52 = arith.constant dense<0.000000e+00> : vector<128x32xf32>
    %65 = tpu.matmul %62, %64, %cst_52 {dimension_numbers = #tpu.dot_dimension_numbers<[1], [0], [0], [1], [0, 0, 1, 1], [], []>} : vector<128x4xf32>, vector<4x32xf32>, vector<128x32xf32> -> vector<128x32xf32>
    %66 = arith.addf %57, %65 : vector<128x32xf32>
    %67 = vector.extract_strided_slice %48 {offsets = [0, 2, 0, 0], sizes = [2, 16, 8, 4], strides = [1, 1, 1, 1]} : vector<2x20x8x4xf32> to vector<2x16x8x4xf32>
    %68 = vector.shape_cast %67 : vector<2x16x8x4xf32> to vector<2x8x2x8x4xf32>
    %69 = vector.extract_strided_slice %68 {offsets = [0, 0, 0, 0, 0], sizes = [2, 8, 1, 8, 4], strides = [1, 1, 1, 1, 1]} : vector<2x8x2x8x4xf32> to vector<2x8x1x8x4xf32>
    %70 = vector.shape_cast %69 : vector<2x8x1x8x4xf32> to vector<2x8x8x4xf32>
    %71 = vector.shape_cast %70 : vector<2x8x8x4xf32> to vector<128x4xf32>
    %c9 = arith.constant 9 : index
    %c0_53 = arith.constant 0 : index
    %c0_54 = arith.constant 0 : index
    %72 = vector.load %arg2[%c9, %c0_53, %c0_54] : memref<16x4x32xf32, #tpu.memory_space<vmem>>, vector<1x4x32xf32>
    %73 = vector.shape_cast %72 : vector<1x4x32xf32> to vector<4x32xf32>
    %cst_55 = arith.constant dense<0.000000e+00> : vector<128x32xf32>
    %74 = tpu.matmul %71, %73, %cst_55 {dimension_numbers = #tpu.dot_dimension_numbers<[1], [0], [0], [1], [0, 0, 1, 1], [], []>} : vector<128x4xf32>, vector<4x32xf32>, vector<128x32xf32> -> vector<128x32xf32>
    %75 = arith.addf %66, %74 : vector<128x32xf32>
    %76 = vector.extract_strided_slice %48 {offsets = [0, 3, 0, 0], sizes = [2, 16, 8, 4], strides = [1, 1, 1, 1]} : vector<2x20x8x4xf32> to vector<2x16x8x4xf32>
    %77 = vector.shape_cast %76 : vector<2x16x8x4xf32> to vector<2x8x2x8x4xf32>
    %78 = vector.extract_strided_slice %77 {offsets = [0, 0, 0, 0, 0], sizes = [2, 8, 1, 8, 4], strides = [1, 1, 1, 1, 1]} : vector<2x8x2x8x4xf32> to vector<2x8x1x8x4xf32>
    %79 = vector.shape_cast %78 : vector<2x8x1x8x4xf32> to vector<2x8x8x4xf32>
    %80 = vector.shape_cast %79 : vector<2x8x8x4xf32> to vector<128x4xf32>
    %c13 = arith.constant 13 : index
    %c0_56 = arith.constant 0 : index
    %c0_57 = arith.constant 0 : index
    %81 = vector.load %arg2[%c13, %c0_56, %c0_57] : memref<16x4x32xf32, #tpu.memory_space<vmem>>, vector<1x4x32xf32>
    %82 = vector.shape_cast %81 : vector<1x4x32xf32> to vector<4x32xf32>
    %cst_58 = arith.constant dense<0.000000e+00> : vector<128x32xf32>
    %83 = tpu.matmul %80, %82, %cst_58 {dimension_numbers = #tpu.dot_dimension_numbers<[1], [0], [0], [1], [0, 0, 1, 1], [], []>} : vector<128x4xf32>, vector<4x32xf32>, vector<128x32xf32> -> vector<128x32xf32>
    %84 = arith.addf %75, %83 : vector<128x32xf32>
    %c0_59 = arith.constant 0 : index
    %c0_60 = arith.constant 0 : index
    %c9_61 = arith.constant 9 : index
    %c0_62 = arith.constant 0 : index
    %85 = tpu.strided_load %arg13[%c0_59, %c0_60, %c9_61, %c0_62] {strides = array<i32: 1, 1, 2, 1>} : memref<2x20x32x4xf32, #tpu.memory_space<vmem>>, vector<2x20x8x4xf32>
    %86 = vector.extract_strided_slice %85 {offsets = [0, 0, 0, 0], sizes = [2, 16, 8, 4], strides = [1, 1, 1, 1]} : vector<2x20x8x4xf32> to vector<2x16x8x4xf32>
    %87 = vector.shape_cast %86 : vector<2x16x8x4xf32> to vector<2x8x2x8x4xf32>
    %88 = vector.extract_strided_slice %87 {offsets = [0, 0, 0, 0, 0], sizes = [2, 8, 1, 8, 4], strides = [1, 1, 1, 1, 1]} : vector<2x8x2x8x4xf32> to vector<2x8x1x8x4xf32>
    %89 = vector.shape_cast %88 : vector<2x8x1x8x4xf32> to vector<2x8x8x4xf32>
    %90 = vector.shape_cast %89 : vector<2x8x8x4xf32> to vector<128x4xf32>
    %c2 = arith.constant 2 : index
    %c0_63 = arith.constant 0 : index
    %c0_64 = arith.constant 0 : index
    %91 = vector.load %arg2[%c2, %c0_63, %c0_64] : memref<16x4x32xf32, #tpu.memory_space<vmem>>, vector<1x4x32xf32>
    %92 = vector.shape_cast %91 : vector<1x4x32xf32> to vector<4x32xf32>
    %cst_65 = arith.constant dense<0.000000e+00> : vector<128x32xf32>
    %93 = tpu.matmul %90, %92, %cst_65 {dimension_numbers = #tpu.dot_dimension_numbers<[1], [0], [0], [1], [0, 0, 1, 1], [], []>} : vector<128x4xf32>, vector<4x32xf32>, vector<128x32xf32> -> vector<128x32xf32>
    %94 = arith.addf %84, %93 : vector<128x32xf32>
    %95 = vector.extract_strided_slice %85 {offsets = [0, 1, 0, 0], sizes = [2, 16, 8, 4], strides = [1, 1, 1, 1]} : vector<2x20x8x4xf32> to vector<2x16x8x4xf32>
    %96 = vector.shape_cast %95 : vector<2x16x8x4xf32> to vector<2x8x2x8x4xf32>
    %97 = vector.extract_strided_slice %96 {offsets = [0, 0, 0, 0, 0], sizes = [2, 8, 1, 8, 4], strides = [1, 1, 1, 1, 1]} : vector<2x8x2x8x4xf32> to vector<2x8x1x8x4xf32>
    %98 = vector.shape_cast %97 : vector<2x8x1x8x4xf32> to vector<2x8x8x4xf32>
    %99 = vector.shape_cast %98 : vector<2x8x8x4xf32> to vector<128x4xf32>
    %c6 = arith.constant 6 : index
    %c0_66 = arith.constant 0 : index
    %c0_67 = arith.constant 0 : index
    %100 = vector.load %arg2[%c6, %c0_66, %c0_67] : memref<16x4x32xf32, #tpu.memory_space<vmem>>, vector<1x4x32xf32>
    %101 = vector.shape_cast %100 : vector<1x4x32xf32> to vector<4x32xf32>
    %cst_68 = arith.constant dense<0.000000e+00> : vector<128x32xf32>
    %102 = tpu.matmul %99, %101, %cst_68 {dimension_numbers = #tpu.dot_dimension_numbers<[1], [0], [0], [1], [0, 0, 1, 1], [], []>} : vector<128x4xf32>, vector<4x32xf32>, vector<128x32xf32> -> vector<128x32xf32>
    %103 = arith.addf %94, %102 : vector<128x32xf32>
    %104 = vector.extract_strided_slice %85 {offsets = [0, 2, 0, 0], sizes = [2, 16, 8, 4], strides = [1, 1, 1, 1]} : vector<2x20x8x4xf32> to vector<2x16x8x4xf32>
    %105 = vector.shape_cast %104 : vector<2x16x8x4xf32> to vector<2x8x2x8x4xf32>
    %106 = vector.extract_strided_slice %105 {offsets = [0, 0, 0, 0, 0], sizes = [2, 8, 1, 8, 4], strides = [1, 1, 1, 1, 1]} : vector<2x8x2x8x4xf32> to vector<2x8x1x8x4xf32>
    %107 = vector.shape_cast %106 : vector<2x8x1x8x4xf32> to vector<2x8x8x4xf32>
    %108 = vector.shape_cast %107 : vector<2x8x8x4xf32> to vector<128x4xf32>
    %c10 = arith.constant 10 : index
    %c0_69 = arith.constant 0 : index
    %c0_70 = arith.constant 0 : index
    %109 = vector.load %arg2[%c10, %c0_69, %c0_70] : memref<16x4x32xf32, #tpu.memory_space<vmem>>, vector<1x4x32xf32>
    %110 = vector.shape_cast %109 : vector<1x4x32xf32> to vector<4x32xf32>
    %cst_71 = arith.constant dense<0.000000e+00> : vector<128x32xf32>
    %111 = tpu.matmul %108, %110, %cst_71 {dimension_numbers = #tpu.dot_dimension_numbers<[1], [0], [0], [1], [0, 0, 1, 1], [], []>} : vector<128x4xf32>, vector<4x32xf32>, vector<128x32xf32> -> vector<128x32xf32>
    %112 = arith.addf %103, %111 : vector<128x32xf32>
    %113 = vector.extract_strided_slice %85 {offsets = [0, 3, 0, 0], sizes = [2, 16, 8, 4], strides = [1, 1, 1, 1]} : vector<2x20x8x4xf32> to vector<2x16x8x4xf32>
    %114 = vector.shape_cast %113 : vector<2x16x8x4xf32> to vector<2x8x2x8x4xf32>
    %115 = vector.extract_strided_slice %114 {offsets = [0, 0, 0, 0, 0], sizes = [2, 8, 1, 8, 4], strides = [1, 1, 1, 1, 1]} : vector<2x8x2x8x4xf32> to vector<2x8x1x8x4xf32>
    %116 = vector.shape_cast %115 : vector<2x8x1x8x4xf32> to vector<2x8x8x4xf32>
    %117 = vector.shape_cast %116 : vector<2x8x8x4xf32> to vector<128x4xf32>
    %c14 = arith.constant 14 : index
    %c0_72 = arith.constant 0 : index
    %c0_73 = arith.constant 0 : index
    %118 = vector.load %arg2[%c14, %c0_72, %c0_73] : memref<16x4x32xf32, #tpu.memory_space<vmem>>, vector<1x4x32xf32>
    %119 = vector.shape_cast %118 : vector<1x4x32xf32> to vector<4x32xf32>
    %cst_74 = arith.constant dense<0.000000e+00> : vector<128x32xf32>
    %120 = tpu.matmul %117, %119, %cst_74 {dimension_numbers = #tpu.dot_dimension_numbers<[1], [0], [0], [1], [0, 0, 1, 1], [], []>} : vector<128x4xf32>, vector<4x32xf32>, vector<128x32xf32> -> vector<128x32xf32>
    %121 = arith.addf %112, %120 : vector<128x32xf32>
    %c0_75 = arith.constant 0 : index
    %c0_76 = arith.constant 0 : index
    %c10_77 = arith.constant 10 : index
    %c0_78 = arith.constant 0 : index
    %122 = tpu.strided_load %arg13[%c0_75, %c0_76, %c10_77, %c0_78] {strides = array<i32: 1, 1, 2, 1>} : memref<2x20x32x4xf32, #tpu.memory_space<vmem>>, vector<2x20x8x4xf32>
    %123 = vector.extract_strided_slice %122 {offsets = [0, 0, 0, 0], sizes = [2, 16, 8, 4], strides = [1, 1, 1, 1]} : vector<2x20x8x4xf32> to vector<2x16x8x4xf32>
    %124 = vector.shape_cast %123 : vector<2x16x8x4xf32> to vector<2x8x2x8x4xf32>
    %125 = vector.extract_strided_slice %124 {offsets = [0, 0, 0, 0, 0], sizes = [2, 8, 1, 8, 4], strides = [1, 1, 1, 1, 1]} : vector<2x8x2x8x4xf32> to vector<2x8x1x8x4xf32>
    %126 = vector.shape_cast %125 : vector<2x8x1x8x4xf32> to vector<2x8x8x4xf32>
    %127 = vector.shape_cast %126 : vector<2x8x8x4xf32> to vector<128x4xf32>
    %c3 = arith.constant 3 : index
    %c0_79 = arith.constant 0 : index
    %c0_80 = arith.constant 0 : index
    %128 = vector.load %arg2[%c3, %c0_79, %c0_80] : memref<16x4x32xf32, #tpu.memory_space<vmem>>, vector<1x4x32xf32>
    %129 = vector.shape_cast %128 : vector<1x4x32xf32> to vector<4x32xf32>
    %cst_81 = arith.constant dense<0.000000e+00> : vector<128x32xf32>
    %130 = tpu.matmul %127, %129, %cst_81 {dimension_numbers = #tpu.dot_dimension_numbers<[1], [0], [0], [1], [0, 0, 1, 1], [], []>} : vector<128x4xf32>, vector<4x32xf32>, vector<128x32xf32> -> vector<128x32xf32>
    %131 = arith.addf %121, %130 : vector<128x32xf32>
    %132 = vector.extract_strided_slice %122 {offsets = [0, 1, 0, 0], sizes = [2, 16, 8, 4], strides = [1, 1, 1, 1]} : vector<2x20x8x4xf32> to vector<2x16x8x4xf32>
    %133 = vector.shape_cast %132 : vector<2x16x8x4xf32> to vector<2x8x2x8x4xf32>
    %134 = vector.extract_strided_slice %133 {offsets = [0, 0, 0, 0, 0], sizes = [2, 8, 1, 8, 4], strides = [1, 1, 1, 1, 1]} : vector<2x8x2x8x4xf32> to vector<2x8x1x8x4xf32>
    %135 = vector.shape_cast %134 : vector<2x8x1x8x4xf32> to vector<2x8x8x4xf32>
    %136 = vector.shape_cast %135 : vector<2x8x8x4xf32> to vector<128x4xf32>
    %c7_82 = arith.constant 7 : index
    %c0_83 = arith.constant 0 : index
    %c0_84 = arith.constant 0 : index
    %137 = vector.load %arg2[%c7_82, %c0_83, %c0_84] : memref<16x4x32xf32, #tpu.memory_space<vmem>>, vector<1x4x32xf32>
    %138 = vector.shape_cast %137 : vector<1x4x32xf32> to vector<4x32xf32>
    %cst_85 = arith.constant dense<0.000000e+00> : vector<128x32xf32>
    %139 = tpu.matmul %136, %138, %cst_85 {dimension_numbers = #tpu.dot_dimension_numbers<[1], [0], [0], [1], [0, 0, 1, 1], [], []>} : vector<128x4xf32>, vector<4x32xf32>, vector<128x32xf32> -> vector<128x32xf32>
    %140 = arith.addf %131, %139 : vector<128x32xf32>
    %141 = vector.extract_strided_slice %122 {offsets = [0, 2, 0, 0], sizes = [2, 16, 8, 4], strides = [1, 1, 1, 1]} : vector<2x20x8x4xf32> to vector<2x16x8x4xf32>
    %142 = vector.shape_cast %141 : vector<2x16x8x4xf32> to vector<2x8x2x8x4xf32>
    %143 = vector.extract_strided_slice %142 {offsets = [0, 0, 0, 0, 0], sizes = [2, 8, 1, 8, 4], strides = [1, 1, 1, 1, 1]} : vector<2x8x2x8x4xf32> to vector<2x8x1x8x4xf32>
    %144 = vector.shape_cast %143 : vector<2x8x1x8x4xf32> to vector<2x8x8x4xf32>
    %145 = vector.shape_cast %144 : vector<2x8x8x4xf32> to vector<128x4xf32>
    %c11 = arith.constant 11 : index
    %c0_86 = arith.constant 0 : index
    %c0_87 = arith.constant 0 : index
    %146 = vector.load %arg2[%c11, %c0_86, %c0_87] : memref<16x4x32xf32, #tpu.memory_space<vmem>>, vector<1x4x32xf32>
    %147 = vector.shape_cast %146 : vector<1x4x32xf32> to vector<4x32xf32>
    %cst_88 = arith.constant dense<0.000000e+00> : vector<128x32xf32>
    %148 = tpu.matmul %145, %147, %cst_88 {dimension_numbers = #tpu.dot_dimension_numbers<[1], [0], [0], [1], [0, 0, 1, 1], [], []>} : vector<128x4xf32>, vector<4x32xf32>, vector<128x32xf32> -> vector<128x32xf32>
    %149 = arith.addf %140, %148 : vector<128x32xf32>
    %150 = vector.extract_strided_slice %122 {offsets = [0, 3, 0, 0], sizes = [2, 16, 8, 4], strides = [1, 1, 1, 1]} : vector<2x20x8x4xf32> to vector<2x16x8x4xf32>
    %151 = vector.shape_cast %150 : vector<2x16x8x4xf32> to vector<2x8x2x8x4xf32>
    %152 = vector.extract_strided_slice %151 {offsets = [0, 0, 0, 0, 0], sizes = [2, 8, 1, 8, 4], strides = [1, 1, 1, 1, 1]} : vector<2x8x2x8x4xf32> to vector<2x8x1x8x4xf32>
    %153 = vector.shape_cast %152 : vector<2x8x1x8x4xf32> to vector<2x8x8x4xf32>
    %154 = vector.shape_cast %153 : vector<2x8x8x4xf32> to vector<128x4xf32>
    %c15 = arith.constant 15 : index
    %c0_89 = arith.constant 0 : index
    %c0_90 = arith.constant 0 : index
    %155 = vector.load %arg2[%c15, %c0_89, %c0_90] : memref<16x4x32xf32, #tpu.memory_space<vmem>>, vector<1x4x32xf32>
    %156 = vector.shape_cast %155 : vector<1x4x32xf32> to vector<4x32xf32>
    %cst_91 = arith.constant dense<0.000000e+00> : vector<128x32xf32>
    %157 = tpu.matmul %154, %156, %cst_91 {dimension_numbers = #tpu.dot_dimension_numbers<[1], [0], [0], [1], [0, 0, 1, 1], [], []>} : vector<128x4xf32>, vector<4x32xf32>, vector<128x32xf32> -> vector<128x32xf32>
    %158 = arith.addf %149, %157 : vector<128x32xf32>
    %c0_92 = arith.constant 0 : index
    %c0_93 = arith.constant 0 : index
    %159 = vector.load %arg3[%c0_92, %c0_93] : memref<1x32xf32, #tpu.memory_space<vmem>>, vector<1x32xf32>
    %160 = vector.broadcast %159 : vector<1x32xf32> to vector<128x32xf32>
    %161 = arith.addf %158, %160 : vector<128x32xf32>
    %162 = vector.shape_cast %161 : vector<128x32xf32> to vector<2x8x8x32xf32>
    %c0_94 = arith.constant 0 : index
    %c1_95 = arith.constant 1 : index
    %c8_96 = arith.constant 8 : index
    %c0_97 = arith.constant 0 : index
    %163 = vector.load %arg14[%c0_94, %c1_95, %c8_96, %c0_97] : memref<2x12x32x32xf32, #tpu.memory_space<vmem>>, vector<2x8x8x32xf32>
    tpu.vector_store %arg14[%c0_94, %c1_95, %c8_96, %c0_97], %162 {strides = array<i32>} : memref<2x12x32x32xf32, #tpu.memory_space<vmem>>, vector<2x8x8x32xf32>,
    %cst_98 = arith.constant 0.000000e+00 : f32
    %164 = vector.broadcast %cst_98 : f32 to vector<64x32xf32>
    %c0_99 = arith.constant 0 : index
    %c0_100 = arith.constant 0 : index
    %c7_101 = arith.constant 7 : index
    %c0_102 = arith.constant 0 : index
    %165 = tpu.strided_load %arg14[%c0_99, %c0_100, %c7_101, %c0_102] {strides = array<i32: 1, 1, 2, 1>} : memref<2x12x32x32xf32, #tpu.memory_space<vmem>>, vector<2x12x8x32xf32>
    %166 = vector.extract_strided_slice %165 {offsets = [0, 0, 0, 0], sizes = [2, 8, 8, 32], strides = [1, 1, 1, 1]} : vector<2x12x8x32xf32> to vector<2x8x8x32xf32>
    %167 = vector.shape_cast %166 : vector<2x8x8x32xf32> to vector<2x4x2x8x32xf32>
    %168 = vector.extract_strided_slice %167 {offsets = [0, 0, 0, 0, 0], sizes = [2, 4, 1, 8, 32], strides = [1, 1, 1, 1, 1]} : vector<2x4x2x8x32xf32> to vector<2x4x1x8x32xf32>
    %169 = vector.shape_cast %168 : vector<2x4x1x8x32xf32> to vector<2x4x8x32xf32>
    %170 = vector.shape_cast %169 : vector<2x4x8x32xf32> to vector<64x32xf32>
    %c0_103 = arith.constant 0 : index
    %c0_104 = arith.constant 0 : index
    %c0_105 = arith.constant 0 : index
    %171 = vector.load %arg4[%c0_103, %c0_104, %c0_105] : memref<16x32x32xf32, #tpu.memory_space<vmem>>, vector<1x32x32xf32>
    %172 = vector.shape_cast %171 : vector<1x32x32xf32> to vector<32x32xf32>
    %cst_106 = arith.constant dense<0.000000e+00> : vector<64x32xf32>
    %173 = tpu.matmul %170, %172, %cst_106 {dimension_numbers = #tpu.dot_dimension_numbers<[1], [0], [0], [1], [0, 0, 1, 1], [], []>} : vector<64x32xf32>, vector<32x32xf32>, vector<64x32xf32> -> vector<64x32xf32>
    %174 = arith.addf %164, %173 : vector<64x32xf32>
    %175 = vector.extract_strided_slice %165 {offsets = [0, 1, 0, 0], sizes = [2, 8, 8, 32], strides = [1, 1, 1, 1]} : vector<2x12x8x32xf32> to vector<2x8x8x32xf32>
    %176 = vector.shape_cast %175 : vector<2x8x8x32xf32> to vector<2x4x2x8x32xf32>
    %177 = vector.extract_strided_slice %176 {offsets = [0, 0, 0, 0, 0], sizes = [2, 4, 1, 8, 32], strides = [1, 1, 1, 1, 1]} : vector<2x4x2x8x32xf32> to vector<2x4x1x8x32xf32>
    %178 = vector.shape_cast %177 : vector<2x4x1x8x32xf32> to vector<2x4x8x32xf32>
    %179 = vector.shape_cast %178 : vector<2x4x8x32xf32> to vector<64x32xf32>
    %c4_107 = arith.constant 4 : index
    %c0_108 = arith.constant 0 : index
    %c0_109 = arith.constant 0 : index
    %180 = vector.load %arg4[%c4_107, %c0_108, %c0_109] : memref<16x32x32xf32, #tpu.memory_space<vmem>>, vector<1x32x32xf32>
    %181 = vector.shape_cast %180 : vector<1x32x32xf32> to vector<32x32xf32>
    %cst_110 = arith.constant dense<0.000000e+00> : vector<64x32xf32>
    %182 = tpu.matmul %179, %181, %cst_110 {dimension_numbers = #tpu.dot_dimension_numbers<[1], [0], [0], [1], [0, 0, 1, 1], [], []>} : vector<64x32xf32>, vector<32x32xf32>, vector<64x32xf32> -> vector<64x32xf32>
    %183 = arith.addf %174, %182 : vector<64x32xf32>
    %184 = vector.extract_strided_slice %165 {offsets = [0, 2, 0, 0], sizes = [2, 8, 8, 32], strides = [1, 1, 1, 1]} : vector<2x12x8x32xf32> to vector<2x8x8x32xf32>
    %185 = vector.shape_cast %184 : vector<2x8x8x32xf32> to vector<2x4x2x8x32xf32>
    %186 = vector.extract_strided_slice %185 {offsets = [0, 0, 0, 0, 0], sizes = [2, 4, 1, 8, 32], strides = [1, 1, 1, 1, 1]} : vector<2x4x2x8x32xf32> to vector<2x4x1x8x32xf32>
    %187 = vector.shape_cast %186 : vector<2x4x1x8x32xf32> to vector<2x4x8x32xf32>
    %188 = vector.shape_cast %187 : vector<2x4x8x32xf32> to vector<64x32xf32>
    %c8_111 = arith.constant 8 : index
    %c0_112 = arith.constant 0 : index
    %c0_113 = arith.constant 0 : index
    %189 = vector.load %arg4[%c8_111, %c0_112, %c0_113] : memref<16x32x32xf32, #tpu.memory_space<vmem>>, vector<1x32x32xf32>
    %190 = vector.shape_cast %189 : vector<1x32x32xf32> to vector<32x32xf32>
    %cst_114 = arith.constant dense<0.000000e+00> : vector<64x32xf32>
    %191 = tpu.matmul %188, %190, %cst_114 {dimension_numbers = #tpu.dot_dimension_numbers<[1], [0], [0], [1], [0, 0, 1, 1], [], []>} : vector<64x32xf32>, vector<32x32xf32>, vector<64x32xf32> -> vector<64x32xf32>
    %192 = arith.addf %183, %191 : vector<64x32xf32>
    %193 = vector.extract_strided_slice %165 {offsets = [0, 3, 0, 0], sizes = [2, 8, 8, 32], strides = [1, 1, 1, 1]} : vector<2x12x8x32xf32> to vector<2x8x8x32xf32>
    %194 = vector.shape_cast %193 : vector<2x8x8x32xf32> to vector<2x4x2x8x32xf32>
    %195 = vector.extract_strided_slice %194 {offsets = [0, 0, 0, 0, 0], sizes = [2, 4, 1, 8, 32], strides = [1, 1, 1, 1, 1]} : vector<2x4x2x8x32xf32> to vector<2x4x1x8x32xf32>
    %196 = vector.shape_cast %195 : vector<2x4x1x8x32xf32> to vector<2x4x8x32xf32>
    %197 = vector.shape_cast %196 : vector<2x4x8x32xf32> to vector<64x32xf32>
    %c12_115 = arith.constant 12 : index
    %c0_116 = arith.constant 0 : index
    %c0_117 = arith.constant 0 : index
    %198 = vector.load %arg4[%c12_115, %c0_116, %c0_117] : memref<16x32x32xf32, #tpu.memory_space<vmem>>, vector<1x32x32xf32>
    %199 = vector.shape_cast %198 : vector<1x32x32xf32> to vector<32x32xf32>
    %cst_118 = arith.constant dense<0.000000e+00> : vector<64x32xf32>
    %200 = tpu.matmul %197, %199, %cst_118 {dimension_numbers = #tpu.dot_dimension_numbers<[1], [0], [0], [1], [0, 0, 1, 1], [], []>} : vector<64x32xf32>, vector<32x32xf32>, vector<64x32xf32> -> vector<64x32xf32>
    %201 = arith.addf %192, %200 : vector<64x32xf32>
    %c0_119 = arith.constant 0 : index
    %c0_120 = arith.constant 0 : index
    %c8_121 = arith.constant 8 : index
    %c0_122 = arith.constant 0 : index
    %202 = tpu.strided_load %arg14[%c0_119, %c0_120, %c8_121, %c0_122] {strides = array<i32: 1, 1, 2, 1>} : memref<2x12x32x32xf32, #tpu.memory_space<vmem>>, vector<2x12x8x32xf32>
    %203 = vector.extract_strided_slice %202 {offsets = [0, 0, 0, 0], sizes = [2, 8, 8, 32], strides = [1, 1, 1, 1]} : vector<2x12x8x32xf32> to vector<2x8x8x32xf32>
    %204 = vector.shape_cast %203 : vector<2x8x8x32xf32> to vector<2x4x2x8x32xf32>
    %205 = vector.extract_strided_slice %204 {offsets = [0, 0, 0, 0, 0], sizes = [2, 4, 1, 8, 32], strides = [1, 1, 1, 1, 1]} : vector<2x4x2x8x32xf32> to vector<2x4x1x8x32xf32>
    %206 = vector.shape_cast %205 : vector<2x4x1x8x32xf32> to vector<2x4x8x32xf32>
    %207 = vector.shape_cast %206 : vector<2x4x8x32xf32> to vector<64x32xf32>
    %c1_123 = arith.constant 1 : index
    %c0_124 = arith.constant 0 : index
    %c0_125 = arith.constant 0 : index
    %208 = vector.load %arg4[%c1_123, %c0_124, %c0_125] : memref<16x32x32xf32, #tpu.memory_space<vmem>>, vector<1x32x32xf32>
    %209 = vector.shape_cast %208 : vector<1x32x32xf32> to vector<32x32xf32>
    %cst_126 = arith.constant dense<0.000000e+00> : vector<64x32xf32>
    %210 = tpu.matmul %207, %209, %cst_126 {dimension_numbers = #tpu.dot_dimension_numbers<[1], [0], [0], [1], [0, 0, 1, 1], [], []>} : vector<64x32xf32>, vector<32x32xf32>, vector<64x32xf32> -> vector<64x32xf32>
    %211 = arith.addf %201, %210 : vector<64x32xf32>
    %212 = vector.extract_strided_slice %202 {offsets = [0, 1, 0, 0], sizes = [2, 8, 8, 32], strides = [1, 1, 1, 1]} : vector<2x12x8x32xf32> to vector<2x8x8x32xf32>
    %213 = vector.shape_cast %212 : vector<2x8x8x32xf32> to vector<2x4x2x8x32xf32>
    %214 = vector.extract_strided_slice %213 {offsets = [0, 0, 0, 0, 0], sizes = [2, 4, 1, 8, 32], strides = [1, 1, 1, 1, 1]} : vector<2x4x2x8x32xf32> to vector<2x4x1x8x32xf32>
    %215 = vector.shape_cast %214 : vector<2x4x1x8x32xf32> to vector<2x4x8x32xf32>
    %216 = vector.shape_cast %215 : vector<2x4x8x32xf32> to vector<64x32xf32>
    %c5_127 = arith.constant 5 : index
    %c0_128 = arith.constant 0 : index
    %c0_129 = arith.constant 0 : index
    %217 = vector.load %arg4[%c5_127, %c0_128, %c0_129] : memref<16x32x32xf32, #tpu.memory_space<vmem>>, vector<1x32x32xf32>
    %218 = vector.shape_cast %217 : vector<1x32x32xf32> to vector<32x32xf32>
    %cst_130 = arith.constant dense<0.000000e+00> : vector<64x32xf32>
    %219 = tpu.matmul %216, %218, %cst_130 {dimension_numbers = #tpu.dot_dimension_numbers<[1], [0], [0], [1], [0, 0, 1, 1], [], []>} : vector<64x32xf32>, vector<32x32xf32>, vector<64x32xf32> -> vector<64x32xf32>
    %220 = arith.addf %211, %219 : vector<64x32xf32>
    %221 = vector.extract_strided_slice %202 {offsets = [0, 2, 0, 0], sizes = [2, 8, 8, 32], strides = [1, 1, 1, 1]} : vector<2x12x8x32xf32> to vector<2x8x8x32xf32>
    %222 = vector.shape_cast %221 : vector<2x8x8x32xf32> to vector<2x4x2x8x32xf32>
    %223 = vector.extract_strided_slice %222 {offsets = [0, 0, 0, 0, 0], sizes = [2, 4, 1, 8, 32], strides = [1, 1, 1, 1, 1]} : vector<2x4x2x8x32xf32> to vector<2x4x1x8x32xf32>
    %224 = vector.shape_cast %223 : vector<2x4x1x8x32xf32> to vector<2x4x8x32xf32>
    %225 = vector.shape_cast %224 : vector<2x4x8x32xf32> to vector<64x32xf32>
    %c9_131 = arith.constant 9 : index
    %c0_132 = arith.constant 0 : index
    %c0_133 = arith.constant 0 : index
    %226 = vector.load %arg4[%c9_131, %c0_132, %c0_133] : memref<16x32x32xf32, #tpu.memory_space<vmem>>, vector<1x32x32xf32>
    %227 = vector.shape_cast %226 : vector<1x32x32xf32> to vector<32x32xf32>
    %cst_134 = arith.constant dense<0.000000e+00> : vector<64x32xf32>
    %228 = tpu.matmul %225, %227, %cst_134 {dimension_numbers = #tpu.dot_dimension_numbers<[1], [0], [0], [1], [0, 0, 1, 1], [], []>} : vector<64x32xf32>, vector<32x32xf32>, vector<64x32xf32> -> vector<64x32xf32>
    %229 = arith.addf %220, %228 : vector<64x32xf32>
    %230 = vector.extract_strided_slice %202 {offsets = [0, 3, 0, 0], sizes = [2, 8, 8, 32], strides = [1, 1, 1, 1]} : vector<2x12x8x32xf32> to vector<2x8x8x32xf32>
    %231 = vector.shape_cast %230 : vector<2x8x8x32xf32> to vector<2x4x2x8x32xf32>
    %232 = vector.extract_strided_slice %231 {offsets = [0, 0, 0, 0, 0], sizes = [2, 4, 1, 8, 32], strides = [1, 1, 1, 1, 1]} : vector<2x4x2x8x32xf32> to vector<2x4x1x8x32xf32>
    %233 = vector.shape_cast %232 : vector<2x4x1x8x32xf32> to vector<2x4x8x32xf32>
    %234 = vector.shape_cast %233 : vector<2x4x8x32xf32> to vector<64x32xf32>
    %c13_135 = arith.constant 13 : index
    %c0_136 = arith.constant 0 : index
    %c0_137 = arith.constant 0 : index
    %235 = vector.load %arg4[%c13_135, %c0_136, %c0_137] : memref<16x32x32xf32, #tpu.memory_space<vmem>>, vector<1x32x32xf32>
    %236 = vector.shape_cast %235 : vector<1x32x32xf32> to vector<32x32xf32>
    %cst_138 = arith.constant dense<0.000000e+00> : vector<64x32xf32>
    %237 = tpu.matmul %234, %236, %cst_138 {dimension_numbers = #tpu.dot_dimension_numbers<[1], [0], [0], [1], [0, 0, 1, 1], [], []>} : vector<64x32xf32>, vector<32x32xf32>, vector<64x32xf32> -> vector<64x32xf32>
    %238 = arith.addf %229, %237 : vector<64x32xf32>
    %c0_139 = arith.constant 0 : index
    %c0_140 = arith.constant 0 : index
    %c9_141 = arith.constant 9 : index
    %c0_142 = arith.constant 0 : index
    %239 = tpu.strided_load %arg14[%c0_139, %c0_140, %c9_141, %c0_142] {strides = array<i32: 1, 1, 2, 1>} : memref<2x12x32x32xf32, #tpu.memory_space<vmem>>, vector<2x12x8x32xf32>
    %240 = vector.extract_strided_slice %239 {offsets = [0, 0, 0, 0], sizes = [2, 8, 8, 32], strides = [1, 1, 1, 1]} : vector<2x12x8x32xf32> to vector<2x8x8x32xf32>
    %241 = vector.shape_cast %240 : vector<2x8x8x32xf32> to vector<2x4x2x8x32xf32>
    %242 = vector.extract_strided_slice %241 {offsets = [0, 0, 0, 0, 0], sizes = [2, 4, 1, 8, 32], strides = [1, 1, 1, 1, 1]} : vector<2x4x2x8x32xf32> to vector<2x4x1x8x32xf32>
    %243 = vector.shape_cast %242 : vector<2x4x1x8x32xf32> to vector<2x4x8x32xf32>
    %244 = vector.shape_cast %243 : vector<2x4x8x32xf32> to vector<64x32xf32>
    %c2_143 = arith.constant 2 : index
    %c0_144 = arith.constant 0 : index
    %c0_145 = arith.constant 0 : index
    %245 = vector.load %arg4[%c2_143, %c0_144, %c0_145] : memref<16x32x32xf32, #tpu.memory_space<vmem>>, vector<1x32x32xf32>
    %246 = vector.shape_cast %245 : vector<1x32x32xf32> to vector<32x32xf32>
    %cst_146 = arith.constant dense<0.000000e+00> : vector<64x32xf32>
    %247 = tpu.matmul %244, %246, %cst_146 {dimension_numbers = #tpu.dot_dimension_numbers<[1], [0], [0], [1], [0, 0, 1, 1], [], []>} : vector<64x32xf32>, vector<32x32xf32>, vector<64x32xf32> -> vector<64x32xf32>
    %248 = arith.addf %238, %247 : vector<64x32xf32>
    %249 = vector.extract_strided_slice %239 {offsets = [0, 1, 0, 0], sizes = [2, 8, 8, 32], strides = [1, 1, 1, 1]} : vector<2x12x8x32xf32> to vector<2x8x8x32xf32>
    %250 = vector.shape_cast %249 : vector<2x8x8x32xf32> to vector<2x4x2x8x32xf32>
    %251 = vector.extract_strided_slice %250 {offsets = [0, 0, 0, 0, 0], sizes = [2, 4, 1, 8, 32], strides = [1, 1, 1, 1, 1]} : vector<2x4x2x8x32xf32> to vector<2x4x1x8x32xf32>
    %252 = vector.shape_cast %251 : vector<2x4x1x8x32xf32> to vector<2x4x8x32xf32>
    %253 = vector.shape_cast %252 : vector<2x4x8x32xf32> to vector<64x32xf32>
    %c6_147 = arith.constant 6 : index
    %c0_148 = arith.constant 0 : index
    %c0_149 = arith.constant 0 : index
    %254 = vector.load %arg4[%c6_147, %c0_148, %c0_149] : memref<16x32x32xf32, #tpu.memory_space<vmem>>, vector<1x32x32xf32>
    %255 = vector.shape_cast %254 : vector<1x32x32xf32> to vector<32x32xf32>
    %cst_150 = arith.constant dense<0.000000e+00> : vector<64x32xf32>
    %256 = tpu.matmul %253, %255, %cst_150 {dimension_numbers = #tpu.dot_dimension_numbers<[1], [0], [0], [1], [0, 0, 1, 1], [], []>} : vector<64x32xf32>, vector<32x32xf32>, vector<64x32xf32> -> vector<64x32xf32>
    %257 = arith.addf %248, %256 : vector<64x32xf32>
    %258 = vector.extract_strided_slice %239 {offsets = [0, 2, 0, 0], sizes = [2, 8, 8, 32], strides = [1, 1, 1, 1]} : vector<2x12x8x32xf32> to vector<2x8x8x32xf32>
    %259 = vector.shape_cast %258 : vector<2x8x8x32xf32> to vector<2x4x2x8x32xf32>
    %260 = vector.extract_strided_slice %259 {offsets = [0, 0, 0, 0, 0], sizes = [2, 4, 1, 8, 32], strides = [1, 1, 1, 1, 1]} : vector<2x4x2x8x32xf32> to vector<2x4x1x8x32xf32>
    %261 = vector.shape_cast %260 : vector<2x4x1x8x32xf32> to vector<2x4x8x32xf32>
    %262 = vector.shape_cast %261 : vector<2x4x8x32xf32> to vector<64x32xf32>
    %c10_151 = arith.constant 10 : index
    %c0_152 = arith.constant 0 : index
    %c0_153 = arith.constant 0 : index
    %263 = vector.load %arg4[%c10_151, %c0_152, %c0_153] : memref<16x32x32xf32, #tpu.memory_space<vmem>>, vector<1x32x32xf32>
    %264 = vector.shape_cast %263 : vector<1x32x32xf32> to vector<32x32xf32>
    %cst_154 = arith.constant dense<0.000000e+00> : vector<64x32xf32>
    %265 = tpu.matmul %262, %264, %cst_154 {dimension_numbers = #tpu.dot_dimension_numbers<[1], [0], [0], [1], [0, 0, 1, 1], [], []>} : vector<64x32xf32>, vector<32x32xf32>, vector<64x32xf32> -> vector<64x32xf32>
    %266 = arith.addf %257, %265 : vector<64x32xf32>
    %267 = vector.extract_strided_slice %239 {offsets = [0, 3, 0, 0], sizes = [2, 8, 8, 32], strides = [1, 1, 1, 1]} : vector<2x12x8x32xf32> to vector<2x8x8x32xf32>
    %268 = vector.shape_cast %267 : vector<2x8x8x32xf32> to vector<2x4x2x8x32xf32>
    %269 = vector.extract_strided_slice %268 {offsets = [0, 0, 0, 0, 0], sizes = [2, 4, 1, 8, 32], strides = [1, 1, 1, 1, 1]} : vector<2x4x2x8x32xf32> to vector<2x4x1x8x32xf32>
    %270 = vector.shape_cast %269 : vector<2x4x1x8x32xf32> to vector<2x4x8x32xf32>
    %271 = vector.shape_cast %270 : vector<2x4x8x32xf32> to vector<64x32xf32>
    %c14_155 = arith.constant 14 : index
    %c0_156 = arith.constant 0 : index
    %c0_157 = arith.constant 0 : index
    %272 = vector.load %arg4[%c14_155, %c0_156, %c0_157] : memref<16x32x32xf32, #tpu.memory_space<vmem>>, vector<1x32x32xf32>
    %273 = vector.shape_cast %272 : vector<1x32x32xf32> to vector<32x32xf32>
    %cst_158 = arith.constant dense<0.000000e+00> : vector<64x32xf32>
    %274 = tpu.matmul %271, %273, %cst_158 {dimension_numbers = #tpu.dot_dimension_numbers<[1], [0], [0], [1], [0, 0, 1, 1], [], []>} : vector<64x32xf32>, vector<32x32xf32>, vector<64x32xf32> -> vector<64x32xf32>
    %275 = arith.addf %266, %274 : vector<64x32xf32>
    %c0_159 = arith.constant 0 : index
    %c0_160 = arith.constant 0 : index
    %c10_161 = arith.constant 10 : index
    %c0_162 = arith.constant 0 : index
    %276 = tpu.strided_load %arg14[%c0_159, %c0_160, %c10_161, %c0_162] {strides = array<i32: 1, 1, 2, 1>} : memref<2x12x32x32xf32, #tpu.memory_space<vmem>>, vector<2x12x8x32xf32>
    %277 = vector.extract_strided_slice %276 {offsets = [0, 0, 0, 0], sizes = [2, 8, 8, 32], strides = [1, 1, 1, 1]} : vector<2x12x8x32xf32> to vector<2x8x8x32xf32>
    %278 = vector.shape_cast %277 : vector<2x8x8x32xf32> to vector<2x4x2x8x32xf32>
    %279 = vector.extract_strided_slice %278 {offsets = [0, 0, 0, 0, 0], sizes = [2, 4, 1, 8, 32], strides = [1, 1, 1, 1, 1]} : vector<2x4x2x8x32xf32> to vector<2x4x1x8x32xf32>
    %280 = vector.shape_cast %279 : vector<2x4x1x8x32xf32> to vector<2x4x8x32xf32>
    %281 = vector.shape_cast %280 : vector<2x4x8x32xf32> to vector<64x32xf32>
    %c3_163 = arith.constant 3 : index
    %c0_164 = arith.constant 0 : index
    %c0_165 = arith.constant 0 : index
    %282 = vector.load %arg4[%c3_163, %c0_164, %c0_165] : memref<16x32x32xf32, #tpu.memory_space<vmem>>, vector<1x32x32xf32>
    %283 = vector.shape_cast %282 : vector<1x32x32xf32> to vector<32x32xf32>
    %cst_166 = arith.constant dense<0.000000e+00> : vector<64x32xf32>
    %284 = tpu.matmul %281, %283, %cst_166 {dimension_numbers = #tpu.dot_dimension_numbers<[1], [0], [0], [1], [0, 0, 1, 1], [], []>} : vector<64x32xf32>, vector<32x32xf32>, vector<64x32xf32> -> vector<64x32xf32>
    %285 = arith.addf %275, %284 : vector<64x32xf32>
    %286 = vector.extract_strided_slice %276 {offsets = [0, 1, 0, 0], sizes = [2, 8, 8, 32], strides = [1, 1, 1, 1]} : vector<2x12x8x32xf32> to vector<2x8x8x32xf32>
    %287 = vector.shape_cast %286 : vector<2x8x8x32xf32> to vector<2x4x2x8x32xf32>
    %288 = vector.extract_strided_slice %287 {offsets = [0, 0, 0, 0, 0], sizes = [2, 4, 1, 8, 32], strides = [1, 1, 1, 1, 1]} : vector<2x4x2x8x32xf32> to vector<2x4x1x8x32xf32>
    %289 = vector.shape_cast %288 : vector<2x4x1x8x32xf32> to vector<2x4x8x32xf32>
    %290 = vector.shape_cast %289 : vector<2x4x8x32xf32> to vector<64x32xf32>
    %c7_167 = arith.constant 7 : index
    %c0_168 = arith.constant 0 : index
    %c0_169 = arith.constant 0 : index
    %291 = vector.load %arg4[%c7_167, %c0_168, %c0_169] : memref<16x32x32xf32, #tpu.memory_space<vmem>>, vector<1x32x32xf32>
    %292 = vector.shape_cast %291 : vector<1x32x32xf32> to vector<32x32xf32>
    %cst_170 = arith.constant dense<0.000000e+00> : vector<64x32xf32>
    %293 = tpu.matmul %290, %292, %cst_170 {dimension_numbers = #tpu.dot_dimension_numbers<[1], [0], [0], [1], [0, 0, 1, 1], [], []>} : vector<64x32xf32>, vector<32x32xf32>, vector<64x32xf32> -> vector<64x32xf32>
    %294 = arith.addf %285, %293 : vector<64x32xf32>
    %295 = vector.extract_strided_slice %276 {offsets = [0, 2, 0, 0], sizes = [2, 8, 8, 32], strides = [1, 1, 1, 1]} : vector<2x12x8x32xf32> to vector<2x8x8x32xf32>
    %296 = vector.shape_cast %295 : vector<2x8x8x32xf32> to vector<2x4x2x8x32xf32>
    %297 = vector.extract_strided_slice %296 {offsets = [0, 0, 0, 0, 0], sizes = [2, 4, 1, 8, 32], strides = [1, 1, 1, 1, 1]} : vector<2x4x2x8x32xf32> to vector<2x4x1x8x32xf32>
    %298 = vector.shape_cast %297 : vector<2x4x1x8x32xf32> to vector<2x4x8x32xf32>
    %299 = vector.shape_cast %298 : vector<2x4x8x32xf32> to vector<64x32xf32>
    %c11_171 = arith.constant 11 : index
    %c0_172 = arith.constant 0 : index
    %c0_173 = arith.constant 0 : index
    %300 = vector.load %arg4[%c11_171, %c0_172, %c0_173] : memref<16x32x32xf32, #tpu.memory_space<vmem>>, vector<1x32x32xf32>
    %301 = vector.shape_cast %300 : vector<1x32x32xf32> to vector<32x32xf32>
    %cst_174 = arith.constant dense<0.000000e+00> : vector<64x32xf32>
    %302 = tpu.matmul %299, %301, %cst_174 {dimension_numbers = #tpu.dot_dimension_numbers<[1], [0], [0], [1], [0, 0, 1, 1], [], []>} : vector<64x32xf32>, vector<32x32xf32>, vector<64x32xf32> -> vector<64x32xf32>
    %303 = arith.addf %294, %302 : vector<64x32xf32>
    %304 = vector.extract_strided_slice %276 {offsets = [0, 3, 0, 0], sizes = [2, 8, 8, 32], strides = [1, 1, 1, 1]} : vector<2x12x8x32xf32> to vector<2x8x8x32xf32>
    %305 = vector.shape_cast %304 : vector<2x8x8x32xf32> to vector<2x4x2x8x32xf32>
    %306 = vector.extract_strided_slice %305 {offsets = [0, 0, 0, 0, 0], sizes = [2, 4, 1, 8, 32], strides = [1, 1, 1, 1, 1]} : vector<2x4x2x8x32xf32> to vector<2x4x1x8x32xf32>
    %307 = vector.shape_cast %306 : vector<2x4x1x8x32xf32> to vector<2x4x8x32xf32>
    %308 = vector.shape_cast %307 : vector<2x4x8x32xf32> to vector<64x32xf32>
    %c15_175 = arith.constant 15 : index
    %c0_176 = arith.constant 0 : index
    %c0_177 = arith.constant 0 : index
    %309 = vector.load %arg4[%c15_175, %c0_176, %c0_177] : memref<16x32x32xf32, #tpu.memory_space<vmem>>, vector<1x32x32xf32>
    %310 = vector.shape_cast %309 : vector<1x32x32xf32> to vector<32x32xf32>
    %cst_178 = arith.constant dense<0.000000e+00> : vector<64x32xf32>
    %311 = tpu.matmul %308, %310, %cst_178 {dimension_numbers = #tpu.dot_dimension_numbers<[1], [0], [0], [1], [0, 0, 1, 1], [], []>} : vector<64x32xf32>, vector<32x32xf32>, vector<64x32xf32> -> vector<64x32xf32>
    %312 = arith.addf %303, %311 : vector<64x32xf32>
    %c0_179 = arith.constant 0 : index
    %c0_180 = arith.constant 0 : index
    %313 = vector.load %arg5[%c0_179, %c0_180] : memref<1x32xf32, #tpu.memory_space<vmem>>, vector<1x32xf32>
    %314 = vector.broadcast %313 : vector<1x32xf32> to vector<64x32xf32>
    %315 = arith.addf %312, %314 : vector<64x32xf32>
    %316 = vector.shape_cast %315 : vector<64x32xf32> to vector<2x4x8x32xf32>
    %317 = vector.extract_strided_slice %316 {offsets = [0, 0, 0, 0], sizes = [2, 4, 4, 32], strides = [1, 1, 1, 1]} : vector<2x4x8x32xf32> to vector<2x4x4x32xf32>
    %c0_181 = arith.constant 0 : index
    %c1_182 = arith.constant 1 : index
    %c8_183 = arith.constant 8 : index
    %c0_184 = arith.constant 0 : index
    %318 = vector.load %arg15[%c0_181, %c1_182, %c8_183, %c0_184] : memref<2x8x32x32xf32, #tpu.memory_space<vmem>>, vector<2x4x4x32xf32>
    tpu.vector_store %arg15[%c0_181, %c1_182, %c8_183, %c0_184], %317 {strides = array<i32>} : memref<2x8x32x32xf32, #tpu.memory_space<vmem>>, vector<2x4x4x32xf32>,
    %cst_185 = arith.constant 0.000000e+00 : f32
    %319 = vector.broadcast %cst_185 : f32 to vector<32x32xf32>
    %c0_186 = arith.constant 0 : index
    %c0_187 = arith.constant 0 : index
    %c7_188 = arith.constant 7 : index
    %c0_189 = arith.constant 0 : index
    %320 = tpu.strided_load %arg15[%c0_186, %c0_187, %c7_188, %c0_189] {strides = array<i32: 1, 1, 2, 1>} : memref<2x8x32x32xf32, #tpu.memory_space<vmem>>, vector<2x8x8x32xf32>
    %321 = vector.extract_strided_slice %320 {offsets = [0, 0, 0, 0], sizes = [2, 4, 8, 32], strides = [1, 1, 1, 1]} : vector<2x8x8x32xf32> to vector<2x4x8x32xf32>
    %322 = vector.shape_cast %321 : vector<2x4x8x32xf32> to vector<2x2x2x8x32xf32>
    %323 = vector.extract_strided_slice %322 {offsets = [0, 0, 0, 0, 0], sizes = [2, 2, 1, 8, 32], strides = [1, 1, 1, 1, 1]} : vector<2x2x2x8x32xf32> to vector<2x2x1x8x32xf32>
    %324 = vector.shape_cast %323 : vector<2x2x1x8x32xf32> to vector<2x2x8x32xf32>
    %325 = vector.shape_cast %324 : vector<2x2x8x32xf32> to vector<32x32xf32>
    %c0_190 = arith.constant 0 : index
    %c0_191 = arith.constant 0 : index
    %c0_192 = arith.constant 0 : index
    %326 = vector.load %arg6[%c0_190, %c0_191, %c0_192] : memref<16x32x32xf32, #tpu.memory_space<vmem>>, vector<1x32x32xf32>
    %327 = vector.shape_cast %326 : vector<1x32x32xf32> to vector<32x32xf32>
    %cst_193 = arith.constant dense<0.000000e+00> : vector<32x32xf32>
    %328 = tpu.matmul %325, %327, %cst_193 {dimension_numbers = #tpu.dot_dimension_numbers<[1], [0], [0], [1], [0, 0, 1, 1], [], []>} : vector<32x32xf32>, vector<32x32xf32>, vector<32x32xf32> -> vector<32x32xf32>
    %329 = arith.addf %319, %328 : vector<32x32xf32>
    %330 = vector.extract_strided_slice %320 {offsets = [0, 1, 0, 0], sizes = [2, 4, 8, 32], strides = [1, 1, 1, 1]} : vector<2x8x8x32xf32> to vector<2x4x8x32xf32>
    %331 = vector.shape_cast %330 : vector<2x4x8x32xf32> to vector<2x2x2x8x32xf32>
    %332 = vector.extract_strided_slice %331 {offsets = [0, 0, 0, 0, 0], sizes = [2, 2, 1, 8, 32], strides = [1, 1, 1, 1, 1]} : vector<2x2x2x8x32xf32> to vector<2x2x1x8x32xf32>
    %333 = vector.shape_cast %332 : vector<2x2x1x8x32xf32> to vector<2x2x8x32xf32>
    %334 = vector.shape_cast %333 : vector<2x2x8x32xf32> to vector<32x32xf32>
    %c4_194 = arith.constant 4 : index
    %c0_195 = arith.constant 0 : index
    %c0_196 = arith.constant 0 : index
    %335 = vector.load %arg6[%c4_194, %c0_195, %c0_196] : memref<16x32x32xf32, #tpu.memory_space<vmem>>, vector<1x32x32xf32>
    %336 = vector.shape_cast %335 : vector<1x32x32xf32> to vector<32x32xf32>
    %cst_197 = arith.constant dense<0.000000e+00> : vector<32x32xf32>
    %337 = tpu.matmul %334, %336, %cst_197 {dimension_numbers = #tpu.dot_dimension_numbers<[1], [0], [0], [1], [0, 0, 1, 1], [], []>} : vector<32x32xf32>, vector<32x32xf32>, vector<32x32xf32> -> vector<32x32xf32>
    %338 = arith.addf %329, %337 : vector<32x32xf32>
    %339 = vector.extract_strided_slice %320 {offsets = [0, 2, 0, 0], sizes = [2, 4, 8, 32], strides = [1, 1, 1, 1]} : vector<2x8x8x32xf32> to vector<2x4x8x32xf32>
    %340 = vector.shape_cast %339 : vector<2x4x8x32xf32> to vector<2x2x2x8x32xf32>
    %341 = vector.extract_strided_slice %340 {offsets = [0, 0, 0, 0, 0], sizes = [2, 2, 1, 8, 32], strides = [1, 1, 1, 1, 1]} : vector<2x2x2x8x32xf32> to vector<2x2x1x8x32xf32>
    %342 = vector.shape_cast %341 : vector<2x2x1x8x32xf32> to vector<2x2x8x32xf32>
    %343 = vector.shape_cast %342 : vector<2x2x8x32xf32> to vector<32x32xf32>
    %c8_198 = arith.constant 8 : index
    %c0_199 = arith.constant 0 : index
    %c0_200 = arith.constant 0 : index
    %344 = vector.load %arg6[%c8_198, %c0_199, %c0_200] : memref<16x32x32xf32, #tpu.memory_space<vmem>>, vector<1x32x32xf32>
    %345 = vector.shape_cast %344 : vector<1x32x32xf32> to vector<32x32xf32>
    %cst_201 = arith.constant dense<0.000000e+00> : vector<32x32xf32>
    %346 = tpu.matmul %343, %345, %cst_201 {dimension_numbers = #tpu.dot_dimension_numbers<[1], [0], [0], [1], [0, 0, 1, 1], [], []>} : vector<32x32xf32>, vector<32x32xf32>, vector<32x32xf32> -> vector<32x32xf32>
    %347 = arith.addf %338, %346 : vector<32x32xf32>
    %348 = vector.extract_strided_slice %320 {offsets = [0, 3, 0, 0], sizes = [2, 4, 8, 32], strides = [1, 1, 1, 1]} : vector<2x8x8x32xf32> to vector<2x4x8x32xf32>
    %349 = vector.shape_cast %348 : vector<2x4x8x32xf32> to vector<2x2x2x8x32xf32>
    %350 = vector.extract_strided_slice %349 {offsets = [0, 0, 0, 0, 0], sizes = [2, 2, 1, 8, 32], strides = [1, 1, 1, 1, 1]} : vector<2x2x2x8x32xf32> to vector<2x2x1x8x32xf32>
    %351 = vector.shape_cast %350 : vector<2x2x1x8x32xf32> to vector<2x2x8x32xf32>
    %352 = vector.shape_cast %351 : vector<2x2x8x32xf32> to vector<32x32xf32>
    %c12_202 = arith.constant 12 : index
    %c0_203 = arith.constant 0 : index
    %c0_204 = arith.constant 0 : index
    %353 = vector.load %arg6[%c12_202, %c0_203, %c0_204] : memref<16x32x32xf32, #tpu.memory_space<vmem>>, vector<1x32x32xf32>
    %354 = vector.shape_cast %353 : vector<1x32x32xf32> to vector<32x32xf32>
    %cst_205 = arith.constant dense<0.000000e+00> : vector<32x32xf32>
    %355 = tpu.matmul %352, %354, %cst_205 {dimension_numbers = #tpu.dot_dimension_numbers<[1], [0], [0], [1], [0, 0, 1, 1], [], []>} : vector<32x32xf32>, vector<32x32xf32>, vector<32x32xf32> -> vector<32x32xf32>
    %356 = arith.addf %347, %355 : vector<32x32xf32>
    %c0_206 = arith.constant 0 : index
    %c0_207 = arith.constant 0 : index
    %c8_208 = arith.constant 8 : index
    %c0_209 = arith.constant 0 : index
    %357 = tpu.strided_load %arg15[%c0_206, %c0_207, %c8_208, %c0_209] {strides = array<i32: 1, 1, 2, 1>} : memref<2x8x32x32xf32, #tpu.memory_space<vmem>>, vector<2x8x8x32xf32>
    %358 = vector.extract_strided_slice %357 {offsets = [0, 0, 0, 0], sizes = [2, 4, 8, 32], strides = [1, 1, 1, 1]} : vector<2x8x8x32xf32> to vector<2x4x8x32xf32>
    %359 = vector.shape_cast %358 : vector<2x4x8x32xf32> to vector<2x2x2x8x32xf32>
    %360 = vector.extract_strided_slice %359 {offsets = [0, 0, 0, 0, 0], sizes = [2, 2, 1, 8, 32], strides = [1, 1, 1, 1, 1]} : vector<2x2x2x8x32xf32> to vector<2x2x1x8x32xf32>
    %361 = vector.shape_cast %360 : vector<2x2x1x8x32xf32> to vector<2x2x8x32xf32>
    %362 = vector.shape_cast %361 : vector<2x2x8x32xf32> to vector<32x32xf32>
    %c1_210 = arith.constant 1 : index
    %c0_211 = arith.constant 0 : index
    %c0_212 = arith.constant 0 : index
    %363 = vector.load %arg6[%c1_210, %c0_211, %c0_212] : memref<16x32x32xf32, #tpu.memory_space<vmem>>, vector<1x32x32xf32>
    %364 = vector.shape_cast %363 : vector<1x32x32xf32> to vector<32x32xf32>
    %cst_213 = arith.constant dense<0.000000e+00> : vector<32x32xf32>
    %365 = tpu.matmul %362, %364, %cst_213 {dimension_numbers = #tpu.dot_dimension_numbers<[1], [0], [0], [1], [0, 0, 1, 1], [], []>} : vector<32x32xf32>, vector<32x32xf32>, vector<32x32xf32> -> vector<32x32xf32>
    %366 = arith.addf %356, %365 : vector<32x32xf32>
    %367 = vector.extract_strided_slice %357 {offsets = [0, 1, 0, 0], sizes = [2, 4, 8, 32], strides = [1, 1, 1, 1]} : vector<2x8x8x32xf32> to vector<2x4x8x32xf32>
    %368 = vector.shape_cast %367 : vector<2x4x8x32xf32> to vector<2x2x2x8x32xf32>
    %369 = vector.extract_strided_slice %368 {offsets = [0, 0, 0, 0, 0], sizes = [2, 2, 1, 8, 32], strides = [1, 1, 1, 1, 1]} : vector<2x2x2x8x32xf32> to vector<2x2x1x8x32xf32>
    %370 = vector.shape_cast %369 : vector<2x2x1x8x32xf32> to vector<2x2x8x32xf32>
    %371 = vector.shape_cast %370 : vector<2x2x8x32xf32> to vector<32x32xf32>
    %c5_214 = arith.constant 5 : index
    %c0_215 = arith.constant 0 : index
    %c0_216 = arith.constant 0 : index
    %372 = vector.load %arg6[%c5_214, %c0_215, %c0_216] : memref<16x32x32xf32, #tpu.memory_space<vmem>>, vector<1x32x32xf32>
    %373 = vector.shape_cast %372 : vector<1x32x32xf32> to vector<32x32xf32>
    %cst_217 = arith.constant dense<0.000000e+00> : vector<32x32xf32>
    %374 = tpu.matmul %371, %373, %cst_217 {dimension_numbers = #tpu.dot_dimension_numbers<[1], [0], [0], [1], [0, 0, 1, 1], [], []>} : vector<32x32xf32>, vector<32x32xf32>, vector<32x32xf32> -> vector<32x32xf32>
    %375 = arith.addf %366, %374 : vector<32x32xf32>
    %376 = vector.extract_strided_slice %357 {offsets = [0, 2, 0, 0], sizes = [2, 4, 8, 32], strides = [1, 1, 1, 1]} : vector<2x8x8x32xf32> to vector<2x4x8x32xf32>
    %377 = vector.shape_cast %376 : vector<2x4x8x32xf32> to vector<2x2x2x8x32xf32>
    %378 = vector.extract_strided_slice %377 {offsets = [0, 0, 0, 0, 0], sizes = [2, 2, 1, 8, 32], strides = [1, 1, 1, 1, 1]} : vector<2x2x2x8x32xf32> to vector<2x2x1x8x32xf32>
    %379 = vector.shape_cast %378 : vector<2x2x1x8x32xf32> to vector<2x2x8x32xf32>
    %380 = vector.shape_cast %379 : vector<2x2x8x32xf32> to vector<32x32xf32>
    %c9_218 = arith.constant 9 : index
    %c0_219 = arith.constant 0 : index
    %c0_220 = arith.constant 0 : index
    %381 = vector.load %arg6[%c9_218, %c0_219, %c0_220] : memref<16x32x32xf32, #tpu.memory_space<vmem>>, vector<1x32x32xf32>
    %382 = vector.shape_cast %381 : vector<1x32x32xf32> to vector<32x32xf32>
    %cst_221 = arith.constant dense<0.000000e+00> : vector<32x32xf32>
    %383 = tpu.matmul %380, %382, %cst_221 {dimension_numbers = #tpu.dot_dimension_numbers<[1], [0], [0], [1], [0, 0, 1, 1], [], []>} : vector<32x32xf32>, vector<32x32xf32>, vector<32x32xf32> -> vector<32x32xf32>
    %384 = arith.addf %375, %383 : vector<32x32xf32>
    %385 = vector.extract_strided_slice %357 {offsets = [0, 3, 0, 0], sizes = [2, 4, 8, 32], strides = [1, 1, 1, 1]} : vector<2x8x8x32xf32> to vector<2x4x8x32xf32>
    %386 = vector.shape_cast %385 : vector<2x4x8x32xf32> to vector<2x2x2x8x32xf32>
    %387 = vector.extract_strided_slice %386 {offsets = [0, 0, 0, 0, 0], sizes = [2, 2, 1, 8, 32], strides = [1, 1, 1, 1, 1]} : vector<2x2x2x8x32xf32> to vector<2x2x1x8x32xf32>
    %388 = vector.shape_cast %387 : vector<2x2x1x8x32xf32> to vector<2x2x8x32xf32>
    %389 = vector.shape_cast %388 : vector<2x2x8x32xf32> to vector<32x32xf32>
    %c13_222 = arith.constant 13 : index
    %c0_223 = arith.constant 0 : index
    %c0_224 = arith.constant 0 : index
    %390 = vector.load %arg6[%c13_222, %c0_223, %c0_224] : memref<16x32x32xf32, #tpu.memory_space<vmem>>, vector<1x32x32xf32>
    %391 = vector.shape_cast %390 : vector<1x32x32xf32> to vector<32x32xf32>
    %cst_225 = arith.constant dense<0.000000e+00> : vector<32x32xf32>
    %392 = tpu.matmul %389, %391, %cst_225 {dimension_numbers = #tpu.dot_dimension_numbers<[1], [0], [0], [1], [0, 0, 1, 1], [], []>} : vector<32x32xf32>, vector<32x32xf32>, vector<32x32xf32> -> vector<32x32xf32>
    %393 = arith.addf %384, %392 : vector<32x32xf32>
    %c0_226 = arith.constant 0 : index
    %c0_227 = arith.constant 0 : index
    %c9_228 = arith.constant 9 : index
    %c0_229 = arith.constant 0 : index
    %394 = tpu.strided_load %arg15[%c0_226, %c0_227, %c9_228, %c0_229] {strides = array<i32: 1, 1, 2, 1>} : memref<2x8x32x32xf32, #tpu.memory_space<vmem>>, vector<2x8x8x32xf32>
    %395 = vector.extract_strided_slice %394 {offsets = [0, 0, 0, 0], sizes = [2, 4, 8, 32], strides = [1, 1, 1, 1]} : vector<2x8x8x32xf32> to vector<2x4x8x32xf32>
    %396 = vector.shape_cast %395 : vector<2x4x8x32xf32> to vector<2x2x2x8x32xf32>
    %397 = vector.extract_strided_slice %396 {offsets = [0, 0, 0, 0, 0], sizes = [2, 2, 1, 8, 32], strides = [1, 1, 1, 1, 1]} : vector<2x2x2x8x32xf32> to vector<2x2x1x8x32xf32>
    %398 = vector.shape_cast %397 : vector<2x2x1x8x32xf32> to vector<2x2x8x32xf32>
    %399 = vector.shape_cast %398 : vector<2x2x8x32xf32> to vector<32x32xf32>
    %c2_230 = arith.constant 2 : index
    %c0_231 = arith.constant 0 : index
    %c0_232 = arith.constant 0 : index
    %400 = vector.load %arg6[%c2_230, %c0_231, %c0_232] : memref<16x32x32xf32, #tpu.memory_space<vmem>>, vector<1x32x32xf32>
    %401 = vector.shape_cast %400 : vector<1x32x32xf32> to vector<32x32xf32>
    %cst_233 = arith.constant dense<0.000000e+00> : vector<32x32xf32>
    %402 = tpu.matmul %399, %401, %cst_233 {dimension_numbers = #tpu.dot_dimension_numbers<[1], [0], [0], [1], [0, 0, 1, 1], [], []>} : vector<32x32xf32>, vector<32x32xf32>, vector<32x32xf32> -> vector<32x32xf32>
    %403 = arith.addf %393, %402 : vector<32x32xf32>
    %404 = vector.extract_strided_slice %394 {offsets = [0, 1, 0, 0], sizes = [2, 4, 8, 32], strides = [1, 1, 1, 1]} : vector<2x8x8x32xf32> to vector<2x4x8x32xf32>
    %405 = vector.shape_cast %404 : vector<2x4x8x32xf32> to vector<2x2x2x8x32xf32>
    %406 = vector.extract_strided_slice %405 {offsets = [0, 0, 0, 0, 0], sizes = [2, 2, 1, 8, 32], strides = [1, 1, 1, 1, 1]} : vector<2x2x2x8x32xf32> to vector<2x2x1x8x32xf32>
    %407 = vector.shape_cast %406 : vector<2x2x1x8x32xf32> to vector<2x2x8x32xf32>
    %408 = vector.shape_cast %407 : vector<2x2x8x32xf32> to vector<32x32xf32>
    %c6_234 = arith.constant 6 : index
    %c0_235 = arith.constant 0 : index
    %c0_236 = arith.constant 0 : index
    %409 = vector.load %arg6[%c6_234, %c0_235, %c0_236] : memref<16x32x32xf32, #tpu.memory_space<vmem>>, vector<1x32x32xf32>
    %410 = vector.shape_cast %409 : vector<1x32x32xf32> to vector<32x32xf32>
    %cst_237 = arith.constant dense<0.000000e+00> : vector<32x32xf32>
    %411 = tpu.matmul %408, %410, %cst_237 {dimension_numbers = #tpu.dot_dimension_numbers<[1], [0], [0], [1], [0, 0, 1, 1], [], []>} : vector<32x32xf32>, vector<32x32xf32>, vector<32x32xf32> -> vector<32x32xf32>
    %412 = arith.addf %403, %411 : vector<32x32xf32>
    %413 = vector.extract_strided_slice %394 {offsets = [0, 2, 0, 0], sizes = [2, 4, 8, 32], strides = [1, 1, 1, 1]} : vector<2x8x8x32xf32> to vector<2x4x8x32xf32>
    %414 = vector.shape_cast %413 : vector<2x4x8x32xf32> to vector<2x2x2x8x32xf32>
    %415 = vector.extract_strided_slice %414 {offsets = [0, 0, 0, 0, 0], sizes = [2, 2, 1, 8, 32], strides = [1, 1, 1, 1, 1]} : vector<2x2x2x8x32xf32> to vector<2x2x1x8x32xf32>
    %416 = vector.shape_cast %415 : vector<2x2x1x8x32xf32> to vector<2x2x8x32xf32>
    %417 = vector.shape_cast %416 : vector<2x2x8x32xf32> to vector<32x32xf32>
    %c10_238 = arith.constant 10 : index
    %c0_239 = arith.constant 0 : index
    %c0_240 = arith.constant 0 : index
    %418 = vector.load %arg6[%c10_238, %c0_239, %c0_240] : memref<16x32x32xf32, #tpu.memory_space<vmem>>, vector<1x32x32xf32>
    %419 = vector.shape_cast %418 : vector<1x32x32xf32> to vector<32x32xf32>
    %cst_241 = arith.constant dense<0.000000e+00> : vector<32x32xf32>
    %420 = tpu.matmul %417, %419, %cst_241 {dimension_numbers = #tpu.dot_dimension_numbers<[1], [0], [0], [1], [0, 0, 1, 1], [], []>} : vector<32x32xf32>, vector<32x32xf32>, vector<32x32xf32> -> vector<32x32xf32>
    %421 = arith.addf %412, %420 : vector<32x32xf32>
    %422 = vector.extract_strided_slice %394 {offsets = [0, 3, 0, 0], sizes = [2, 4, 8, 32], strides = [1, 1, 1, 1]} : vector<2x8x8x32xf32> to vector<2x4x8x32xf32>
    %423 = vector.shape_cast %422 : vector<2x4x8x32xf32> to vector<2x2x2x8x32xf32>
    %424 = vector.extract_strided_slice %423 {offsets = [0, 0, 0, 0, 0], sizes = [2, 2, 1, 8, 32], strides = [1, 1, 1, 1, 1]} : vector<2x2x2x8x32xf32> to vector<2x2x1x8x32xf32>
    %425 = vector.shape_cast %424 : vector<2x2x1x8x32xf32> to vector<2x2x8x32xf32>
    %426 = vector.shape_cast %425 : vector<2x2x8x32xf32> to vector<32x32xf32>
    %c14_242 = arith.constant 14 : index
    %c0_243 = arith.constant 0 : index
    %c0_244 = arith.constant 0 : index
    %427 = vector.load %arg6[%c14_242, %c0_243, %c0_244] : memref<16x32x32xf32, #tpu.memory_space<vmem>>, vector<1x32x32xf32>
    %428 = vector.shape_cast %427 : vector<1x32x32xf32> to vector<32x32xf32>
    %cst_245 = arith.constant dense<0.000000e+00> : vector<32x32xf32>
    %429 = tpu.matmul %426, %428, %cst_245 {dimension_numbers = #tpu.dot_dimension_numbers<[1], [0], [0], [1], [0, 0, 1, 1], [], []>} : vector<32x32xf32>, vector<32x32xf32>, vector<32x32xf32> -> vector<32x32xf32>
    %430 = arith.addf %421, %429 : vector<32x32xf32>
    %c0_246 = arith.constant 0 : index
    %c0_247 = arith.constant 0 : index
    %c10_248 = arith.constant 10 : index
    %c0_249 = arith.constant 0 : index
    %431 = tpu.strided_load %arg15[%c0_246, %c0_247, %c10_248, %c0_249] {strides = array<i32: 1, 1, 2, 1>} : memref<2x8x32x32xf32, #tpu.memory_space<vmem>>, vector<2x8x8x32xf32>
    %432 = vector.extract_strided_slice %431 {offsets = [0, 0, 0, 0], sizes = [2, 4, 8, 32], strides = [1, 1, 1, 1]} : vector<2x8x8x32xf32> to vector<2x4x8x32xf32>
    %433 = vector.shape_cast %432 : vector<2x4x8x32xf32> to vector<2x2x2x8x32xf32>
    %434 = vector.extract_strided_slice %433 {offsets = [0, 0, 0, 0, 0], sizes = [2, 2, 1, 8, 32], strides = [1, 1, 1, 1, 1]} : vector<2x2x2x8x32xf32> to vector<2x2x1x8x32xf32>
    %435 = vector.shape_cast %434 : vector<2x2x1x8x32xf32> to vector<2x2x8x32xf32>
    %436 = vector.shape_cast %435 : vector<2x2x8x32xf32> to vector<32x32xf32>
    %c3_250 = arith.constant 3 : index
    %c0_251 = arith.constant 0 : index
    %c0_252 = arith.constant 0 : index
    %437 = vector.load %arg6[%c3_250, %c0_251, %c0_252] : memref<16x32x32xf32, #tpu.memory_space<vmem>>, vector<1x32x32xf32>
    %438 = vector.shape_cast %437 : vector<1x32x32xf32> to vector<32x32xf32>
    %cst_253 = arith.constant dense<0.000000e+00> : vector<32x32xf32>
    %439 = tpu.matmul %436, %438, %cst_253 {dimension_numbers = #tpu.dot_dimension_numbers<[1], [0], [0], [1], [0, 0, 1, 1], [], []>} : vector<32x32xf32>, vector<32x32xf32>, vector<32x32xf32> -> vector<32x32xf32>
    %440 = arith.addf %430, %439 : vector<32x32xf32>
    %441 = vector.extract_strided_slice %431 {offsets = [0, 1, 0, 0], sizes = [2, 4, 8, 32], strides = [1, 1, 1, 1]} : vector<2x8x8x32xf32> to vector<2x4x8x32xf32>
    %442 = vector.shape_cast %441 : vector<2x4x8x32xf32> to vector<2x2x2x8x32xf32>
    %443 = vector.extract_strided_slice %442 {offsets = [0, 0, 0, 0, 0], sizes = [2, 2, 1, 8, 32], strides = [1, 1, 1, 1, 1]} : vector<2x2x2x8x32xf32> to vector<2x2x1x8x32xf32>
    %444 = vector.shape_cast %443 : vector<2x2x1x8x32xf32> to vector<2x2x8x32xf32>
    %445 = vector.shape_cast %444 : vector<2x2x8x32xf32> to vector<32x32xf32>
    %c7_254 = arith.constant 7 : index
    %c0_255 = arith.constant 0 : index
    %c0_256 = arith.constant 0 : index
    %446 = vector.load %arg6[%c7_254, %c0_255, %c0_256] : memref<16x32x32xf32, #tpu.memory_space<vmem>>, vector<1x32x32xf32>
    %447 = vector.shape_cast %446 : vector<1x32x32xf32> to vector<32x32xf32>
    %cst_257 = arith.constant dense<0.000000e+00> : vector<32x32xf32>
    %448 = tpu.matmul %445, %447, %cst_257 {dimension_numbers = #tpu.dot_dimension_numbers<[1], [0], [0], [1], [0, 0, 1, 1], [], []>} : vector<32x32xf32>, vector<32x32xf32>, vector<32x32xf32> -> vector<32x32xf32>
    %449 = arith.addf %440, %448 : vector<32x32xf32>
    %450 = vector.extract_strided_slice %431 {offsets = [0, 2, 0, 0], sizes = [2, 4, 8, 32], strides = [1, 1, 1, 1]} : vector<2x8x8x32xf32> to vector<2x4x8x32xf32>
    %451 = vector.shape_cast %450 : vector<2x4x8x32xf32> to vector<2x2x2x8x32xf32>
    %452 = vector.extract_strided_slice %451 {offsets = [0, 0, 0, 0, 0], sizes = [2, 2, 1, 8, 32], strides = [1, 1, 1, 1, 1]} : vector<2x2x2x8x32xf32> to vector<2x2x1x8x32xf32>
    %453 = vector.shape_cast %452 : vector<2x2x1x8x32xf32> to vector<2x2x8x32xf32>
    %454 = vector.shape_cast %453 : vector<2x2x8x32xf32> to vector<32x32xf32>
    %c11_258 = arith.constant 11 : index
    %c0_259 = arith.constant 0 : index
    %c0_260 = arith.constant 0 : index
    %455 = vector.load %arg6[%c11_258, %c0_259, %c0_260] : memref<16x32x32xf32, #tpu.memory_space<vmem>>, vector<1x32x32xf32>
    %456 = vector.shape_cast %455 : vector<1x32x32xf32> to vector<32x32xf32>
    %cst_261 = arith.constant dense<0.000000e+00> : vector<32x32xf32>
    %457 = tpu.matmul %454, %456, %cst_261 {dimension_numbers = #tpu.dot_dimension_numbers<[1], [0], [0], [1], [0, 0, 1, 1], [], []>} : vector<32x32xf32>, vector<32x32xf32>, vector<32x32xf32> -> vector<32x32xf32>
    %458 = arith.addf %449, %457 : vector<32x32xf32>
    %459 = vector.extract_strided_slice %431 {offsets = [0, 3, 0, 0], sizes = [2, 4, 8, 32], strides = [1, 1, 1, 1]} : vector<2x8x8x32xf32> to vector<2x4x8x32xf32>
    %460 = vector.shape_cast %459 : vector<2x4x8x32xf32> to vector<2x2x2x8x32xf32>
    %461 = vector.extract_strided_slice %460 {offsets = [0, 0, 0, 0, 0], sizes = [2, 2, 1, 8, 32], strides = [1, 1, 1, 1, 1]} : vector<2x2x2x8x32xf32> to vector<2x2x1x8x32xf32>
    %462 = vector.shape_cast %461 : vector<2x2x1x8x32xf32> to vector<2x2x8x32xf32>
    %463 = vector.shape_cast %462 : vector<2x2x8x32xf32> to vector<32x32xf32>
    %c15_262 = arith.constant 15 : index
    %c0_263 = arith.constant 0 : index
    %c0_264 = arith.constant 0 : index
    %464 = vector.load %arg6[%c15_262, %c0_263, %c0_264] : memref<16x32x32xf32, #tpu.memory_space<vmem>>, vector<1x32x32xf32>
    %465 = vector.shape_cast %464 : vector<1x32x32xf32> to vector<32x32xf32>
    %cst_265 = arith.constant dense<0.000000e+00> : vector<32x32xf32>
    %466 = tpu.matmul %463, %465, %cst_265 {dimension_numbers = #tpu.dot_dimension_numbers<[1], [0], [0], [1], [0, 0, 1, 1], [], []>} : vector<32x32xf32>, vector<32x32xf32>, vector<32x32xf32> -> vector<32x32xf32>
    %467 = arith.addf %458, %466 : vector<32x32xf32>
    %c0_266 = arith.constant 0 : index
    %c0_267 = arith.constant 0 : index
    %468 = vector.load %arg7[%c0_266, %c0_267] : memref<1x32xf32, #tpu.memory_space<vmem>>, vector<1x32xf32>
    %469 = vector.broadcast %468 : vector<1x32xf32> to vector<32x32xf32>
    %470 = arith.addf %467, %469 : vector<32x32xf32>
    %471 = vector.shape_cast %470 : vector<32x32xf32> to vector<2x2x8x32xf32>
    %472 = vector.extract_strided_slice %471 {offsets = [0, 0, 0, 0], sizes = [2, 2, 2, 32], strides = [1, 1, 1, 1]} : vector<2x2x8x32xf32> to vector<2x2x2x32xf32>
    %c0_268 = arith.constant 0 : index
    %c1_269 = arith.constant 1 : index
    %c8_270 = arith.constant 8 : index
    %c0_271 = arith.constant 0 : index
    %473 = vector.load %arg16[%c0_268, %c1_269, %c8_270, %c0_271] : memref<2x6x32x32xf32, #tpu.memory_space<vmem>>, vector<2x2x2x32xf32>
    tpu.vector_store %arg16[%c0_268, %c1_269, %c8_270, %c0_271], %472 {strides = array<i32>} : memref<2x6x32x32xf32, #tpu.memory_space<vmem>>, vector<2x2x2x32xf32>,
    %cst_272 = arith.constant 0.000000e+00 : f32
    %474 = vector.broadcast %cst_272 : f32 to vector<16x32xf32>
    %c0_273 = arith.constant 0 : index
    %c0_274 = arith.constant 0 : index
    %c7_275 = arith.constant 7 : index
    %c0_276 = arith.constant 0 : index
    %475 = tpu.strided_load %arg16[%c0_273, %c0_274, %c7_275, %c0_276] {strides = array<i32: 1, 1, 2, 1>} : memref<2x6x32x32xf32, #tpu.memory_space<vmem>>, vector<2x6x8x32xf32>
    %476 = vector.extract_strided_slice %475 {offsets = [0, 0, 0, 0], sizes = [2, 2, 8, 32], strides = [1, 1, 1, 1]} : vector<2x6x8x32xf32> to vector<2x2x8x32xf32>
    %477 = vector.shape_cast %476 : vector<2x2x8x32xf32> to vector<2x1x2x8x32xf32>
    %478 = vector.extract_strided_slice %477 {offsets = [0, 0, 0, 0, 0], sizes = [2, 1, 1, 8, 32], strides = [1, 1, 1, 1, 1]} : vector<2x1x2x8x32xf32> to vector<2x1x1x8x32xf32>
    %479 = vector.shape_cast %478 : vector<2x1x1x8x32xf32> to vector<2x1x8x32xf32>
    %480 = vector.shape_cast %479 : vector<2x1x8x32xf32> to vector<16x32xf32>
    %c0_277 = arith.constant 0 : index
    %c0_278 = arith.constant 0 : index
    %c0_279 = arith.constant 0 : index
    %481 = vector.load %arg8[%c0_277, %c0_278, %c0_279] : memref<16x32x32xf32, #tpu.memory_space<vmem>>, vector<1x32x32xf32>
    %482 = vector.shape_cast %481 : vector<1x32x32xf32> to vector<32x32xf32>
    %cst_280 = arith.constant dense<0.000000e+00> : vector<16x32xf32>
    %483 = tpu.matmul %480, %482, %cst_280 {dimension_numbers = #tpu.dot_dimension_numbers<[1], [0], [0], [1], [0, 0, 1, 1], [], []>} : vector<16x32xf32>, vector<32x32xf32>, vector<16x32xf32> -> vector<16x32xf32>
    %484 = arith.addf %474, %483 : vector<16x32xf32>
    %485 = vector.extract_strided_slice %475 {offsets = [0, 1, 0, 0], sizes = [2, 2, 8, 32], strides = [1, 1, 1, 1]} : vector<2x6x8x32xf32> to vector<2x2x8x32xf32>
    %486 = vector.shape_cast %485 : vector<2x2x8x32xf32> to vector<2x1x2x8x32xf32>
    %487 = vector.extract_strided_slice %486 {offsets = [0, 0, 0, 0, 0], sizes = [2, 1, 1, 8, 32], strides = [1, 1, 1, 1, 1]} : vector<2x1x2x8x32xf32> to vector<2x1x1x8x32xf32>
    %488 = vector.shape_cast %487 : vector<2x1x1x8x32xf32> to vector<2x1x8x32xf32>
    %489 = vector.shape_cast %488 : vector<2x1x8x32xf32> to vector<16x32xf32>
    %c4_281 = arith.constant 4 : index
    %c0_282 = arith.constant 0 : index
    %c0_283 = arith.constant 0 : index
    %490 = vector.load %arg8[%c4_281, %c0_282, %c0_283] : memref<16x32x32xf32, #tpu.memory_space<vmem>>, vector<1x32x32xf32>
    %491 = vector.shape_cast %490 : vector<1x32x32xf32> to vector<32x32xf32>
    %cst_284 = arith.constant dense<0.000000e+00> : vector<16x32xf32>
    %492 = tpu.matmul %489, %491, %cst_284 {dimension_numbers = #tpu.dot_dimension_numbers<[1], [0], [0], [1], [0, 0, 1, 1], [], []>} : vector<16x32xf32>, vector<32x32xf32>, vector<16x32xf32> -> vector<16x32xf32>
    %493 = arith.addf %484, %492 : vector<16x32xf32>
    %494 = vector.extract_strided_slice %475 {offsets = [0, 2, 0, 0], sizes = [2, 2, 8, 32], strides = [1, 1, 1, 1]} : vector<2x6x8x32xf32> to vector<2x2x8x32xf32>
    %495 = vector.shape_cast %494 : vector<2x2x8x32xf32> to vector<2x1x2x8x32xf32>
    %496 = vector.extract_strided_slice %495 {offsets = [0, 0, 0, 0, 0], sizes = [2, 1, 1, 8, 32], strides = [1, 1, 1, 1, 1]} : vector<2x1x2x8x32xf32> to vector<2x1x1x8x32xf32>
    %497 = vector.shape_cast %496 : vector<2x1x1x8x32xf32> to vector<2x1x8x32xf32>
    %498 = vector.shape_cast %497 : vector<2x1x8x32xf32> to vector<16x32xf32>
    %c8_285 = arith.constant 8 : index
    %c0_286 = arith.constant 0 : index
    %c0_287 = arith.constant 0 : index
    %499 = vector.load %arg8[%c8_285, %c0_286, %c0_287] : memref<16x32x32xf32, #tpu.memory_space<vmem>>, vector<1x32x32xf32>
    %500 = vector.shape_cast %499 : vector<1x32x32xf32> to vector<32x32xf32>
    %cst_288 = arith.constant dense<0.000000e+00> : vector<16x32xf32>
    %501 = tpu.matmul %498, %500, %cst_288 {dimension_numbers = #tpu.dot_dimension_numbers<[1], [0], [0], [1], [0, 0, 1, 1], [], []>} : vector<16x32xf32>, vector<32x32xf32>, vector<16x32xf32> -> vector<16x32xf32>
    %502 = arith.addf %493, %501 : vector<16x32xf32>
    %503 = vector.extract_strided_slice %475 {offsets = [0, 3, 0, 0], sizes = [2, 2, 8, 32], strides = [1, 1, 1, 1]} : vector<2x6x8x32xf32> to vector<2x2x8x32xf32>
    %504 = vector.shape_cast %503 : vector<2x2x8x32xf32> to vector<2x1x2x8x32xf32>
    %505 = vector.extract_strided_slice %504 {offsets = [0, 0, 0, 0, 0], sizes = [2, 1, 1, 8, 32], strides = [1, 1, 1, 1, 1]} : vector<2x1x2x8x32xf32> to vector<2x1x1x8x32xf32>
    %506 = vector.shape_cast %505 : vector<2x1x1x8x32xf32> to vector<2x1x8x32xf32>
    %507 = vector.shape_cast %506 : vector<2x1x8x32xf32> to vector<16x32xf32>
    %c12_289 = arith.constant 12 : index
    %c0_290 = arith.constant 0 : index
    %c0_291 = arith.constant 0 : index
    %508 = vector.load %arg8[%c12_289, %c0_290, %c0_291] : memref<16x32x32xf32, #tpu.memory_space<vmem>>, vector<1x32x32xf32>
    %509 = vector.shape_cast %508 : vector<1x32x32xf32> to vector<32x32xf32>
    %cst_292 = arith.constant dense<0.000000e+00> : vector<16x32xf32>
    %510 = tpu.matmul %507, %509, %cst_292 {dimension_numbers = #tpu.dot_dimension_numbers<[1], [0], [0], [1], [0, 0, 1, 1], [], []>} : vector<16x32xf32>, vector<32x32xf32>, vector<16x32xf32> -> vector<16x32xf32>
    %511 = arith.addf %502, %510 : vector<16x32xf32>
    %c0_293 = arith.constant 0 : index
    %c0_294 = arith.constant 0 : index
    %c8_295 = arith.constant 8 : index
    %c0_296 = arith.constant 0 : index
    %512 = tpu.strided_load %arg16[%c0_293, %c0_294, %c8_295, %c0_296] {strides = array<i32: 1, 1, 2, 1>} : memref<2x6x32x32xf32, #tpu.memory_space<vmem>>, vector<2x6x8x32xf32>
    %513 = vector.extract_strided_slice %512 {offsets = [0, 0, 0, 0], sizes = [2, 2, 8, 32], strides = [1, 1, 1, 1]} : vector<2x6x8x32xf32> to vector<2x2x8x32xf32>
    %514 = vector.shape_cast %513 : vector<2x2x8x32xf32> to vector<2x1x2x8x32xf32>
    %515 = vector.extract_strided_slice %514 {offsets = [0, 0, 0, 0, 0], sizes = [2, 1, 1, 8, 32], strides = [1, 1, 1, 1, 1]} : vector<2x1x2x8x32xf32> to vector<2x1x1x8x32xf32>
    %516 = vector.shape_cast %515 : vector<2x1x1x8x32xf32> to vector<2x1x8x32xf32>
    %517 = vector.shape_cast %516 : vector<2x1x8x32xf32> to vector<16x32xf32>
    %c1_297 = arith.constant 1 : index
    %c0_298 = arith.constant 0 : index
    %c0_299 = arith.constant 0 : index
    %518 = vector.load %arg8[%c1_297, %c0_298, %c0_299] : memref<16x32x32xf32, #tpu.memory_space<vmem>>, vector<1x32x32xf32>
    %519 = vector.shape_cast %518 : vector<1x32x32xf32> to vector<32x32xf32>
    %cst_300 = arith.constant dense<0.000000e+00> : vector<16x32xf32>
    %520 = tpu.matmul %517, %519, %cst_300 {dimension_numbers = #tpu.dot_dimension_numbers<[1], [0], [0], [1], [0, 0, 1, 1], [], []>} : vector<16x32xf32>, vector<32x32xf32>, vector<16x32xf32> -> vector<16x32xf32>
    %521 = arith.addf %511, %520 : vector<16x32xf32>
    %522 = vector.extract_strided_slice %512 {offsets = [0, 1, 0, 0], sizes = [2, 2, 8, 32], strides = [1, 1, 1, 1]} : vector<2x6x8x32xf32> to vector<2x2x8x32xf32>
    %523 = vector.shape_cast %522 : vector<2x2x8x32xf32> to vector<2x1x2x8x32xf32>
    %524 = vector.extract_strided_slice %523 {offsets = [0, 0, 0, 0, 0], sizes = [2, 1, 1, 8, 32], strides = [1, 1, 1, 1, 1]} : vector<2x1x2x8x32xf32> to vector<2x1x1x8x32xf32>
    %525 = vector.shape_cast %524 : vector<2x1x1x8x32xf32> to vector<2x1x8x32xf32>
    %526 = vector.shape_cast %525 : vector<2x1x8x32xf32> to vector<16x32xf32>
    %c5_301 = arith.constant 5 : index
    %c0_302 = arith.constant 0 : index
    %c0_303 = arith.constant 0 : index
    %527 = vector.load %arg8[%c5_301, %c0_302, %c0_303] : memref<16x32x32xf32, #tpu.memory_space<vmem>>, vector<1x32x32xf32>
    %528 = vector.shape_cast %527 : vector<1x32x32xf32> to vector<32x32xf32>
    %cst_304 = arith.constant dense<0.000000e+00> : vector<16x32xf32>
    %529 = tpu.matmul %526, %528, %cst_304 {dimension_numbers = #tpu.dot_dimension_numbers<[1], [0], [0], [1], [0, 0, 1, 1], [], []>} : vector<16x32xf32>, vector<32x32xf32>, vector<16x32xf32> -> vector<16x32xf32>
    %530 = arith.addf %521, %529 : vector<16x32xf32>
    %531 = vector.extract_strided_slice %512 {offsets = [0, 2, 0, 0], sizes = [2, 2, 8, 32], strides = [1, 1, 1, 1]} : vector<2x6x8x32xf32> to vector<2x2x8x32xf32>
    %532 = vector.shape_cast %531 : vector<2x2x8x32xf32> to vector<2x1x2x8x32xf32>
    %533 = vector.extract_strided_slice %532 {offsets = [0, 0, 0, 0, 0], sizes = [2, 1, 1, 8, 32], strides = [1, 1, 1, 1, 1]} : vector<2x1x2x8x32xf32> to vector<2x1x1x8x32xf32>
    %534 = vector.shape_cast %533 : vector<2x1x1x8x32xf32> to vector<2x1x8x32xf32>
    %535 = vector.shape_cast %534 : vector<2x1x8x32xf32> to vector<16x32xf32>
    %c9_305 = arith.constant 9 : index
    %c0_306 = arith.constant 0 : index
    %c0_307 = arith.constant 0 : index
    %536 = vector.load %arg8[%c9_305, %c0_306, %c0_307] : memref<16x32x32xf32, #tpu.memory_space<vmem>>, vector<1x32x32xf32>
    %537 = vector.shape_cast %536 : vector<1x32x32xf32> to vector<32x32xf32>
    %cst_308 = arith.constant dense<0.000000e+00> : vector<16x32xf32>
    %538 = tpu.matmul %535, %537, %cst_308 {dimension_numbers = #tpu.dot_dimension_numbers<[1], [0], [0], [1], [0, 0, 1, 1], [], []>} : vector<16x32xf32>, vector<32x32xf32>, vector<16x32xf32> -> vector<16x32xf32>
    %539 = arith.addf %530, %538 : vector<16x32xf32>
    %540 = vector.extract_strided_slice %512 {offsets = [0, 3, 0, 0], sizes = [2, 2, 8, 32], strides = [1, 1, 1, 1]} : vector<2x6x8x32xf32> to vector<2x2x8x32xf32>
    %541 = vector.shape_cast %540 : vector<2x2x8x32xf32> to vector<2x1x2x8x32xf32>
    %542 = vector.extract_strided_slice %541 {offsets = [0, 0, 0, 0, 0], sizes = [2, 1, 1, 8, 32], strides = [1, 1, 1, 1, 1]} : vector<2x1x2x8x32xf32> to vector<2x1x1x8x32xf32>
    %543 = vector.shape_cast %542 : vector<2x1x1x8x32xf32> to vector<2x1x8x32xf32>
    %544 = vector.shape_cast %543 : vector<2x1x8x32xf32> to vector<16x32xf32>
    %c13_309 = arith.constant 13 : index
    %c0_310 = arith.constant 0 : index
    %c0_311 = arith.constant 0 : index
    %545 = vector.load %arg8[%c13_309, %c0_310, %c0_311] : memref<16x32x32xf32, #tpu.memory_space<vmem>>, vector<1x32x32xf32>
    %546 = vector.shape_cast %545 : vector<1x32x32xf32> to vector<32x32xf32>
    %cst_312 = arith.constant dense<0.000000e+00> : vector<16x32xf32>
    %547 = tpu.matmul %544, %546, %cst_312 {dimension_numbers = #tpu.dot_dimension_numbers<[1], [0], [0], [1], [0, 0, 1, 1], [], []>} : vector<16x32xf32>, vector<32x32xf32>, vector<16x32xf32> -> vector<16x32xf32>
    %548 = arith.addf %539, %547 : vector<16x32xf32>
    %c0_313 = arith.constant 0 : index
    %c0_314 = arith.constant 0 : index
    %c9_315 = arith.constant 9 : index
    %c0_316 = arith.constant 0 : index
    %549 = tpu.strided_load %arg16[%c0_313, %c0_314, %c9_315, %c0_316] {strides = array<i32: 1, 1, 2, 1>} : memref<2x6x32x32xf32, #tpu.memory_space<vmem>>, vector<2x6x8x32xf32>
    %550 = vector.extract_strided_slice %549 {offsets = [0, 0, 0, 0], sizes = [2, 2, 8, 32], strides = [1, 1, 1, 1]} : vector<2x6x8x32xf32> to vector<2x2x8x32xf32>
    %551 = vector.shape_cast %550 : vector<2x2x8x32xf32> to vector<2x1x2x8x32xf32>
    %552 = vector.extract_strided_slice %551 {offsets = [0, 0, 0, 0, 0], sizes = [2, 1, 1, 8, 32], strides = [1, 1, 1, 1, 1]} : vector<2x1x2x8x32xf32> to vector<2x1x1x8x32xf32>
    %553 = vector.shape_cast %552 : vector<2x1x1x8x32xf32> to vector<2x1x8x32xf32>
    %554 = vector.shape_cast %553 : vector<2x1x8x32xf32> to vector<16x32xf32>
    %c2_317 = arith.constant 2 : index
    %c0_318 = arith.constant 0 : index
    %c0_319 = arith.constant 0 : index
    %555 = vector.load %arg8[%c2_317, %c0_318, %c0_319] : memref<16x32x32xf32, #tpu.memory_space<vmem>>, vector<1x32x32xf32>
    %556 = vector.shape_cast %555 : vector<1x32x32xf32> to vector<32x32xf32>
    %cst_320 = arith.constant dense<0.000000e+00> : vector<16x32xf32>
    %557 = tpu.matmul %554, %556, %cst_320 {dimension_numbers = #tpu.dot_dimension_numbers<[1], [0], [0], [1], [0, 0, 1, 1], [], []>} : vector<16x32xf32>, vector<32x32xf32>, vector<16x32xf32> -> vector<16x32xf32>
    %558 = arith.addf %548, %557 : vector<16x32xf32>
    %559 = vector.extract_strided_slice %549 {offsets = [0, 1, 0, 0], sizes = [2, 2, 8, 32], strides = [1, 1, 1, 1]} : vector<2x6x8x32xf32> to vector<2x2x8x32xf32>
    %560 = vector.shape_cast %559 : vector<2x2x8x32xf32> to vector<2x1x2x8x32xf32>
    %561 = vector.extract_strided_slice %560 {offsets = [0, 0, 0, 0, 0], sizes = [2, 1, 1, 8, 32], strides = [1, 1, 1, 1, 1]} : vector<2x1x2x8x32xf32> to vector<2x1x1x8x32xf32>
    %562 = vector.shape_cast %561 : vector<2x1x1x8x32xf32> to vector<2x1x8x32xf32>
    %563 = vector.shape_cast %562 : vector<2x1x8x32xf32> to vector<16x32xf32>
    %c6_321 = arith.constant 6 : index
    %c0_322 = arith.constant 0 : index
    %c0_323 = arith.constant 0 : index
    %564 = vector.load %arg8[%c6_321, %c0_322, %c0_323] : memref<16x32x32xf32, #tpu.memory_space<vmem>>, vector<1x32x32xf32>
    %565 = vector.shape_cast %564 : vector<1x32x32xf32> to vector<32x32xf32>
    %cst_324 = arith.constant dense<0.000000e+00> : vector<16x32xf32>
    %566 = tpu.matmul %563, %565, %cst_324 {dimension_numbers = #tpu.dot_dimension_numbers<[1], [0], [0], [1], [0, 0, 1, 1], [], []>} : vector<16x32xf32>, vector<32x32xf32>, vector<16x32xf32> -> vector<16x32xf32>
    %567 = arith.addf %558, %566 : vector<16x32xf32>
    %568 = vector.extract_strided_slice %549 {offsets = [0, 2, 0, 0], sizes = [2, 2, 8, 32], strides = [1, 1, 1, 1]} : vector<2x6x8x32xf32> to vector<2x2x8x32xf32>
    %569 = vector.shape_cast %568 : vector<2x2x8x32xf32> to vector<2x1x2x8x32xf32>
    %570 = vector.extract_strided_slice %569 {offsets = [0, 0, 0, 0, 0], sizes = [2, 1, 1, 8, 32], strides = [1, 1, 1, 1, 1]} : vector<2x1x2x8x32xf32> to vector<2x1x1x8x32xf32>
    %571 = vector.shape_cast %570 : vector<2x1x1x8x32xf32> to vector<2x1x8x32xf32>
    %572 = vector.shape_cast %571 : vector<2x1x8x32xf32> to vector<16x32xf32>
    %c10_325 = arith.constant 10 : index
    %c0_326 = arith.constant 0 : index
    %c0_327 = arith.constant 0 : index
    %573 = vector.load %arg8[%c10_325, %c0_326, %c0_327] : memref<16x32x32xf32, #tpu.memory_space<vmem>>, vector<1x32x32xf32>
    %574 = vector.shape_cast %573 : vector<1x32x32xf32> to vector<32x32xf32>
    %cst_328 = arith.constant dense<0.000000e+00> : vector<16x32xf32>
    %575 = tpu.matmul %572, %574, %cst_328 {dimension_numbers = #tpu.dot_dimension_numbers<[1], [0], [0], [1], [0, 0, 1, 1], [], []>} : vector<16x32xf32>, vector<32x32xf32>, vector<16x32xf32> -> vector<16x32xf32>
    %576 = arith.addf %567, %575 : vector<16x32xf32>
    %577 = vector.extract_strided_slice %549 {offsets = [0, 3, 0, 0], sizes = [2, 2, 8, 32], strides = [1, 1, 1, 1]} : vector<2x6x8x32xf32> to vector<2x2x8x32xf32>
    %578 = vector.shape_cast %577 : vector<2x2x8x32xf32> to vector<2x1x2x8x32xf32>
    %579 = vector.extract_strided_slice %578 {offsets = [0, 0, 0, 0, 0], sizes = [2, 1, 1, 8, 32], strides = [1, 1, 1, 1, 1]} : vector<2x1x2x8x32xf32> to vector<2x1x1x8x32xf32>
    %580 = vector.shape_cast %579 : vector<2x1x1x8x32xf32> to vector<2x1x8x32xf32>
    %581 = vector.shape_cast %580 : vector<2x1x8x32xf32> to vector<16x32xf32>
    %c14_329 = arith.constant 14 : index
    %c0_330 = arith.constant 0 : index
    %c0_331 = arith.constant 0 : index
    %582 = vector.load %arg8[%c14_329, %c0_330, %c0_331] : memref<16x32x32xf32, #tpu.memory_space<vmem>>, vector<1x32x32xf32>
    %583 = vector.shape_cast %582 : vector<1x32x32xf32> to vector<32x32xf32>
    %cst_332 = arith.constant dense<0.000000e+00> : vector<16x32xf32>
    %584 = tpu.matmul %581, %583, %cst_332 {dimension_numbers = #tpu.dot_dimension_numbers<[1], [0], [0], [1], [0, 0, 1, 1], [], []>} : vector<16x32xf32>, vector<32x32xf32>, vector<16x32xf32> -> vector<16x32xf32>
    %585 = arith.addf %576, %584 : vector<16x32xf32>
    %c0_333 = arith.constant 0 : index
    %c0_334 = arith.constant 0 : index
    %c10_335 = arith.constant 10 : index
    %c0_336 = arith.constant 0 : index
    %586 = tpu.strided_load %arg16[%c0_333, %c0_334, %c10_335, %c0_336] {strides = array<i32: 1, 1, 2, 1>} : memref<2x6x32x32xf32, #tpu.memory_space<vmem>>, vector<2x6x8x32xf32>
    %587 = vector.extract_strided_slice %586 {offsets = [0, 0, 0, 0], sizes = [2, 2, 8, 32], strides = [1, 1, 1, 1]} : vector<2x6x8x32xf32> to vector<2x2x8x32xf32>
    %588 = vector.shape_cast %587 : vector<2x2x8x32xf32> to vector<2x1x2x8x32xf32>
    %589 = vector.extract_strided_slice %588 {offsets = [0, 0, 0, 0, 0], sizes = [2, 1, 1, 8, 32], strides = [1, 1, 1, 1, 1]} : vector<2x1x2x8x32xf32> to vector<2x1x1x8x32xf32>
    %590 = vector.shape_cast %589 : vector<2x1x1x8x32xf32> to vector<2x1x8x32xf32>
    %591 = vector.shape_cast %590 : vector<2x1x8x32xf32> to vector<16x32xf32>
    %c3_337 = arith.constant 3 : index
    %c0_338 = arith.constant 0 : index
    %c0_339 = arith.constant 0 : index
    %592 = vector.load %arg8[%c3_337, %c0_338, %c0_339] : memref<16x32x32xf32, #tpu.memory_space<vmem>>, vector<1x32x32xf32>
    %593 = vector.shape_cast %592 : vector<1x32x32xf32> to vector<32x32xf32>
    %cst_340 = arith.constant dense<0.000000e+00> : vector<16x32xf32>
    %594 = tpu.matmul %591, %593, %cst_340 {dimension_numbers = #tpu.dot_dimension_numbers<[1], [0], [0], [1], [0, 0, 1, 1], [], []>} : vector<16x32xf32>, vector<32x32xf32>, vector<16x32xf32> -> vector<16x32xf32>
    %595 = arith.addf %585, %594 : vector<16x32xf32>
    %596 = vector.extract_strided_slice %586 {offsets = [0, 1, 0, 0], sizes = [2, 2, 8, 32], strides = [1, 1, 1, 1]} : vector<2x6x8x32xf32> to vector<2x2x8x32xf32>
    %597 = vector.shape_cast %596 : vector<2x2x8x32xf32> to vector<2x1x2x8x32xf32>
    %598 = vector.extract_strided_slice %597 {offsets = [0, 0, 0, 0, 0], sizes = [2, 1, 1, 8, 32], strides = [1, 1, 1, 1, 1]} : vector<2x1x2x8x32xf32> to vector<2x1x1x8x32xf32>
    %599 = vector.shape_cast %598 : vector<2x1x1x8x32xf32> to vector<2x1x8x32xf32>
    %600 = vector.shape_cast %599 : vector<2x1x8x32xf32> to vector<16x32xf32>
    %c7_341 = arith.constant 7 : index
    %c0_342 = arith.constant 0 : index
    %c0_343 = arith.constant 0 : index
    %601 = vector.load %arg8[%c7_341, %c0_342, %c0_343] : memref<16x32x32xf32, #tpu.memory_space<vmem>>, vector<1x32x32xf32>
    %602 = vector.shape_cast %601 : vector<1x32x32xf32> to vector<32x32xf32>
    %cst_344 = arith.constant dense<0.000000e+00> : vector<16x32xf32>
    %603 = tpu.matmul %600, %602, %cst_344 {dimension_numbers = #tpu.dot_dimension_numbers<[1], [0], [0], [1], [0, 0, 1, 1], [], []>} : vector<16x32xf32>, vector<32x32xf32>, vector<16x32xf32> -> vector<16x32xf32>
    %604 = arith.addf %595, %603 : vector<16x32xf32>
    %605 = vector.extract_strided_slice %586 {offsets = [0, 2, 0, 0], sizes = [2, 2, 8, 32], strides = [1, 1, 1, 1]} : vector<2x6x8x32xf32> to vector<2x2x8x32xf32>
    %606 = vector.shape_cast %605 : vector<2x2x8x32xf32> to vector<2x1x2x8x32xf32>
    %607 = vector.extract_strided_slice %606 {offsets = [0, 0, 0, 0, 0], sizes = [2, 1, 1, 8, 32], strides = [1, 1, 1, 1, 1]} : vector<2x1x2x8x32xf32> to vector<2x1x1x8x32xf32>
    %608 = vector.shape_cast %607 : vector<2x1x1x8x32xf32> to vector<2x1x8x32xf32>
    %609 = vector.shape_cast %608 : vector<2x1x8x32xf32> to vector<16x32xf32>
    %c11_345 = arith.constant 11 : index
    %c0_346 = arith.constant 0 : index
    %c0_347 = arith.constant 0 : index
    %610 = vector.load %arg8[%c11_345, %c0_346, %c0_347] : memref<16x32x32xf32, #tpu.memory_space<vmem>>, vector<1x32x32xf32>
    %611 = vector.shape_cast %610 : vector<1x32x32xf32> to vector<32x32xf32>
    %cst_348 = arith.constant dense<0.000000e+00> : vector<16x32xf32>
    %612 = tpu.matmul %609, %611, %cst_348 {dimension_numbers = #tpu.dot_dimension_numbers<[1], [0], [0], [1], [0, 0, 1, 1], [], []>} : vector<16x32xf32>, vector<32x32xf32>, vector<16x32xf32> -> vector<16x32xf32>
    %613 = arith.addf %604, %612 : vector<16x32xf32>
    %614 = vector.extract_strided_slice %586 {offsets = [0, 3, 0, 0], sizes = [2, 2, 8, 32], strides = [1, 1, 1, 1]} : vector<2x6x8x32xf32> to vector<2x2x8x32xf32>
    %615 = vector.shape_cast %614 : vector<2x2x8x32xf32> to vector<2x1x2x8x32xf32>
    %616 = vector.extract_strided_slice %615 {offsets = [0, 0, 0, 0, 0], sizes = [2, 1, 1, 8, 32], strides = [1, 1, 1, 1, 1]} : vector<2x1x2x8x32xf32> to vector<2x1x1x8x32xf32>
    %617 = vector.shape_cast %616 : vector<2x1x1x8x32xf32> to vector<2x1x8x32xf32>
    %618 = vector.shape_cast %617 : vector<2x1x8x32xf32> to vector<16x32xf32>
    %c15_349 = arith.constant 15 : index
    %c0_350 = arith.constant 0 : index
    %c0_351 = arith.constant 0 : index
    %619 = vector.load %arg8[%c15_349, %c0_350, %c0_351] : memref<16x32x32xf32, #tpu.memory_space<vmem>>, vector<1x32x32xf32>
    %620 = vector.shape_cast %619 : vector<1x32x32xf32> to vector<32x32xf32>
    %cst_352 = arith.constant dense<0.000000e+00> : vector<16x32xf32>
    %621 = tpu.matmul %618, %620, %cst_352 {dimension_numbers = #tpu.dot_dimension_numbers<[1], [0], [0], [1], [0, 0, 1, 1], [], []>} : vector<16x32xf32>, vector<32x32xf32>, vector<16x32xf32> -> vector<16x32xf32>
    %622 = arith.addf %613, %621 : vector<16x32xf32>
    %c0_353 = arith.constant 0 : index
    %c0_354 = arith.constant 0 : index
    %623 = vector.load %arg9[%c0_353, %c0_354] : memref<1x32xf32, #tpu.memory_space<vmem>>, vector<1x32xf32>
    %624 = vector.broadcast %623 : vector<1x32xf32> to vector<16x32xf32>
    %625 = arith.addf %622, %624 : vector<16x32xf32>
    %626 = vector.extract_strided_slice %625 {offsets = [0, 0], sizes = [1, 32], strides = [1, 1]} : vector<16x32xf32> to vector<1x32xf32>
    %627 = vector.extract_strided_slice %625 {offsets = [8, 0], sizes = [1, 32], strides = [1, 1]} : vector<16x32xf32> to vector<1x32xf32>
    %628 = tpu.concatenate %626, %627 in 0 : vector<1x32xf32>, vector<1x32xf32> -> vector<2x32xf32>
    %cst_355 = arith.constant dense<0.000000e+00> : vector<2xf32>
    %629 = vector.multi_reduction <add>, %628, %cst_355 [1] : vector<2x32xf32> to vector<2xf32>
    %630 = vector.shape_cast %629 : vector<2xf32> to vector<2x1xf32>
    %cst_356 = arith.constant 3.200000e+01 : f32
    %631 = vector.broadcast %cst_356 : f32 to vector<2x1xf32>
    %632 = arith.divf %630, %631 : vector<2x1xf32>
    %633 = vector.broadcast %632 : vector<2x1xf32> to vector<2x32xf32>
    %634 = arith.subf %628, %633 : vector<2x32xf32>
    %635 = arith.mulf %634, %634 : vector<2x32xf32>
    %cst_357 = arith.constant dense<0.000000e+00> : vector<2xf32>
    %636 = vector.multi_reduction <add>, %635, %cst_357 [1] : vector<2x32xf32> to vector<2xf32>
    %637 = vector.shape_cast %636 : vector<2xf32> to vector<2x1xf32>
    %cst_358 = arith.constant 3.200000e+01 : f32
    %638 = vector.broadcast %cst_358 : f32 to vector<2x1xf32>
    %639 = arith.divf %637, %638 : vector<2x1xf32>
    %cst_359 = arith.constant 9.99999974E-6 : f32
    %640 = vector.broadcast %cst_359 : f32 to vector<2x1xf32>
    %641 = arith.addf %639, %640 : vector<2x1xf32>
    %642 = math.rsqrt %641 : vector<2x1xf32>
    %643 = vector.broadcast %642 : vector<2x1xf32> to vector<2x32xf32>
    %644 = arith.mulf %634, %643 : vector<2x32xf32>
    %c0_360 = arith.constant 0 : index
    %c0_361 = arith.constant 0 : index
    %645 = vector.load %arg10[%c0_360, %c0_361] : memref<1x32xf32, #tpu.memory_space<vmem>>, vector<1x32xf32>
    %646 = vector.broadcast %645 : vector<1x32xf32> to vector<2x32xf32>
    %647 = arith.mulf %644, %646 : vector<2x32xf32>
    %c0_362 = arith.constant 0 : index
    %c0_363 = arith.constant 0 : index
    %648 = vector.load %arg11[%c0_362, %c0_363] : memref<1x32xf32, #tpu.memory_space<vmem>>, vector<1x32xf32>
    %649 = vector.broadcast %648 : vector<1x32xf32> to vector<2x32xf32>
    %650 = arith.addf %647, %649 : vector<2x32xf32>
    %c0_364 = arith.constant 0 : index
    %c0_365 = arith.constant 0 : index
    %651 = vector.load %arg12[%c0_364, %c0_365] : memref<2x32xf32, #tpu.memory_space<vmem>>, vector<2x32xf32>
    tpu.vector_store %arg12[%c0_364, %c0_365], %650 {strides = array<i32>} : memref<2x32xf32, #tpu.memory_space<vmem>>, vector<2x32xf32>,
    return
  }
  func.func @transform_0(%arg0: i32) -> (i32, i32, i32, i32) {
    %c0_i32 = arith.constant 0 : i32
    %c0_i32_0 = arith.constant 0 : i32
    %c0_i32_1 = arith.constant 0 : i32
    %c0_i32_2 = arith.constant 0 : i32
    %c0_i32_3 = arith.constant 0 : i32
    return %c0_i32, %c0_i32_0, %c0_i32_1, %c0_i32_2 : i32, i32, i32, i32
  }
  func.func @transform_1(%arg0: i32) -> (i32, i32, i32) {
    %c0_i32 = arith.constant 0 : i32
    %c0_i32_0 = arith.constant 0 : i32
    %c0_i32_1 = arith.constant 0 : i32
    %c0_i32_2 = arith.constant 0 : i32
    return %c0_i32, %c0_i32_0, %c0_i32_1 : i32, i32, i32
  }
  func.func @transform_2(%arg0: i32) -> (i32, i32) {
    %c0_i32 = arith.constant 0 : i32
    %c0_i32_0 = arith.constant 0 : i32
    %c0_i32_1 = arith.constant 0 : i32
    return %c0_i32, %c0_i32_0 : i32, i32
  }
  func.func @transform_3(%arg0: i32) -> (i32, i32, i32) {
    %c0_i32 = arith.constant 0 : i32
    %c0_i32_0 = arith.constant 0 : i32
    %c0_i32_1 = arith.constant 0 : i32
    %c0_i32_2 = arith.constant 0 : i32
    return %c0_i32, %c0_i32_0, %c0_i32_1 : i32, i32, i32
  }
  func.func @transform_4(%arg0: i32) -> (i32, i32) {
    %c0_i32 = arith.constant 0 : i32
    %c0_i32_0 = arith.constant 0 : i32
    %c0_i32_1 = arith.constant 0 : i32
    return %c0_i32, %c0_i32_0 : i32, i32
  }
  func.func @transform_5(%arg0: i32) -> (i32, i32, i32) {
    %c0_i32 = arith.constant 0 : i32
    %c0_i32_0 = arith.constant 0 : i32
    %c0_i32_1 = arith.constant 0 : i32
    %c0_i32_2 = arith.constant 0 : i32
    return %c0_i32, %c0_i32_0, %c0_i32_1 : i32, i32, i32
  }
  func.func @transform_6(%arg0: i32) -> (i32, i32) {
    %c0_i32 = arith.constant 0 : i32
    %c0_i32_0 = arith.constant 0 : i32
    %c0_i32_1 = arith.constant 0 : i32
    return %c0_i32, %c0_i32_0 : i32, i32
  }
  func.func @transform_7(%arg0: i32) -> (i32, i32, i32) {
    %c0_i32 = arith.constant 0 : i32
    %c0_i32_0 = arith.constant 0 : i32
    %c0_i32_1 = arith.constant 0 : i32
    %c0_i32_2 = arith.constant 0 : i32
    return %c0_i32, %c0_i32_0, %c0_i32_1 : i32, i32, i32
  }
  func.func @transform_8(%arg0: i32) -> (i32, i32) {
    %c0_i32 = arith.constant 0 : i32
    %c0_i32_0 = arith.constant 0 : i32
    %c0_i32_1 = arith.constant 0 : i32
    return %c0_i32, %c0_i32_0 : i32, i32
  }
  func.func @transform_9(%arg0: i32) -> (i32, i32) {
    %c0_i32 = arith.constant 0 : i32
    %c0_i32_0 = arith.constant 0 : i32
    %c0_i32_1 = arith.constant 0 : i32
    return %c0_i32, %c0_i32_0 : i32, i32
  }
  func.func @transform_10(%arg0: i32) -> (i32, i32) {
    %c0_i32 = arith.constant 0 : i32
    %c0_i32_0 = arith.constant 0 : i32
    %c0_i32_1 = arith.constant 0 : i32
    return %c0_i32, %c0_i32_0 : i32, i32
  }
  func.func @transform_11(%arg0: i32) -> (i32, i32) {
    %c0_i32 = arith.constant 0 : i32
    %c0_i32_0 = arith.constant 0 : i32
    %c0_i32_1 = arith.constant 0 : i32
    return %c0_i32, %c0_i32_0 : i32, i32
  }
}

</mosaic_0001>

<bundles_post_ra>
// kernel: tpu_custom_call.1
= control target key start
LH: loop header
LB: loop body
LE: loop exit
PB: predicated region body
PF: predicated region fallthrough
CT: control target
= control target key end

     0   :  { %16 = vsyncpa [#allocation7], 0  ;;  %s14774_s0 = inlined_call_operand.vmem [shape: f32[2,16,16,4], index: 0, kind: input, shape index: {}]   ;;  %s14775_s1 = inlined_call_operand.vmem [shape: f32[16,4,32], index: 1, kind: input, shape index: {}]   ;;  %s14776_s2 = inlined_call_operand.vmem [shape: f32[1,32], index: 2, kind: input, shape index: {}]   ;;  %s14777_s3 = inlined_call_operand.vmem [shape: f32[16,32,32], index: 3, kind: input, shape index: {}]   ;;  %s14778_s4 = inlined_call_operand.vmem [shape: f32[1,32], index: 4, kind: input, shape index: {}]   ;;  %s14779_s5 = inlined_call_operand.hbm [shape: f32[16,32,32], index: 5, kind: input, shape index: {}]   ;;  %s14780_s6 = inlined_call_operand.vmem [shape: f32[1,32], index: 6, kind: input, shape index: {}]   ;;  %s14781_s7 = inlined_call_operand.hbm [shape: f32[16,32,32], index: 7, kind: input, shape index: {}]   ;;  %s14782_s8 = inlined_call_operand.vmem [shape: f32[1,32], index: 8, kind: input, shape index: {}]   ;;  %s14783_s9 = inlined_call_operand.vmem [shape: f32[1,32], index: 9, kind: input, shape index: {}]   ;;  %s14784_s10 = inlined_call_operand.vmem [shape: f32[1,32], index: 10, kind: input, shape index: {}]   ;;  %s14785_s11 = inlined_call_operand.hbm [shape: f32[2,32], index: 11, kind: output, shape index: {}]  }
   0x1   :  { %17 = vsyncpa [#allocation10], 0 }
   0x2   :  { %18 = vsyncpa [#allocation8], 0  ;;  %s12841_s17 = smov [#allocation6]   ;;  %s12769_s21 = scalar_lea.hbm %s14779_s5, 8192 }
   0x3   :  { %s34_s18 = sshll.u32 %s12841_s17, 4  ;;  %p12770_p0 = scmp.ne.s32.totalorder %s14779_s5, %s12769_s21  ;;  %s35_s18 = int_to_ptr.vmem [resolvable:$true] %s34_s18 }
   0x4   :  { %p12773_p1 = scmp.lt.u32.totalorder %s12769_s21, %s14779_s5 }
   0x6   :  { %p12775_p2 = pnand %p12773_p1, %p12770_p0 }
   0x8   :  { %12778 = shalt.err (!%p12775_p2)
}
   0x9   :  { %s12779_s26 = scalar_lea.vmem %s35_s18, 8192  ;;  %p12784_p4 = scmp.lt.s32.totalorder %s35_s18, %s35_s18 }
   0xa   :  { %p12780_p3 = scmp.ne.s32.totalorder %s35_s18, %s12779_s26  ;;  %p12785_p5 = scmp.lt.s32.totalorder %s12779_s26, %s12779_s26 }
   0xc   :  { %p12786_p6 = por %p12785_p5, %p12784_p4 }
   0xe   :  { %p12787_p7 = pnand %p12786_p6, %p12780_p3 }
  0x10   :  { %12790 = shalt.err (!%p12787_p7)
}
  0x11   :  { %s12842_s27 = smov 128   ;;  %s12843_s28 = smov 8  }
  0x12   :  { %40 = dma.hbm_to_vmem [thread:$0]  %s14779_s5, 8192, %s35_s18, [#allocation7], %s12842_s27, %s12842_s27, %s12843_s28  }
  0x13   :  { %s12844_s12 = smov [#allocation9]   ;;  %s12791_s16 = scalar_lea.hbm %s14781_s7, 8192 }
  0x14   :  { %s48_s13 = sshll.u32 %s12844_s12, 4  ;;  %p12792_p8 = scmp.ne.s32.totalorder %s14781_s7, %s12791_s16  ;;  %s49_s13 = int_to_ptr.vmem [resolvable:$true] %s48_s13 }
  0x15   :  { %p12795_p9 = scmp.lt.u32.totalorder %s12791_s16, %s14781_s7 }
  0x17   :  { %p12797_p10 = pnand %p12795_p9, %p12792_p8 }
  0x19   :  { %12800 = shalt.err (!%p12797_p10)
}
  0x1a   :  { %s12801_s22 = scalar_lea.vmem %s49_s13, 8192  ;;  %p12806_p12 = scmp.lt.s32.totalorder %s49_s13, %s49_s13 }
  0x1b   :  { %p12802_p11 = scmp.ne.s32.totalorder %s49_s13, %s12801_s22  ;;  %p12807_p13 = scmp.lt.s32.totalorder %s12801_s22, %s12801_s22 }
  0x1d   :  { %p12808_p0 = por %p12807_p13, %p12806_p12 }
  0x1f   :  { %p12809_p1 = pnand %p12808_p0, %p12802_p11 }
  0x21   :  { %12812 = shalt.err (!%p12809_p1)
}
  0x22   :  { %54 = dma.hbm_to_vmem [thread:$0]  %s14781_s7, 8192, %s49_s13, [#allocation10], %s12842_s27, %s12842_s27, %s12843_s28  }
  0x23   :  { %12835 = dma.done.wait [#allocation7], 8192  }
  0x24   :  { %12836 = vsyncadd [#allocation7], 4294959104 }
  0x25   :  { %12837 = dma.done.wait [#allocation10], 8192  }
  0x26   :  { %12838 = vsyncadd [#allocation10], 4294959104  ;;  %vm67_vm0 = vcmask 31744   ;;  %vm228_vm1 = vcmask 261120   ;;  %v12845_v0 = vmov 0.0   ;;  %vm689_vm2 = vcmask 1043456  }
  0x27   :  { %68 = vst.msk [vmem:[#allocation2] sm:$0xff] %vm67_vm0, %v12845_v0  ;;  %69 = vst.msk [vmem:[#allocation2 + $0x8] sm:$0xff] %vm67_vm0, %v12845_v0  ;;  %v9526_v1 = vld [vmem:[%s14775_s1 + $0x10] sm:$0xf]  ;;  %v437_v2 = vld [vmem:[%s14774_s0] sm:$0xff]  ;;  %vm6237_vm3 = vcmask 257024  }
  0x28   :  { %70 = vst.msk [vmem:[#allocation2 + $0x10] sm:$0xff] %vm67_vm0, %v12845_v0  ;;  %71 = vst.msk [vmem:[#allocation2 + $0x18] sm:$0xff] %vm67_vm0, %v12845_v0  ;;  %v438_v3 = vld [vmem:[%s14774_s0 + $0x8] sm:$0xff]  ;;  %10791 = vmatprep.subr.msk.mxu0 %vm689_vm2, %v9526_v1  ;;  %v638_v4 = vld [vmem:[%s14775_s1] sm:$0xf]  ;;  %vm7993_vm4 = vcmask 254976  }
  0x29   :  { %72 = vst.msk [vmem:[#allocation2 + $0x20] sm:$0xff] %vm67_vm0, %v12845_v0  ;;  %73 = vst.msk [vmem:[#allocation2 + $0x28] sm:$0xff] %vm67_vm0, %v12845_v0  ;;  %v441_v5 = vld [vmem:[%s14774_s0 + $0x20] sm:$0xff]  ;;  %v442_v6 = vld [vmem:[%s14774_s0 + $0x28] sm:$0xff]  ;;  %10792 = vmatpush3.msk.msra.mxu0 %vm689_vm2, %v9526_v1  ;;  %vm9477_vm5 = vcmask 1040384   ;;  %s12846_s26 = smov [#allocation11]  }
  0x2a   :  { %74 = vst.msk [vmem:[#allocation2 + $0x30] sm:$0xff] %vm67_vm0, %v12845_v0  ;;  %75 = vst.msk [vmem:[#allocation2 + $0x38] sm:$0xff] %vm67_vm0, %v12845_v0  ;;  %v445_v7 = vld [vmem:[%s14774_s0 + $0x40] sm:$0xff]  ;;  %v446_v8 = vld [vmem:[%s14774_s0 + $0x48] sm:$0xff]  ;;  %10817 = vmatprep.subr.msk.mxu0 %vm689_vm2, %v638_v4  ;;  %s9516_s27 = sshll.u32 %s12846_s26, 4  ;;  %s9517_s27 = int_to_ptr.vmem [resolvable:$true] %s9516_s27 }
  0x2b   :  { %76 = vst.msk [vmem:[#allocation2 + $0x40] sm:$0xff] %vm67_vm0, %v12845_v0  ;;  %77 = vst.msk [vmem:[#allocation2 + $0x48] sm:$0xff] %vm67_vm0, %v12845_v0  ;;  %v449_v9 = vld [vmem:[%s14774_s0 + $0x60] sm:$0xff]  ;;  %v450_v10 = vld [vmem:[%s14774_s0 + $0x68] sm:$0xff]  ;;  %s12813_s28 = scalar_lea.vmem %s9517_s27, 32  ;;  %p12818_p3 = scmp.lt.s32.totalorder %s9517_s27, %s9517_s27 }
  0x2c   :  { %78 = vst.msk [vmem:[#allocation2 + $0x50] sm:$0xff] %vm67_vm0, %v12845_v0  ;;  %79 = vst.msk [vmem:[#allocation2 + $0x58] sm:$0xff] %vm67_vm0, %v12845_v0  ;;  %v453_v11 = vld [vmem:[%s14774_s0 + $0x80] sm:$0xff]  ;;  %v454_v12 = vld [vmem:[%s14774_s0 + $0x88] sm:$0xff]  ;;  %p12814_p2 = scmp.ne.s32.totalorder %s9517_s27, %s12813_s28  ;;  %p12819_p4 = scmp.lt.s32.totalorder %s12813_s28, %s12813_s28 }
  0x2d   :  { %80 = vst.msk [vmem:[#allocation2 + $0x60] sm:$0xff] %vm67_vm0, %v12845_v0  ;;  %81 = vst.msk [vmem:[#allocation2 + $0x68] sm:$0xff] %vm67_vm0, %v12845_v0  ;;  %v457_v13 = vld [vmem:[%s14774_s0 + $0xa0] sm:$0xff]  ;;  %v458_v14 = vld [vmem:[%s14774_s0 + $0xa8] sm:$0xff] }
  0x2e   :  { %82 = vst.msk [vmem:[#allocation2 + $0x70] sm:$0xff] %vm67_vm0, %v12845_v0  ;;  %83 = vst.msk [vmem:[#allocation2 + $0x78] sm:$0xff] %vm67_vm0, %v12845_v0  ;;  %v461_v15 = vld [vmem:[%s14774_s0 + $0xc0] sm:$0xff]  ;;  %v462_v16 = vld [vmem:[%s14774_s0 + $0xc8] sm:$0xff]  ;;  %p12820_p5 = por %p12819_p4, %p12818_p3 }
  0x2f   :  { %84 = vst.msk [vmem:[#allocation2 + $0x80] sm:$0xff] %vm67_vm0, %v12845_v0  ;;  %85 = vst.msk [vmem:[#allocation2 + $0x88] sm:$0xff] %vm67_vm0, %v12845_v0  ;;  %v465_v17 = vld [vmem:[%s14774_s0 + $0xe0] sm:$0xff]  ;;  %v466_v18 = vld [vmem:[%s14774_s0 + $0xe8] sm:$0xff] }
  0x30   :  { %86 = vst.msk [vmem:[#allocation2 + $0x90] sm:$0xff] %vm67_vm0, %v12845_v0  ;;  %87 = vst.msk [vmem:[#allocation2 + $0x98] sm:$0xff] %vm67_vm0, %v12845_v0  ;;  %v469_v19 = vld [vmem:[%s14774_s0 + $0x100] sm:$0xff]  ;;  %v470_v20 = vld [vmem:[%s14774_s0 + $0x108] sm:$0xff]  ;;  %p12821_p6 = pnand %p12820_p5, %p12814_p2 }
  0x31   :  { %88 = vst.msk [vmem:[#allocation2 + $0xa0] sm:$0xff] %vm67_vm0, %v12845_v0  ;;  %89 = vst.msk [vmem:[#allocation2 + $0xa8] sm:$0xff] %vm67_vm0, %v12845_v0  ;;  %v473_v21 = vld [vmem:[%s14774_s0 + $0x120] sm:$0xff]  ;;  %v474_v22 = vld [vmem:[%s14774_s0 + $0x128] sm:$0xff] }
  0x32   :  { %90 = vst.msk [vmem:[#allocation2 + $0xb0] sm:$0xff] %vm67_vm0, %v12845_v0  ;;  %91 = vst.msk [vmem:[#allocation2 + $0xb8] sm:$0xff] %vm67_vm0, %v12845_v0  ;;  %v477_v23 = vld [vmem:[%s14774_s0 + $0x140] sm:$0xff]  ;;  %v478_v24 = vld [vmem:[%s14774_s0 + $0x148] sm:$0xff] }
  0x33   :  { %92 = vst.msk [vmem:[#allocation2 + $0xc0] sm:$0xff] %vm67_vm0, %v12845_v0  ;;  %93 = vst.msk [vmem:[#allocation2 + $0xc8] sm:$0xff] %vm67_vm0, %v12845_v0  ;;  %v481_v26 = vld [vmem:[%s14774_s0 + $0x160] sm:$0xff]  ;;  %v482_v27 = vld [vmem:[%s14774_s0 + $0x168] sm:$0xff] }
  0x34   :  { %94 = vst.msk [vmem:[#allocation2 + $0xd0] sm:$0xff] %vm67_vm0, %v12845_v0  ;;  %95 = vst.msk [vmem:[#allocation2 + $0xd8] sm:$0xff] %vm67_vm0, %v12845_v0  ;;  %v485_v29 = vld [vmem:[%s14774_s0 + $0x180] sm:$0xff]  ;;  %v486_v30 = vld [vmem:[%s14774_s0 + $0x188] sm:$0xff] }
  0x35   :  { %96 = vst.msk [vmem:[#allocation2 + $0xe0] sm:$0xff] %vm67_vm0, %v12845_v0  ;;  %97 = vst.msk [vmem:[#allocation2 + $0xe8] sm:$0xff] %vm67_vm0, %v12845_v0  ;;  %v489_v32 = vld [vmem:[%s14774_s0 + $0x1a0] sm:$0xff]  ;;  %v490_v33 = vld [vmem:[%s14774_s0 + $0x1a8] sm:$0xff] }
  0x36   :  { %98 = vst.msk [vmem:[#allocation2 + $0xf0] sm:$0xff] %vm67_vm0, %v12845_v0  ;;  %99 = vst.msk [vmem:[#allocation2 + $0xf8] sm:$0xff] %vm67_vm0, %v12845_v0  ;;  %v493_v35 = vld [vmem:[%s14774_s0 + $0x1c0] sm:$0xff]  ;;  %v494_v37 = vld [vmem:[%s14774_s0 + $0x1c8] sm:$0xff] }
  0x37   :  { %100 = vst.msk [vmem:[#allocation2 + $0x100] sm:$0xff] %vm67_vm0, %v12845_v0  ;;  %101 = vst.msk [vmem:[#allocation2 + $0x108] sm:$0xff] %vm67_vm0, %v12845_v0  ;;  %v497_v38 = vld [vmem:[%s14774_s0 + $0x1e0] sm:$0xff]  ;;  %v498_v39 = vld [vmem:[%s14774_s0 + $0x1e8] sm:$0xff] }
  0x38   :  { %102 = vst.msk [vmem:[#allocation2 + $0x110] sm:$0xff] %vm67_vm0, %v12845_v0  ;;  %103 = vst.msk [vmem:[#allocation2 + $0x118] sm:$0xff] %vm67_vm0, %v12845_v0  ;;  %v13695_v40 = vld [vmem:[%s14775_s1 + $0x20] sm:$0xf]  ;;  %v439_v42 = vld [vmem:[%s14774_s0 + $0x10] sm:$0xff] }
  0x39   :  { %104 = vst.msk [vmem:[#allocation2 + $0x120] sm:$0xff] %vm67_vm0, %v12845_v0  ;;  %105 = vst.msk [vmem:[#allocation2 + $0x128] sm:$0xff] %vm67_vm0, %v12845_v0  ;;  %v440_v44 = vld [vmem:[%s14774_s0 + $0x18] sm:$0xff]  ;;  %v443_v45 = vld [vmem:[%s14774_s0 + $0x30] sm:$0xff] }
  0x3a   :  { %106 = vst.msk [vmem:[#allocation2 + $0x130] sm:$0xff] %vm67_vm0, %v12845_v0  ;;  %107 = vst.msk [vmem:[#allocation2 + $0x138] sm:$0xff] %vm67_vm0, %v12845_v0  ;;  %v444_v46 = vld [vmem:[%s14774_s0 + $0x38] sm:$0xff]  ;;  %v447_v47 = vld [vmem:[%s14774_s0 + $0x50] sm:$0xff] }
  0x3b   :  { %108 = vst.msk [vmem:[#allocation2 + $0x140] sm:$0xff] %vm67_vm0, %v12845_v0  ;;  %109 = vst.msk [vmem:[#allocation2 + $0x148] sm:$0xff] %vm67_vm0, %v12845_v0  ;;  %v448_v49 = vld [vmem:[%s14774_s0 + $0x58] sm:$0xff]  ;;  %v451_v50 = vld [vmem:[%s14774_s0 + $0x70] sm:$0xff] }
  0x3c   :  { %110 = vst.msk [vmem:[#allocation2 + $0x150] sm:$0xff] %vm67_vm0, %v12845_v0  ;;  %111 = vst.msk [vmem:[#allocation2 + $0x158] sm:$0xff] %vm67_vm0, %v12845_v0  ;;  %v452_v51 = vld [vmem:[%s14774_s0 + $0x78] sm:$0xff]  ;;  %v455_v52 = vld [vmem:[%s14774_s0 + $0x90] sm:$0xff] }
  0x3d   :  { %112 = vst.msk [vmem:[#allocation2 + $0x160] sm:$0xff] %vm67_vm0, %v12845_v0  ;;  %113 = vst.msk [vmem:[#allocation2 + $0x168] sm:$0xff] %vm67_vm0, %v12845_v0  ;;  %v456_v53 = vld [vmem:[%s14774_s0 + $0x98] sm:$0xff]  ;;  %v459_v55 = vld [vmem:[%s14774_s0 + $0xb0] sm:$0xff] }
  0x3e   :  { %114 = vst.msk [vmem:[#allocation2 + $0x170] sm:$0xff] %vm67_vm0, %v12845_v0  ;;  %115 = vst.msk [vmem:[#allocation2 + $0x178] sm:$0xff] %vm67_vm0, %v12845_v0  ;;  %v460_v56 = vld [vmem:[%s14774_s0 + $0xb8] sm:$0xff]  ;;  %v463_v57 = vld [vmem:[%s14774_s0 + $0xd0] sm:$0xff] }
  0x3f   :  { %116 = vst.msk [vmem:[#allocation2 + $0x180] sm:$0xff] %vm67_vm0, %v12845_v0  ;;  %117 = vst.msk [vmem:[#allocation2 + $0x188] sm:$0xff] %vm67_vm0, %v12845_v0  ;;  %v464_v58 = vld [vmem:[%s14774_s0 + $0xd8] sm:$0xff]  ;;  %v471_v60 = vld [vmem:[%s14774_s0 + $0x110] sm:$0xff] }
  0x40   :  { %118 = vst.msk [vmem:[#allocation2 + $0x190] sm:$0xff] %vm67_vm0, %v12845_v0  ;;  %119 = vst.msk [vmem:[#allocation2 + $0x198] sm:$0xff] %vm67_vm0, %v12845_v0  ;;  %v472_v61 = vld [vmem:[%s14774_s0 + $0x118] sm:$0xff]  ;;  %v475_v62 = vld [vmem:[%s14774_s0 + $0x130] sm:$0xff] }
  0x41   :  { %120 = vst.msk [vmem:[#allocation2 + $0x1a0] sm:$0xff] %vm67_vm0, %v12845_v0  ;;  %121 = vst.msk [vmem:[#allocation2 + $0x1a8] sm:$0xff] %vm67_vm0, %v12845_v0  ;;  %v476_v63 = vld [vmem:[%s14774_s0 + $0x138] sm:$0xff] }
  0x42   :  { %122 = vst.msk [vmem:[#allocation2 + $0x1b0] sm:$0xff] %vm67_vm0, %v12845_v0  ;;  %123 = vst.msk [vmem:[#allocation2 + $0x1b8] sm:$0xff] %vm67_vm0, %v12845_v0 }
  0x43   :  { %124 = vst.msk [vmem:[#allocation2 + $0x1c0] sm:$0xff] %vm67_vm0, %v12845_v0  ;;  %125 = vst.msk [vmem:[#allocation2 + $0x1c8] sm:$0xff] %vm67_vm0, %v12845_v0 }
  0x44   :  { %126 = vst.msk [vmem:[#allocation2 + $0x1d0] sm:$0xff] %vm67_vm0, %v12845_v0  ;;  %127 = vst.msk [vmem:[#allocation2 + $0x1d8] sm:$0xff] %vm67_vm0, %v12845_v0 }
  0x45   :  { %128 = vst.msk [vmem:[#allocation2 + $0x1e0] sm:$0xff] %vm67_vm0, %v12845_v0  ;;  %129 = vst.msk [vmem:[#allocation2 + $0x1e8] sm:$0xff] %vm67_vm0, %v12845_v0 }
  0x46   :  { %130 = vst.msk [vmem:[#allocation2 + $0x1f0] sm:$0xff] %vm67_vm0, %v12845_v0  ;;  %131 = vst.msk [vmem:[#allocation2 + $0x1f8] sm:$0xff] %vm67_vm0, %v12845_v0 }
  0x47   :  { %132 = vst.msk [vmem:[#allocation2 + $0x200] sm:$0xff] %vm67_vm0, %v12845_v0  ;;  %133 = vst.msk [vmem:[#allocation2 + $0x208] sm:$0xff] %vm67_vm0, %v12845_v0 }
  0x48   :  { %134 = vst.msk [vmem:[#allocation2 + $0x210] sm:$0xff] %vm67_vm0, %v12845_v0  ;;  %135 = vst.msk [vmem:[#allocation2 + $0x218] sm:$0xff] %vm67_vm0, %v12845_v0 }
  0x49   :  { %136 = vst.msk [vmem:[#allocation2 + $0x220] sm:$0xff] %vm67_vm0, %v12845_v0  ;;  %137 = vst.msk [vmem:[#allocation2 + $0x228] sm:$0xff] %vm67_vm0, %v12845_v0 }
  0x4a   :  { %138 = vst.msk [vmem:[#allocation2 + $0x230] sm:$0xff] %vm67_vm0, %v12845_v0  ;;  %139 = vst.msk [vmem:[#allocation2 + $0x238] sm:$0xff] %vm67_vm0, %v12845_v0 }
  0x4b   :  { %148 = vst.msk [vmem:[#allocation2 + $0x280] sm:$0xff] %vm67_vm0, %v12845_v0  ;;  %149 = vst.msk [vmem:[#allocation2 + $0x288] sm:$0xff] %vm67_vm0, %v12845_v0 }
  0x4c   :  { %150 = vst.msk [vmem:[#allocation2 + $0x290] sm:$0xff] %vm67_vm0, %v12845_v0  ;;  %151 = vst.msk [vmem:[#allocation2 + $0x298] sm:$0xff] %vm67_vm0, %v12845_v0 }
  0x4d   :  { %152 = vst.msk [vmem:[#allocation2 + $0x2a0] sm:$0xff] %vm67_vm0, %v12845_v0  ;;  %153 = vst.msk [vmem:[#allocation2 + $0x2a8] sm:$0xff] %vm67_vm0, %v12845_v0 }
  0x4e   :  { %154 = vst.msk [vmem:[#allocation2 + $0x2b0] sm:$0xff] %vm67_vm0, %v12845_v0  ;;  %155 = vst.msk [vmem:[#allocation2 + $0x2b8] sm:$0xff] %vm67_vm0, %v12845_v0 }
  0x4f   :  { %156 = vst.msk [vmem:[#allocation2 + $0x2c0] sm:$0xff] %vm67_vm0, %v12845_v0  ;;  %157 = vst.msk [vmem:[#allocation2 + $0x2c8] sm:$0xff] %vm67_vm0, %v12845_v0 }
  0x50   :  { %158 = vst.msk [vmem:[#allocation2 + $0x2d0] sm:$0xff] %vm67_vm0, %v12845_v0  ;;  %159 = vst.msk [vmem:[#allocation2 + $0x2d8] sm:$0xff] %vm67_vm0, %v12845_v0 }
  0x51   :  { %160 = vst.msk [vmem:[#allocation2 + $0x2e0] sm:$0xff] %vm67_vm0, %v12845_v0  ;;  %161 = vst.msk [vmem:[#allocation2 + $0x2e8] sm:$0xff] %vm67_vm0, %v12845_v0 }
  0x52   :  { %162 = vst.msk [vmem:[#allocation2 + $0x2f0] sm:$0xff] %vm67_vm0, %v12845_v0  ;;  %163 = vst.msk [vmem:[#allocation2 + $0x2f8] sm:$0xff] %vm67_vm0, %v12845_v0 }
  0x53   :  { %164 = vst.msk [vmem:[#allocation2 + $0x300] sm:$0xff] %vm67_vm0, %v12845_v0  ;;  %165 = vst.msk [vmem:[#allocation2 + $0x308] sm:$0xff] %vm67_vm0, %v12845_v0 }
  0x54   :  { %166 = vst.msk [vmem:[#allocation2 + $0x310] sm:$0xff] %vm67_vm0, %v12845_v0  ;;  %167 = vst.msk [vmem:[#allocation2 + $0x318] sm:$0xff] %vm67_vm0, %v12845_v0 }
  0x55   :  { %168 = vst.msk [vmem:[#allocation2 + $0x320] sm:$0xff] %vm67_vm0, %v12845_v0  ;;  %169 = vst.msk [vmem:[#allocation2 + $0x328] sm:$0xff] %vm67_vm0, %v12845_v0 }
  0x56   :  { %170 = vst.msk [vmem:[#allocation2 + $0x330] sm:$0xff] %vm67_vm0, %v12845_v0  ;;  %171 = vst.msk [vmem:[#allocation2 + $0x338] sm:$0xff] %vm67_vm0, %v12845_v0 }
  0x57   :  { %172 = vst.msk [vmem:[#allocation2 + $0x340] sm:$0xff] %vm67_vm0, %v12845_v0  ;;  %173 = vst.msk [vmem:[#allocation2 + $0x348] sm:$0xff] %vm67_vm0, %v12845_v0 }
  0x58   :  { %174 = vst.msk [vmem:[#allocation2 + $0x350] sm:$0xff] %vm67_vm0, %v12845_v0  ;;  %175 = vst.msk [vmem:[#allocation2 + $0x358] sm:$0xff] %vm67_vm0, %v12845_v0 }
  0x59   :  { %176 = vst.msk [vmem:[#allocation2 + $0x360] sm:$0xff] %vm67_vm0, %v12845_v0  ;;  %177 = vst.msk [vmem:[#allocation2 + $0x368] sm:$0xff] %vm67_vm0, %v12845_v0 }
  0x5a   :  { %178 = vst.msk [vmem:[#allocation2 + $0x370] sm:$0xff] %vm67_vm0, %v12845_v0  ;;  %179 = vst.msk [vmem:[#allocation2 + $0x378] sm:$0xff] %vm67_vm0, %v12845_v0 }
  0x5b   :  { %180 = vst.msk [vmem:[#allocation2 + $0x380] sm:$0xff] %vm67_vm0, %v12845_v0  ;;  %181 = vst.msk [vmem:[#allocation2 + $0x388] sm:$0xff] %vm67_vm0, %v12845_v0 }
  0x5c   :  { %182 = vst.msk [vmem:[#allocation2 + $0x390] sm:$0xff] %vm67_vm0, %v12845_v0  ;;  %183 = vst.msk [vmem:[#allocation2 + $0x398] sm:$0xff] %vm67_vm0, %v12845_v0 }
  0x5d   :  { %184 = vst.msk [vmem:[#allocation2 + $0x3a0] sm:$0xff] %vm67_vm0, %v12845_v0  ;;  %185 = vst.msk [vmem:[#allocation2 + $0x3a8] sm:$0xff] %vm67_vm0, %v12845_v0 }
  0x5e   :  { %186 = vst.msk [vmem:[#allocation2 + $0x3b0] sm:$0xff] %vm67_vm0, %v12845_v0  ;;  %187 = vst.msk [vmem:[#allocation2 + $0x3b8] sm:$0xff] %vm67_vm0, %v12845_v0 }
  0x5f   :  { %188 = vst.msk [vmem:[#allocation2 + $0x3c0] sm:$0xff] %vm67_vm0, %v12845_v0  ;;  %189 = vst.msk [vmem:[#allocation2 + $0x3c8] sm:$0xff] %vm67_vm0, %v12845_v0 }
  0x60   :  { %190 = vst.msk [vmem:[#allocation2 + $0x3d0] sm:$0xff] %vm67_vm0, %v12845_v0  ;;  %191 = vst.msk [vmem:[#allocation2 + $0x3d8] sm:$0xff] %vm67_vm0, %v12845_v0 }
  0x61   :  { %192 = vst.msk [vmem:[#allocation2 + $0x3e0] sm:$0xff] %vm67_vm0, %v12845_v0  ;;  %193 = vst.msk [vmem:[#allocation2 + $0x3e8] sm:$0xff] %vm67_vm0, %v12845_v0 }
  0x62   :  { %194 = vst.msk [vmem:[#allocation2 + $0x3f0] sm:$0xff] %vm67_vm0, %v12845_v0  ;;  %195 = vst.msk [vmem:[#allocation2 + $0x3f8] sm:$0xff] %vm67_vm0, %v12845_v0 }
  0x63   :  { %196 = vst.msk [vmem:[#allocation2 + $0x400] sm:$0xff] %vm67_vm0, %v12845_v0  ;;  %197 = vst.msk [vmem:[#allocation2 + $0x408] sm:$0xff] %vm67_vm0, %v12845_v0 }
  0x64   :  { %198 = vst.msk [vmem:[#allocation2 + $0x410] sm:$0xff] %vm67_vm0, %v12845_v0  ;;  %199 = vst.msk [vmem:[#allocation2 + $0x418] sm:$0xff] %vm67_vm0, %v12845_v0 }
  0x65   :  { %200 = vst.msk [vmem:[#allocation2 + $0x420] sm:$0xff] %vm67_vm0, %v12845_v0  ;;  %201 = vst.msk [vmem:[#allocation2 + $0x428] sm:$0xff] %vm67_vm0, %v12845_v0 }
  0x66   :  { %202 = vst.msk [vmem:[#allocation2 + $0x430] sm:$0xff] %vm67_vm0, %v12845_v0  ;;  %203 = vst.msk [vmem:[#allocation2 + $0x438] sm:$0xff] %vm67_vm0, %v12845_v0 }
  0x67   :  { %204 = vst.msk [vmem:[#allocation2 + $0x440] sm:$0xff] %vm67_vm0, %v12845_v0  ;;  %205 = vst.msk [vmem:[#allocation2 + $0x448] sm:$0xff] %vm67_vm0, %v12845_v0 }
  0x68   :  { %206 = vst.msk [vmem:[#allocation2 + $0x450] sm:$0xff] %vm67_vm0, %v12845_v0  ;;  %207 = vst.msk [vmem:[#allocation2 + $0x458] sm:$0xff] %vm67_vm0, %v12845_v0 }
  0x69   :  { %208 = vst.msk [vmem:[#allocation2 + $0x460] sm:$0xff] %vm67_vm0, %v12845_v0  ;;  %209 = vst.msk [vmem:[#allocation2 + $0x468] sm:$0xff] %vm67_vm0, %v12845_v0 }
  0x6a   :  { %210 = vst.msk [vmem:[#allocation2 + $0x470] sm:$0xff] %vm67_vm0, %v12845_v0  ;;  %211 = vst.msk [vmem:[#allocation2 + $0x478] sm:$0xff] %vm67_vm0, %v12845_v0 }
  0x6b   :  { %212 = vst.msk [vmem:[#allocation2 + $0x480] sm:$0xff] %vm67_vm0, %v12845_v0  ;;  %213 = vst.msk [vmem:[#allocation2 + $0x488] sm:$0xff] %vm67_vm0, %v12845_v0 }
  0x6c   :  { %214 = vst.msk [vmem:[#allocation2 + $0x490] sm:$0xff] %vm67_vm0, %v12845_v0  ;;  %215 = vst.msk [vmem:[#allocation2 + $0x498] sm:$0xff] %vm67_vm0, %v12845_v0 }
  0x6d   :  { %216 = vst.msk [vmem:[#allocation2 + $0x4a0] sm:$0xff] %vm67_vm0, %v12845_v0  ;;  %217 = vst.msk [vmem:[#allocation2 + $0x4a8] sm:$0xff] %vm67_vm0, %v12845_v0 }
  0x6e   :  { %218 = vst.msk [vmem:[#allocation2 + $0x4b0] sm:$0xff] %vm67_vm0, %v12845_v0  ;;  %219 = vst.msk [vmem:[#allocation2 + $0x4b8] sm:$0xff] %vm67_vm0, %v12845_v0 }
  0x6f   :  { %229 = vst.msk [vmem:[#allocation3] sm:$0xff] %vm228_vm1, %v12845_v0  ;;  %230 = vst.msk [vmem:[#allocation3 + $0x8] sm:$0xff] %vm228_vm1, %v12845_v0 }
  0x70   :  { %231 = vst.msk [vmem:[#allocation3 + $0x10] sm:$0xff] %vm228_vm1, %v12845_v0  ;;  %232 = vst.msk [vmem:[#allocation3 + $0x18] sm:$0xff] %vm228_vm1, %v12845_v0 }
  0x71   :  { %233 = vst.msk [vmem:[#allocation3 + $0x20] sm:$0xff] %vm228_vm1, %v12845_v0  ;;  %234 = vst.msk [vmem:[#allocation3 + $0x28] sm:$0xff] %vm228_vm1, %v12845_v0 }
  0x72   :  { %235 = vst.msk [vmem:[#allocation3 + $0x30] sm:$0xff] %vm228_vm1, %v12845_v0  ;;  %236 = vst.msk [vmem:[#allocation3 + $0x38] sm:$0xff] %vm228_vm1, %v12845_v0 }
  0x73   :  { %237 = vst.msk [vmem:[#allocation3 + $0x40] sm:$0xff] %vm228_vm1, %v12845_v0  ;;  %238 = vst.msk [vmem:[#allocation3 + $0x48] sm:$0xff] %vm228_vm1, %v12845_v0 }
  0x74   :  { %239 = vst.msk [vmem:[#allocation3 + $0x50] sm:$0xff] %vm228_vm1, %v12845_v0  ;;  %240 = vst.msk [vmem:[#allocation3 + $0x58] sm:$0xff] %vm228_vm1, %v12845_v0 }
  0x75   :  { %241 = vst.msk [vmem:[#allocation3 + $0x60] sm:$0xff] %vm228_vm1, %v12845_v0  ;;  %242 = vst.msk [vmem:[#allocation3 + $0x68] sm:$0xff] %vm228_vm1, %v12845_v0 }
  0x76   :  { %243 = vst.msk [vmem:[#allocation3 + $0x70] sm:$0xff] %vm228_vm1, %v12845_v0  ;;  %244 = vst.msk [vmem:[#allocation3 + $0x78] sm:$0xff] %vm228_vm1, %v12845_v0 }
  0x77   :  { %245 = vst.msk [vmem:[#allocation3 + $0x80] sm:$0xff] %vm228_vm1, %v12845_v0  ;;  %246 = vst.msk [vmem:[#allocation3 + $0x88] sm:$0xff] %vm228_vm1, %v12845_v0 }
  0x78   :  { %247 = vst.msk [vmem:[#allocation3 + $0x90] sm:$0xff] %vm228_vm1, %v12845_v0  ;;  %248 = vst.msk [vmem:[#allocation3 + $0x98] sm:$0xff] %vm228_vm1, %v12845_v0 }
  0x79   :  { %249 = vst.msk [vmem:[#allocation3 + $0xa0] sm:$0xff] %vm228_vm1, %v12845_v0  ;;  %250 = vst.msk [vmem:[#allocation3 + $0xa8] sm:$0xff] %vm228_vm1, %v12845_v0 }
  0x7a   :  { %251 = vst.msk [vmem:[#allocation3 + $0xb0] sm:$0xff] %vm228_vm1, %v12845_v0  ;;  %252 = vst.msk [vmem:[#allocation3 + $0xb8] sm:$0xff] %vm228_vm1, %v12845_v0 }
  0x7b   :  { %253 = vst.msk [vmem:[#allocation3 + $0xc0] sm:$0xff] %vm228_vm1, %v12845_v0  ;;  %254 = vst.msk [vmem:[#allocation3 + $0xc8] sm:$0xff] %vm228_vm1, %v12845_v0 }
  0x7c   :  { %255 = vst.msk [vmem:[#allocation3 + $0xd0] sm:$0xff] %vm228_vm1, %v12845_v0  ;;  %256 = vst.msk [vmem:[#allocation3 + $0xd8] sm:$0xff] %vm228_vm1, %v12845_v0 }
  0x7d   :  { %257 = vst.msk [vmem:[#allocation3 + $0xe0] sm:$0xff] %vm228_vm1, %v12845_v0  ;;  %258 = vst.msk [vmem:[#allocation3 + $0xe8] sm:$0xff] %vm228_vm1, %v12845_v0 }
  0x7e   :  { %259 = vst.msk [vmem:[#allocation3 + $0xf0] sm:$0xff] %vm228_vm1, %v12845_v0  ;;  %260 = vst.msk [vmem:[#allocation3 + $0xf8] sm:$0xff] %vm228_vm1, %v12845_v0 }
  0x7f   :  { %261 = vst.msk [vmem:[#allocation3 + $0x100] sm:$0xff] %vm228_vm1, %v12845_v0  ;;  %262 = vst.msk [vmem:[#allocation3 + $0x108] sm:$0xff] %vm228_vm1, %v12845_v0 }
  0x80   :  { %263 = vst.msk [vmem:[#allocation3 + $0x110] sm:$0xff] %vm228_vm1, %v12845_v0  ;;  %264 = vst.msk [vmem:[#allocation3 + $0x118] sm:$0xff] %vm228_vm1, %v12845_v0 }
  0x81   :  { %265 = vst.msk [vmem:[#allocation3 + $0x120] sm:$0xff] %vm228_vm1, %v12845_v0  ;;  %266 = vst.msk [vmem:[#allocation3 + $0x128] sm:$0xff] %vm228_vm1, %v12845_v0 }
  0x82   :  { %267 = vst.msk [vmem:[#allocation3 + $0x130] sm:$0xff] %vm228_vm1, %v12845_v0  ;;  %268 = vst.msk [vmem:[#allocation3 + $0x138] sm:$0xff] %vm228_vm1, %v12845_v0 }
  0x83   :  { %277 = vst.msk [vmem:[#allocation3 + $0x180] sm:$0xff] %vm228_vm1, %v12845_v0  ;;  %278 = vst.msk [vmem:[#allocation3 + $0x188] sm:$0xff] %vm228_vm1, %v12845_v0 }
  0x84   :  { %279 = vst.msk [vmem:[#allocation3 + $0x190] sm:$0xff] %vm228_vm1, %v12845_v0  ;;  %280 = vst.msk [vmem:[#allocation3 + $0x198] sm:$0xff] %vm228_vm1, %v12845_v0 }
  0x85   :  { %281 = vst.msk [vmem:[#allocation3 + $0x1a0] sm:$0xff] %vm228_vm1, %v12845_v0  ;;  %282 = vst.msk [vmem:[#allocation3 + $0x1a8] sm:$0xff] %vm228_vm1, %v12845_v0 }
  0x86   :  { %283 = vst.msk [vmem:[#allocation3 + $0x1b0] sm:$0xff] %vm228_vm1, %v12845_v0  ;;  %284 = vst.msk [vmem:[#allocation3 + $0x1b8] sm:$0xff] %vm228_vm1, %v12845_v0 }
  0x87   :  { %285 = vst.msk [vmem:[#allocation3 + $0x1c0] sm:$0xff] %vm228_vm1, %v12845_v0  ;;  %286 = vst.msk [vmem:[#allocation3 + $0x1c8] sm:$0xff] %vm228_vm1, %v12845_v0 }
  0x88   :  { %287 = vst.msk [vmem:[#allocation3 + $0x1d0] sm:$0xff] %vm228_vm1, %v12845_v0  ;;  %288 = vst.msk [vmem:[#allocation3 + $0x1d8] sm:$0xff] %vm228_vm1, %v12845_v0 }
  0x89   :  { %289 = vst.msk [vmem:[#allocation3 + $0x1e0] sm:$0xff] %vm228_vm1, %v12845_v0  ;;  %290 = vst.msk [vmem:[#allocation3 + $0x1e8] sm:$0xff] %vm228_vm1, %v12845_v0 }
  0x8a   :  { %291 = vst.msk [vmem:[#allocation3 + $0x1f0] sm:$0xff] %vm228_vm1, %v12845_v0  ;;  %292 = vst.msk [vmem:[#allocation3 + $0x1f8] sm:$0xff] %vm228_vm1, %v12845_v0 }
  0x8b   :  { %293 = vst.msk [vmem:[#allocation3 + $0x200] sm:$0xff] %vm228_vm1, %v12845_v0  ;;  %294 = vst.msk [vmem:[#allocation3 + $0x208] sm:$0xff] %vm228_vm1, %v12845_v0 }
  0x8c   :  { %295 = vst.msk [vmem:[#allocation3 + $0x210] sm:$0xff] %vm228_vm1, %v12845_v0  ;;  %296 = vst.msk [vmem:[#allocation3 + $0x218] sm:$0xff] %vm228_vm1, %v12845_v0 }
  0x8d   :  { %297 = vst.msk [vmem:[#allocation3 + $0x220] sm:$0xff] %vm228_vm1, %v12845_v0  ;;  %298 = vst.msk [vmem:[#allocation3 + $0x228] sm:$0xff] %vm228_vm1, %v12845_v0 }
  0x8e   :  { %299 = vst.msk [vmem:[#allocation3 + $0x230] sm:$0xff] %vm228_vm1, %v12845_v0  ;;  %300 = vst.msk [vmem:[#allocation3 + $0x238] sm:$0xff] %vm228_vm1, %v12845_v0 }
  0x8f   :  { %301 = vst.msk [vmem:[#allocation3 + $0x240] sm:$0xff] %vm228_vm1, %v12845_v0  ;;  %302 = vst.msk [vmem:[#allocation3 + $0x248] sm:$0xff] %vm228_vm1, %v12845_v0 }
  0x90   :  { %303 = vst.msk [vmem:[#allocation3 + $0x250] sm:$0xff] %vm228_vm1, %v12845_v0  ;;  %304 = vst.msk [vmem:[#allocation3 + $0x258] sm:$0xff] %vm228_vm1, %v12845_v0 }
  0x91   :  { %305 = vst.msk [vmem:[#allocation3 + $0x260] sm:$0xff] %vm228_vm1, %v12845_v0  ;;  %306 = vst.msk [vmem:[#allocation3 + $0x268] sm:$0xff] %vm228_vm1, %v12845_v0 }
  0x92   :  { %307 = vst.msk [vmem:[#allocation3 + $0x270] sm:$0xff] %vm228_vm1, %v12845_v0  ;;  %308 = vst.msk [vmem:[#allocation3 + $0x278] sm:$0xff] %vm228_vm1, %v12845_v0 }
  0x93   :  { %309 = vst.msk [vmem:[#allocation3 + $0x280] sm:$0xff] %vm228_vm1, %v12845_v0  ;;  %310 = vst.msk [vmem:[#allocation3 + $0x288] sm:$0xff] %vm228_vm1, %v12845_v0 }
  0x94   :  { %311 = vst.msk [vmem:[#allocation3 + $0x290] sm:$0xff] %vm228_vm1, %v12845_v0  ;;  %312 = vst.msk [vmem:[#allocation3 + $0x298] sm:$0xff] %vm228_vm1, %v12845_v0 }
  0x95   :  { %313 = vst.msk [vmem:[#allocation3 + $0x2a0] sm:$0xff] %vm228_vm1, %v12845_v0  ;;  %314 = vst.msk [vmem:[#allocation3 + $0x2a8] sm:$0xff] %vm228_vm1, %v12845_v0 }
  0x96   :  { %315 = vst.msk [vmem:[#allocation3 + $0x2b0] sm:$0xff] %vm228_vm1, %v12845_v0  ;;  %316 = vst.msk [vmem:[#allocation3 + $0x2b8] sm:$0xff] %vm228_vm1, %v12845_v0 }
  0x97   :  { %325 = vst.msk [vmem:[#allocation4] sm:$0xff] %vm228_vm1, %v12845_v0  ;;  %326 = vst.msk [vmem:[#allocation4 + $0x8] sm:$0xff] %vm228_vm1, %v12845_v0 }
  0x98   :  { %327 = vst.msk [vmem:[#allocation4 + $0x10] sm:$0xff] %vm228_vm1, %v12845_v0  ;;  %328 = vst.msk [vmem:[#allocation4 + $0x18] sm:$0xff] %vm228_vm1, %v12845_v0 }
  0x99   :  { %329 = vst.msk [vmem:[#allocation4 + $0x20] sm:$0xff] %vm228_vm1, %v12845_v0  ;;  %330 = vst.msk [vmem:[#allocation4 + $0x28] sm:$0xff] %vm228_vm1, %v12845_v0 }
  0x9a   :  { %331 = vst.msk [vmem:[#allocation4 + $0x30] sm:$0xff] %vm228_vm1, %v12845_v0  ;;  %332 = vst.msk [vmem:[#allocation4 + $0x38] sm:$0xff] %vm228_vm1, %v12845_v0 }
  0x9b   :  { %333 = vst.msk [vmem:[#allocation4 + $0x40] sm:$0xff] %vm228_vm1, %v12845_v0  ;;  %334 = vst.msk [vmem:[#allocation4 + $0x48] sm:$0xff] %vm228_vm1, %v12845_v0 }
  0x9c   :  { %335 = vst.msk [vmem:[#allocation4 + $0x50] sm:$0xff] %vm228_vm1, %v12845_v0  ;;  %336 = vst.msk [vmem:[#allocation4 + $0x58] sm:$0xff] %vm228_vm1, %v12845_v0 }
  0x9d   :  { %337 = vst.msk [vmem:[#allocation4 + $0x60] sm:$0xff] %vm228_vm1, %v12845_v0  ;;  %338 = vst.msk [vmem:[#allocation4 + $0x68] sm:$0xff] %vm228_vm1, %v12845_v0 }
  0x9e   :  { %339 = vst.msk [vmem:[#allocation4 + $0x70] sm:$0xff] %vm228_vm1, %v12845_v0  ;;  %340 = vst.msk [vmem:[#allocation4 + $0x78] sm:$0xff] %vm228_vm1, %v12845_v0 }
  0x9f   :  { %341 = vst.msk [vmem:[#allocation4 + $0x80] sm:$0xff] %vm228_vm1, %v12845_v0  ;;  %342 = vst.msk [vmem:[#allocation4 + $0x88] sm:$0xff] %vm228_vm1, %v12845_v0 }
  0xa0   :  { %343 = vst.msk [vmem:[#allocation4 + $0x90] sm:$0xff] %vm228_vm1, %v12845_v0  ;;  %344 = vst.msk [vmem:[#allocation4 + $0x98] sm:$0xff] %vm228_vm1, %v12845_v0 }
  0xa1   :  { %345 = vst.msk [vmem:[#allocation4 + $0xa0] sm:$0xff] %vm228_vm1, %v12845_v0  ;;  %346 = vst.msk [vmem:[#allocation4 + $0xa8] sm:$0xff] %vm228_vm1, %v12845_v0 }
  0xa2   :  { %347 = vst.msk [vmem:[#allocation4 + $0xb0] sm:$0xff] %vm228_vm1, %v12845_v0  ;;  %348 = vst.msk [vmem:[#allocation4 + $0xb8] sm:$0xff] %vm228_vm1, %v12845_v0 }
  0xa3   :  { %357 = vst.msk [vmem:[#allocation4 + $0x100] sm:$0xff] %vm228_vm1, %v12845_v0  ;;  %358 = vst.msk [vmem:[#allocation4 + $0x108] sm:$0xff] %vm228_vm1, %v12845_v0 }
  0xa4   :  { %359 = vst.msk [vmem:[#allocation4 + $0x110] sm:$0xff] %vm228_vm1, %v12845_v0  ;;  %360 = vst.msk [vmem:[#allocation4 + $0x118] sm:$0xff] %vm228_vm1, %v12845_v0 }
  0xa5   :  { %361 = vst.msk [vmem:[#allocation4 + $0x120] sm:$0xff] %vm228_vm1, %v12845_v0  ;;  %362 = vst.msk [vmem:[#allocation4 + $0x128] sm:$0xff] %vm228_vm1, %v12845_v0 }
  0xa6   :  { %363 = vst.msk [vmem:[#allocation4 + $0x130] sm:$0xff] %vm228_vm1, %v12845_v0  ;;  %364 = vst.msk [vmem:[#allocation4 + $0x138] sm:$0xff] %vm228_vm1, %v12845_v0 }
  0xa7   :  { %365 = vst.msk [vmem:[#allocation4 + $0x140] sm:$0xff] %vm228_vm1, %v12845_v0  ;;  %366 = vst.msk [vmem:[#allocation4 + $0x148] sm:$0xff] %vm228_vm1, %v12845_v0 }
  0xa8   :  { %367 = vst.msk [vmem:[#allocation4 + $0x150] sm:$0xff] %vm228_vm1, %v12845_v0  ;;  %368 = vst.msk [vmem:[#allocation4 + $0x158] sm:$0xff] %vm228_vm1, %v12845_v0 }
  0xa9   :  { %369 = vst.msk [vmem:[#allocation4 + $0x160] sm:$0xff] %vm228_vm1, %v12845_v0  ;;  %370 = vst.msk [vmem:[#allocation4 + $0x168] sm:$0xff] %vm228_vm1, %v12845_v0 }
  0xaa   :  { %371 = vst.msk [vmem:[#allocation4 + $0x170] sm:$0xff] %vm228_vm1, %v12845_v0  ;;  %372 = vst.msk [vmem:[#allocation4 + $0x178] sm:$0xff] %vm228_vm1, %v12845_v0 }
  0xab   :  { %373 = vst.msk [vmem:[#allocation4 + $0x180] sm:$0xff] %vm228_vm1, %v12845_v0  ;;  %374 = vst.msk [vmem:[#allocation4 + $0x188] sm:$0xff] %vm228_vm1, %v12845_v0 }
  0xac   :  { %375 = vst.msk [vmem:[#allocation4 + $0x190] sm:$0xff] %vm228_vm1, %v12845_v0  ;;  %376 = vst.msk [vmem:[#allocation4 + $0x198] sm:$0xff] %vm228_vm1, %v12845_v0 }
  0xad   :  { %377 = vst.msk [vmem:[#allocation4 + $0x1a0] sm:$0xff] %vm228_vm1, %v12845_v0  ;;  %378 = vst.msk [vmem:[#allocation4 + $0x1a8] sm:$0xff] %vm228_vm1, %v12845_v0 }
  0xae   :  { %379 = vst.msk [vmem:[#allocation4 + $0x1b0] sm:$0xff] %vm228_vm1, %v12845_v0  ;;  %380 = vst.msk [vmem:[#allocation4 + $0x1b8] sm:$0xff] %vm228_vm1, %v12845_v0 }
  0xaf   :  { %389 = vst.msk [vmem:[#allocation5] sm:$0xff] %vm228_vm1, %v12845_v0  ;;  %390 = vst.msk [vmem:[#allocation5 + $0x8] sm:$0xff] %vm228_vm1, %v12845_v0 }
  0xb0   :  { %391 = vst.msk [vmem:[#allocation5 + $0x10] sm:$0xff] %vm228_vm1, %v12845_v0  ;;  %392 = vst.msk [vmem:[#allocation5 + $0x18] sm:$0xff] %vm228_vm1, %v12845_v0 }
  0xb1   :  { %393 = vst.msk [vmem:[#allocation5 + $0x20] sm:$0xff] %vm228_vm1, %v12845_v0  ;;  %394 = vst.msk [vmem:[#allocation5 + $0x28] sm:$0xff] %vm228_vm1, %v12845_v0 }
  0xb2   :  { %395 = vst.msk [vmem:[#allocation5 + $0x30] sm:$0xff] %vm228_vm1, %v12845_v0  ;;  %396 = vst.msk [vmem:[#allocation5 + $0x38] sm:$0xff] %vm228_vm1, %v12845_v0 }
  0xb3   :  { %397 = vst.msk [vmem:[#allocation5 + $0x40] sm:$0xff] %vm228_vm1, %v12845_v0  ;;  %398 = vst.msk [vmem:[#allocation5 + $0x48] sm:$0xff] %vm228_vm1, %v12845_v0 }
  0xb4   :  { %399 = vst.msk [vmem:[#allocation5 + $0x50] sm:$0xff] %vm228_vm1, %v12845_v0  ;;  %400 = vst.msk [vmem:[#allocation5 + $0x58] sm:$0xff] %vm228_vm1, %v12845_v0 }
  0xb5   :  { %401 = vst.msk [vmem:[#allocation5 + $0x60] sm:$0xff] %vm228_vm1, %v12845_v0  ;;  %402 = vst.msk [vmem:[#allocation5 + $0x68] sm:$0xff] %vm228_vm1, %v12845_v0 }
  0xb6   :  { %403 = vst.msk [vmem:[#allocation5 + $0x70] sm:$0xff] %vm228_vm1, %v12845_v0  ;;  %404 = vst.msk [vmem:[#allocation5 + $0x78] sm:$0xff] %vm228_vm1, %v12845_v0 }
  0xb7   :  { %413 = vst.msk [vmem:[#allocation5 + $0xc0] sm:$0xff] %vm228_vm1, %v12845_v0  ;;  %414 = vst.msk [vmem:[#allocation5 + $0xc8] sm:$0xff] %vm228_vm1, %v12845_v0 }
  0xb8   :  { %415 = vst.msk [vmem:[#allocation5 + $0xd0] sm:$0xff] %vm228_vm1, %v12845_v0  ;;  %416 = vst.msk [vmem:[#allocation5 + $0xd8] sm:$0xff] %vm228_vm1, %v12845_v0 }
  0xb9   :  { %417 = vst.msk [vmem:[#allocation5 + $0xe0] sm:$0xff] %vm228_vm1, %v12845_v0  ;;  %418 = vst.msk [vmem:[#allocation5 + $0xe8] sm:$0xff] %vm228_vm1, %v12845_v0 }
  0xba   :  { %419 = vst.msk [vmem:[#allocation5 + $0xf0] sm:$0xff] %vm228_vm1, %v12845_v0  ;;  %420 = vst.msk [vmem:[#allocation5 + $0xf8] sm:$0xff] %vm228_vm1, %v12845_v0 }
  0xbb   :  { %421 = vst.msk [vmem:[#allocation5 + $0x100] sm:$0xff] %vm228_vm1, %v12845_v0  ;;  %422 = vst.msk [vmem:[#allocation5 + $0x108] sm:$0xff] %vm228_vm1, %v12845_v0 }
  0xbc   :  { %423 = vst.msk [vmem:[#allocation5 + $0x110] sm:$0xff] %vm228_vm1, %v12845_v0  ;;  %424 = vst.msk [vmem:[#allocation5 + $0x118] sm:$0xff] %vm228_vm1, %v12845_v0 }
  0xbd   :  { %425 = vst.msk [vmem:[#allocation5 + $0x120] sm:$0xff] %vm228_vm1, %v12845_v0  ;;  %426 = vst.msk [vmem:[#allocation5 + $0x128] sm:$0xff] %vm228_vm1, %v12845_v0 }
  0xbe   :  { %427 = vst.msk [vmem:[#allocation5 + $0x130] sm:$0xff] %vm228_vm1, %v12845_v0  ;;  %428 = vst.msk [vmem:[#allocation5 + $0x138] sm:$0xff] %vm228_vm1, %v12845_v0  ;;  %v479_v0 = vld [vmem:[%s14774_s0 + $0x150] sm:$0xff] }
  0xbf   :  { %502 = vst.msk [vmem:[#allocation2 + $0x28] sm:$0xff] %vm67_vm0, %v437_v2  ;;  %503 = vst.msk [vmem:[#allocation2 + $0x30] sm:$0xff] %vm67_vm0, %v438_v3  ;;  %v480_v2 = vld [vmem:[%s14774_s0 + $0x158] sm:$0xff]  ;;  %v483_v3 = vld [vmem:[%s14774_s0 + $0x170] sm:$0xff] }
  0xc0   :  { %506 = vst.msk [vmem:[#allocation2 + $0x68] sm:$0xff] %vm67_vm0, %v441_v5  ;;  %507 = vst.msk [vmem:[#allocation2 + $0x70] sm:$0xff] %vm67_vm0, %v442_v6  ;;  %v487_v5 = vld [vmem:[%s14774_s0 + $0x190] sm:$0xff]  ;;  %v488_v6 = vld [vmem:[%s14774_s0 + $0x198] sm:$0xff] }
  0xc1   :  { %510 = vst.msk [vmem:[#allocation2 + $0xa8] sm:$0xff] %vm67_vm0, %v445_v7  ;;  %511 = vst.msk [vmem:[#allocation2 + $0xb0] sm:$0xff] %vm67_vm0, %v446_v8  ;;  %v491_v7 = vld [vmem:[%s14774_s0 + $0x1b0] sm:$0xff] }
  0xc2   :  { %514 = vst.msk [vmem:[#allocation2 + $0xe8] sm:$0xff] %vm67_vm0, %v449_v9  ;;  %515 = vst.msk [vmem:[#allocation2 + $0xf0] sm:$0xff] %vm67_vm0, %v450_v10  ;;  %v492_v9 = vld [vmem:[%s14774_s0 + $0x1b8] sm:$0xff] }
  0xc3   :  { %518 = vst.msk [vmem:[#allocation2 + $0x128] sm:$0xff] %vm67_vm0, %v453_v11  ;;  %519 = vst.msk [vmem:[#allocation2 + $0x130] sm:$0xff] %vm67_vm0, %v454_v12  ;;  %v495_v11 = vld [vmem:[%s14774_s0 + $0x1d0] sm:$0xff]  ;;  %v496_v12 = vld [vmem:[%s14774_s0 + $0x1d8] sm:$0xff] }
  0xc4   :  { %522 = vst.msk [vmem:[#allocation2 + $0x168] sm:$0xff] %vm67_vm0, %v457_v13  ;;  %523 = vst.msk [vmem:[#allocation2 + $0x170] sm:$0xff] %vm67_vm0, %v458_v14  ;;  %v467_v13 = vld [vmem:[%s14774_s0 + $0xf0] sm:$0xff]  ;;  %v468_v14 = vld [vmem:[%s14774_s0 + $0xf8] sm:$0xff] }
  0xc5   :  { %526 = vst.msk [vmem:[#allocation2 + $0x1a8] sm:$0xff] %vm67_vm0, %v461_v15  ;;  %527 = vst.msk [vmem:[#allocation2 + $0x1b0] sm:$0xff] %vm67_vm0, %v462_v16  ;;  %v499_v15 = vld [vmem:[%s14774_s0 + $0x1f0] sm:$0xff] }
  0xc6   :  { %530 = vst.msk [vmem:[#allocation2 + $0x1e8] sm:$0xff] %vm67_vm0, %v465_v17  ;;  %531 = vst.msk [vmem:[#allocation2 + $0x1f0] sm:$0xff] %vm67_vm0, %v466_v18  ;;  %v569_v25 = vld [vmem:[#allocation2 + $0x27] ss:$2 sm:$0xff]  ;;  %v500_v17 = vld [vmem:[%s14774_s0 + $0x1f8] sm:$0xff] }
  0xc7   :  { %534 = vst.msk [vmem:[#allocation2 + $0x2a8] sm:$0xff] %vm67_vm0, %v469_v19  ;;  %535 = vst.msk [vmem:[#allocation2 + $0x2b0] sm:$0xff] %vm67_vm0, %v470_v20  ;;  %10793 = vmatprep.mubr.msk.f32.mxu0 %vm67_vm0, %v569_v25  ;;  %v13643_v28 = vld [vmem:[#allocation2 + $0x67] ss:$2 sm:$0xff] }
  0xc8   :  { %538 = vst.msk [vmem:[#allocation2 + $0x2e8] sm:$0xff] %vm67_vm0, %v473_v21  ;;  %539 = vst.msk [vmem:[#allocation2 + $0x2f0] sm:$0xff] %vm67_vm0, %v474_v22  ;;  %10794 = vmatmul.mubr.msk.f32.vlgmr.msra.gmra.mrb[0].mxu0 %vm67_vm0, %v13643_v28  ;;  %v13655_v31 = vld [vmem:[#allocation2 + $0xa7] ss:$2 sm:$0xff] }
  0xc9   :  { %542 = vst.msk [vmem:[#allocation2 + $0x328] sm:$0xff] %vm67_vm0, %v477_v23  ;;  %543 = vst.msk [vmem:[#allocation2 + $0x330] sm:$0xff] %vm67_vm0, %v478_v24  ;;  %10818 = vmatpush3.msk.msra.mxu0 %vm689_vm2, %v638_v4  ;;  %10796 = vmatprep.mubr.msk.f32.mxu0 %vm67_vm0, %v13655_v31  ;;  %v13668_v34 = vld [vmem:[#allocation2 + $0xe7] ss:$2 sm:$0xff]  ;;  %v484_v4 = vld [vmem:[%s14774_s0 + $0x178] sm:$0xff] }
  0xca   :  { %546 = vst.msk [vmem:[#allocation2 + $0x368] sm:$0xff] %vm67_vm0, %v481_v26  ;;  %547 = vst.msk [vmem:[#allocation2 + $0x370] sm:$0xff] %vm67_vm0, %v482_v27  ;;  %v13675_v36 = vld [vmem:[#allocation2 + $0x127] ss:$2 sm:$0xff]  ;;  %10843 = vmatprep.subr.msk.mxu0 %vm689_vm2, %v13695_v40 }
  0xcb   :  { %550 = vst.msk [vmem:[#allocation2 + $0x3a8] sm:$0xff] %vm67_vm0, %v485_v29  ;;  %551 = vst.msk [vmem:[#allocation2 + $0x3b0] sm:$0xff] %vm67_vm0, %v486_v30  ;;  %v13699_v41 = vld [vmem:[#allocation2 + $0x167] ss:$2 sm:$0xff] }
  0xcc   :  { %554 = vst.msk [vmem:[#allocation2 + $0x3e8] sm:$0xff] %vm67_vm0, %v489_v32  ;;  %555 = vst.msk [vmem:[#allocation2 + $0x3f0] sm:$0xff] %vm67_vm0, %v490_v33  ;;  %10797 = vmatmul.mubr.msk.f32.gmra.mrb[2].mxu0 %vm67_vm0, %v13668_v34  ;;  %v13706_v43 = vld [vmem:[#allocation2 + $0x1a7] ss:$2 sm:$0xff] }
  0xcd   :  { %558 = vst.msk [vmem:[#allocation2 + $0x428] sm:$0xff] %vm67_vm0, %v493_v35  ;;  %559 = vst.msk [vmem:[#allocation2 + $0x430] sm:$0xff] %vm67_vm0, %v494_v37  ;;  %10799 = vmatprep.mubr.msk.f32.mxu0 %vm67_vm0, %v13675_v36  ;;  %v13725_v48 = vld [vmem:[#allocation2 + $0x1e7] ss:$2 sm:$0xff] }
  0xce   :  { %562 = vst.msk [vmem:[#allocation2 + $0x468] sm:$0xff] %vm67_vm0, %v497_v38  ;;  %563 = vst.msk [vmem:[#allocation2 + $0x470] sm:$0xff] %vm67_vm0, %v498_v39  ;;  %v605_v54 = vld [vmem:[#allocation2 + $0x2a7] ss:$2 sm:$0xff] }
  0xcf   :  { %504 = vst.msk [vmem:[#allocation2 + $0x48] sm:$0xff] %vm67_vm0, %v439_v42  ;;  %505 = vst.msk [vmem:[#allocation2 + $0x50] sm:$0xff] %vm67_vm0, %v440_v44  ;;  %v13767_v59 = vld [vmem:[#allocation2 + $0x2e7] ss:$2 sm:$0xff] }
  0xd0   :  { %508 = vst.msk [vmem:[#allocation2 + $0x88] sm:$0xff] %vm67_vm0, %v443_v45  ;;  %10800 = vmatmul.mubr.msk.f32.gmra.mrb[4].mxu0 %vm67_vm0, %v13699_v41  ;;  %509 = vst.msk [vmem:[#allocation2 + $0x90] sm:$0xff] %vm67_vm0, %v444_v46  ;;  %v13789_v1 = vld [vmem:[#allocation2 + $0x327] ss:$2 sm:$0xff] }
  0xd1   :  { %512 = vst.msk [vmem:[#allocation2 + $0xc8] sm:$0xff] %vm67_vm0, %v447_v47  ;;  %10802 = vmatprep.mubr.msk.f32.mxu0 %vm67_vm0, %v13706_v43  ;;  %513 = vst.msk [vmem:[#allocation2 + $0xd0] sm:$0xff] %vm67_vm0, %v448_v49  ;;  %v13820_v8 = vld [vmem:[#allocation2 + $0x367] ss:$2 sm:$0xff] }
  0xd2   :  { %516 = vst.msk [vmem:[#allocation2 + $0x108] sm:$0xff] %vm67_vm0, %v451_v50  ;;  %517 = vst.msk [vmem:[#allocation2 + $0x110] sm:$0xff] %vm67_vm0, %v452_v51  ;;  %v13827_v10 = vld [vmem:[#allocation2 + $0x3a7] ss:$2 sm:$0xff] }
  0xd3   :  { %520 = vst.msk [vmem:[#allocation2 + $0x148] sm:$0xff] %vm67_vm0, %v455_v52  ;;  %521 = vst.msk [vmem:[#allocation2 + $0x150] sm:$0xff] %vm67_vm0, %v456_v53  ;;  %v13852_v16 = vld [vmem:[#allocation2 + $0x3e7] ss:$2 sm:$0xff]  ;;  %v1415_v52 = vld [vmem:[#allocation2 + $0x288] ss:$2 sm:$0xff] }
  0xd4   :  { %524 = vst.msk [vmem:[#allocation2 + $0x188] sm:$0xff] %vm67_vm0, %v459_v55  ;;  %525 = vst.msk [vmem:[#allocation2 + $0x190] sm:$0xff] %vm67_vm0, %v460_v56  ;;  %10803 = vmatmul.mubr.msk.f32.gmra.mrb[6].mxu0 %vm67_vm0, %v13725_v48  ;;  %v13859_v18 = vld [vmem:[#allocation2 + $0x427] ss:$2 sm:$0xff] }
  0xd5   :  { %528 = vst.msk [vmem:[#allocation2 + $0x1c8] sm:$0xff] %vm67_vm0, %v463_v57  ;;  %529 = vst.msk [vmem:[#allocation2 + $0x1d0] sm:$0xff] %vm67_vm0, %v464_v58  ;;  %10805 = vmatprep.mubr.msk.f32.mxu0 %vm67_vm0, %v605_v54  ;;  %v13866_v19 = vld [vmem:[#allocation2 + $0x467] ss:$2 sm:$0xff] }
  0xd6   :  { %536 = vst.msk [vmem:[#allocation2 + $0x2c8] sm:$0xff] %vm67_vm0, %v471_v60  ;;  %537 = vst.msk [vmem:[#allocation2 + $0x2d0] sm:$0xff] %vm67_vm0, %v472_v61  ;;  %v567_v20 = vld [vmem:[#allocation2 + $0x7] ss:$2 sm:$0xff]  ;;  %v1381_v60 = vld [vmem:[#allocation2 + $0x28] ss:$2 sm:$0xff] }
  0xd7   :  { %540 = vst.msk [vmem:[#allocation2 + $0x308] sm:$0xff] %vm67_vm0, %v475_v62  ;;  %541 = vst.msk [vmem:[#allocation2 + $0x310] sm:$0xff] %vm67_vm0, %v476_v63  ;;  %v571_v21 = vld [vmem:[#allocation2 + $0x47] ss:$2 sm:$0xff]  ;;  %v1385_v61 = vld [vmem:[#allocation2 + $0x68] ss:$2 sm:$0xff] }
  0xd8   :  { %544 = vst.msk [vmem:[#allocation2 + $0x348] sm:$0xff] %vm67_vm0, %v479_v0  ;;  %545 = vst.msk [vmem:[#allocation2 + $0x350] sm:$0xff] %vm67_vm0, %v480_v2  ;;  %10806 = vmatmul.mubr.msk.f32.gmra.mrb[8].mxu0 %vm67_vm0, %v13767_v59  ;;  %v575_v22 = vld [vmem:[#allocation2 + $0x87] ss:$2 sm:$0xff]  ;;  %v13961_v47 = vld [vmem:[#allocation2 + $0xc8] ss:$2 sm:$0xff] }
  0xd9   :  { %548 = vst.msk [vmem:[#allocation2 + $0x388] sm:$0xff] %vm67_vm0, %v483_v3  ;;  %549 = vst.msk [vmem:[#allocation2 + $0x390] sm:$0xff] %vm67_vm0, %v484_v4  ;;  %10808 = vmatprep.mubr.msk.f32.mxu0 %vm67_vm0, %v13789_v1  ;;  %v9579_v23 = vld [vmem:[%s14775_s1 + $0x30] sm:$0xf]  ;;  %v9597_v42 = vld [vmem:[%s14775_s1 + $0x4] sm:$0xf] }
  0xda   :  { %552 = vst.msk [vmem:[#allocation2 + $0x3c8] sm:$0xff] %vm67_vm0, %v487_v5  ;;  %553 = vst.msk [vmem:[#allocation2 + $0x3d0] sm:$0xff] %vm67_vm0, %v488_v6  ;;  %v579_v24 = vld [vmem:[#allocation2 + $0xc7] ss:$2 sm:$0xff]  ;;  %v13970_v49 = vld [vmem:[#allocation2 + $0x148] ss:$2 sm:$0xff] }
  0xdb   :  { %556 = vst.msk [vmem:[#allocation2 + $0x408] sm:$0xff] %vm67_vm0, %v491_v7  ;;  %557 = vst.msk [vmem:[#allocation2 + $0x410] sm:$0xff] %vm67_vm0, %v492_v9  ;;  %v583_v25 = vld [vmem:[#allocation2 + $0x107] ss:$2 sm:$0xff]  ;;  %v13972_v50 = vld [vmem:[#allocation2 + $0x188] ss:$2 sm:$0xff] }
  0xdc   :  { %560 = vst.msk [vmem:[#allocation2 + $0x448] sm:$0xff] %vm67_vm0, %v495_v11  ;;  %561 = vst.msk [vmem:[#allocation2 + $0x450] sm:$0xff] %vm67_vm0, %v496_v12  ;;  %10809 = vmatmul.mubr.msk.f32.gmra.mrb[10].mxu0 %vm67_vm0, %v13820_v8  ;;  %v587_v26 = vld [vmem:[#allocation2 + $0x147] ss:$2 sm:$0xff]  ;;  %v1407_v51 = vld [vmem:[#allocation2 + $0x1c8] ss:$2 sm:$0xff] }
  0xdd   :  { %532 = vst.msk [vmem:[#allocation2 + $0x208] sm:$0xff] %vm67_vm0, %v467_v13  ;;  %10811 = vmatprep.mubr.msk.f32.mxu0 %vm67_vm0, %v13827_v10  ;;  %533 = vst.msk [vmem:[#allocation2 + $0x210] sm:$0xff] %vm67_vm0, %v468_v14  ;;  %v591_v27 = vld [vmem:[#allocation2 + $0x187] ss:$2 sm:$0xff]  ;;  %v1419_v53 = vld [vmem:[#allocation2 + $0x2c8] ss:$2 sm:$0xff] }
  0xde   :  { %564 = vst.msk [vmem:[#allocation2 + $0x488] sm:$0xff] %vm67_vm0, %v499_v15  ;;  %565 = vst.msk [vmem:[#allocation2 + $0x490] sm:$0xff] %vm67_vm0, %v500_v17  ;;  %v595_v29 = vld [vmem:[#allocation2 + $0x1c7] ss:$2 sm:$0xff]  ;;  %v1423_v54 = vld [vmem:[#allocation2 + $0x308] ss:$2 sm:$0xff] }
  0xdf   :  { %v603_v30 = vld [vmem:[#allocation2 + $0x287] ss:$2 sm:$0xff]  ;;  %v1427_v55 = vld [vmem:[#allocation2 + $0x348] ss:$2 sm:$0xff] }
  0xe0   :  { %10812 = vmatmul.mubr.msk.f32.gmra.mrb[12].mxu0 %vm67_vm0, %v13852_v16  ;;  %v607_v32 = vld [vmem:[#allocation2 + $0x2c7] ss:$2 sm:$0xff]  ;;  %v1431_v56 = vld [vmem:[#allocation2 + $0x388] ss:$2 sm:$0xff] }
  0xe1   :  { %10814 = vmatprep.mubr.msk.f32.mxu0 %vm67_vm0, %v13859_v18  ;;  %v611_v33 = vld [vmem:[#allocation2 + $0x307] ss:$2 sm:$0xff]  ;;  %v1435_v57 = vld [vmem:[#allocation2 + $0x3c8] ss:$2 sm:$0xff] }
  0xe2   :  { %v615_v35 = vld [vmem:[#allocation2 + $0x347] ss:$2 sm:$0xff]  ;;  %v1439_v58 = vld [vmem:[#allocation2 + $0x408] ss:$2 sm:$0xff] }
  0xe3   :  { %v619_v37 = vld [vmem:[#allocation2 + $0x387] ss:$2 sm:$0xff]  ;;  %v1389_v62 = vld [vmem:[#allocation2 + $0xa8] ss:$2 sm:$0xff] }
  0xe4   :  { %10815 = vmatmul.mubr.msk.f32.gmra.mrb[14].mxu0 %vm67_vm0, %v13866_v19  ;;  %v623_v38 = vld [vmem:[#allocation2 + $0x3c7] ss:$2 sm:$0xff]  ;;  %v1393_v0 = vld [vmem:[#allocation2 + $0xe8] ss:$2 sm:$0xff] }
  0xe5   :  { %10819 = vmatprep.mubr.msk.f32.mxu0 %vm67_vm0, %v567_v20  ;;  %v627_v39 = vld [vmem:[#allocation2 + $0x407] ss:$2 sm:$0xff]  ;;  %v1401_v2 = vld [vmem:[#allocation2 + $0x168] ss:$2 sm:$0xff] }
  0xe6   :  { %v599_v44 = vld [vmem:[#allocation2 + $0x207] ss:$2 sm:$0xff]  ;;  %v1405_v3 = vld [vmem:[#allocation2 + $0x1a8] ss:$2 sm:$0xff] }
  0xe7   :  { %v635_v45 = vld [vmem:[#allocation2 + $0x487] ss:$2 sm:$0xff]  ;;  %v1409_v4 = vld [vmem:[#allocation2 + $0x1e8] ss:$2 sm:$0xff] }
  0xe8   :  { %10820 = vmatmul.mubr.msk.f32.vlgmr.msra.gmra.mrb[0].mxu0 %vm67_vm0, %v571_v21  ;;  %v9615_v46 = vld [vmem:[%s14775_s1 + $0x14] sm:$0xf]  ;;  %v9669_v13 = vld [vmem:[%s14775_s1 + $0x8] sm:$0xf] }
  0xe9   :  { %10844 = vmatpush3.msk.msra.mxu0 %vm689_vm2, %v13695_v40  ;;  %10822 = vmatprep.mubr.msk.f32.mxu0 %vm67_vm0, %v575_v22  ;;  %v631_v40 = vld [vmem:[#allocation2 + $0x447] ss:$2 sm:$0xff]  ;;  %v1417_v5 = vld [vmem:[#allocation2 + $0x2a8] ss:$2 sm:$0xff] }
  0xea   :  { %10869 = vmatprep.subr.msk.mxu0 %vm689_vm2, %v9579_v23  ;;  %v9651_v63 = vld [vmem:[%s14775_s1 + $0x34] sm:$0xf] }
  0xeb   :  { %v1421_v6 = vld [vmem:[#allocation2 + $0x2e8] ss:$2 sm:$0xff]  ;;  %v14057_v20 = vld [vmem:[#allocation2 + $0x49] ss:$2 sm:$0xff] }
  0xec   :  { %10823 = vmatmul.mubr.msk.f32.gmra.mrb[2].mxu0 %vm67_vm0, %v579_v24  ;;  %v1425_v7 = vld [vmem:[#allocation2 + $0x328] ss:$2 sm:$0xff] }
  0xed   :  { %10825 = vmatprep.mubr.msk.f32.mxu0 %vm67_vm0, %v583_v25  ;;  %v1433_v9 = vld [vmem:[#allocation2 + $0x3a8] ss:$2 sm:$0xff] }
  0xee   :  { %v1441_v11 = vld [vmem:[#allocation2 + $0x428] ss:$2 sm:$0xff] }
  0xef   :  { %v1445_v12 = vld [vmem:[#allocation2 + $0x468] ss:$2 sm:$0xff] }
  0xf0   :  { %10826 = vmatmul.mubr.msk.f32.gmra.mrb[4].mxu0 %vm67_vm0, %v587_v26  ;;  %v1411_v14 = vld [vmem:[#allocation2 + $0x208] ss:$2 sm:$0xff] }
  0xf1   :  { %10828 = vmatprep.mubr.msk.f32.mxu0 %vm67_vm0, %v591_v27  ;;  %v1447_v15 = vld [vmem:[#allocation2 + $0x488] ss:$2 sm:$0xff] }
  0xf2   :  { %v1413_v17 = vld [vmem:[#allocation2 + $0x228] ss:$2 sm:$0xff] }
  0xf4   :  { %10829 = vmatmul.mubr.msk.f32.gmra.mrb[6].mxu0 %vm67_vm0, %v595_v29 }
  0xf5   :  { %10831 = vmatprep.mubr.msk.f32.mxu0 %vm67_vm0, %v603_v30  ;;  %v2263_v30 = vld [vmem:[#allocation2 + $0x2c9] ss:$2 sm:$0xff] }
  0xf8   :  { %10832 = vmatmul.mubr.msk.f32.gmra.mrb[8].mxu0 %vm67_vm0, %v607_v32 }
  0xf9   :  { %10834 = vmatprep.mubr.msk.f32.mxu0 %vm67_vm0, %v611_v33 }
  0xfc   :  { %10835 = vmatmul.mubr.msk.f32.gmra.mrb[10].mxu0 %vm67_vm0, %v615_v35 }
  0xfd   :  { %10837 = vmatprep.mubr.msk.f32.mxu0 %vm67_vm0, %v619_v37 }
 0x100   :  { %10838 = vmatmul.mubr.msk.f32.gmra.mrb[12].mxu0 %vm67_vm0, %v623_v38 }
 0x101   :  { %10840 = vmatprep.mubr.msk.f32.mxu0 %vm67_vm0, %v627_v39 }
 0x104   :  { %10841 = vmatmul.mubr.msk.f32.gmra.mrb[14].mxu0 %vm67_vm0, %v631_v40 }
 0x105   :  { %10845 = vmatprep.mubr.msk.f32.mxu0 %vm67_vm0, %v571_v21  ;;  %v14059_v21 = vld [vmem:[#allocation2 + $0x89] ss:$2 sm:$0xff] }
 0x108   :  { %10846 = vmatmul.mubr.msk.f32.vlgmr.msra.gmra.mrb[0].mxu0 %vm67_vm0, %v575_v22  ;;  %v9705_v22 = vld [vmem:[%s14775_s1 + $0x28] sm:$0xf] }
 0x109   :  { %10870 = vmatpush3.msk.msra.mxu0 %vm689_vm2, %v9579_v23  ;;  %10848 = vmatprep.mubr.msk.f32.mxu0 %vm67_vm0, %v579_v24  ;;  %v14069_v23 = vld [vmem:[#allocation2 + $0xc9] ss:$2 sm:$0xff] }
 0x10a   :  { %10895 = vmatprep.subr.msk.mxu0 %vm689_vm2, %v9597_v42  ;;  %v14071_v24 = vld [vmem:[#allocation2 + $0x109] ss:$2 sm:$0xff] }
 0x10c   :  { %10849 = vmatmul.mubr.msk.f32.gmra.mrb[2].mxu0 %vm67_vm0, %v583_v25  ;;  %v14078_v25 = vld [vmem:[#allocation2 + $0x149] ss:$2 sm:$0xff] }
 0x10d   :  { %10851 = vmatprep.mubr.msk.f32.mxu0 %vm67_vm0, %v587_v26  ;;  %v14080_v26 = vld [vmem:[#allocation2 + $0x189] ss:$2 sm:$0xff] }
 0x110   :  { %10852 = vmatmul.mubr.msk.f32.gmra.mrb[4].mxu0 %vm67_vm0, %v591_v27  ;;  %v2251_v27 = vld [vmem:[#allocation2 + $0x1c9] ss:$2 sm:$0xff] }
 0x111   :  { %10854 = vmatprep.mubr.msk.f32.mxu0 %vm67_vm0, %v595_v29  ;;  %v2259_v29 = vld [vmem:[#allocation2 + $0x289] ss:$2 sm:$0xff] }
 0x114   :  { %10855 = vmatmul.mubr.msk.f32.gmra.mrb[6].mxu0 %vm67_vm0, %v599_v44  ;;  %v2233_v44 = vld [vmem:[#allocation2 + $0xa9] ss:$2 sm:$0xff] }
 0x115   :  { %10857 = vmatprep.mubr.msk.f32.mxu0 %vm67_vm0, %v607_v32  ;;  %v2267_v32 = vld [vmem:[#allocation2 + $0x309] ss:$2 sm:$0xff] }
 0x118   :  { %10858 = vmatmul.mubr.msk.f32.gmra.mrb[8].mxu0 %vm67_vm0, %v611_v33  ;;  %v2271_v33 = vld [vmem:[#allocation2 + $0x349] ss:$2 sm:$0xff] }
 0x119   :  { %10860 = vmatprep.mubr.msk.f32.mxu0 %vm67_vm0, %v615_v35  ;;  %v2275_v35 = vld [vmem:[#allocation2 + $0x389] ss:$2 sm:$0xff] }
 0x11c   :  { %10861 = vmatmul.mubr.msk.f32.gmra.mrb[10].mxu0 %vm67_vm0, %v619_v37  ;;  %v2279_v37 = vld [vmem:[#allocation2 + $0x3c9] ss:$2 sm:$0xff] }
 0x11d   :  { %10863 = vmatprep.mubr.msk.f32.mxu0 %vm67_vm0, %v623_v38  ;;  %v2283_v38 = vld [vmem:[#allocation2 + $0x409] ss:$2 sm:$0xff] }
 0x120   :  { %10864 = vmatmul.mubr.msk.f32.gmra.mrb[12].mxu0 %vm67_vm0, %v627_v39  ;;  %v2287_v39 = vld [vmem:[#allocation2 + $0x449] ss:$2 sm:$0xff] }
 0x121   :  { %10866 = vmatprep.mubr.msk.f32.mxu0 %vm67_vm0, %v631_v40  ;;  %v2225_v40 = vld [vmem:[#allocation2 + $0x29] ss:$2 sm:$0xff] }
 0x124   :  { %10867 = vmatmul.mubr.msk.f32.gmra.mrb[14].mxu0 %vm67_vm0, %v635_v45  ;;  %v9723_v45 = vld [vmem:[%s14775_s1 + $0x38] sm:$0xf] }
 0x125   :  { %10871 = vmatprep.mubr.msk.f32.mxu0 %vm67_vm0, %v13643_v28  ;;  %v601_v28 = vld [vmem:[#allocation2 + $0x227] ss:$2 sm:$0xff] }
 0x128   :  { %10872 = vmatmul.mubr.msk.f32.vlgmr.msra.gmra.mrb[0].mxu0 %vm67_vm0, %v13655_v31  ;;  %v637_v31 = vld [vmem:[#allocation2 + $0x4a7] ss:$2 sm:$0xff] }
 0x129   :  { %10896 = vmatpush3.msk.msra.mxu0 %vm689_vm2, %v9597_v42  ;;  %10874 = vmatprep.mubr.msk.f32.mxu0 %vm67_vm0, %v13668_v34  ;;  %v1379_v34 = vld [vmem:[#allocation2 + $0x8] ss:$2 sm:$0xff]  ;;  %v2229_v42 = vld [vmem:[#allocation2 + $0x69] ss:$2 sm:$0xff] }
 0x12a   :  { %10921 = vmatprep.subr.msk.mxu0 %vm689_vm2, %v9615_v46 }
 0x12c   :  { %10875 = vmatmul.mubr.msk.f32.gmra.mrb[2].mxu0 %vm67_vm0, %v13675_v36  ;;  %v13949_v36 = vld [vmem:[#allocation2 + $0x48] ss:$2 sm:$0xff] }
 0x12d   :  { %10877 = vmatprep.mubr.msk.f32.mxu0 %vm67_vm0, %v13699_v41  ;;  %v13951_v41 = vld [vmem:[#allocation2 + $0x88] ss:$2 sm:$0xff] }
 0x130   :  { %10878 = vmatmul.mubr.msk.f32.gmra.mrb[4].mxu0 %vm67_vm0, %v13706_v43  ;;  %v9633_v43 = vld [vmem:[%s14775_s1 + $0x24] sm:$0xf] }
 0x131   :  { %10880 = vmatprep.mubr.msk.f32.mxu0 %vm67_vm0, %v13725_v48  ;;  %v13963_v48 = vld [vmem:[#allocation2 + $0x108] ss:$2 sm:$0xff] }
 0x134   :  { %10881 = vmatmul.mubr.msk.f32.gmra.mrb[6].mxu0 %vm67_vm0, %v601_v28  ;;  %v2241_v28 = vld [vmem:[#allocation2 + $0x129] ss:$2 sm:$0xff] }
 0x135   :  { %10883 = vmatprep.mubr.msk.f32.mxu0 %vm67_vm0, %v13767_v59  ;;  %v1443_v59 = vld [vmem:[#allocation2 + $0x448] ss:$2 sm:$0xff] }
 0x138   :  { %10884 = vmatmul.mubr.msk.f32.gmra.mrb[8].mxu0 %vm67_vm0, %v13789_v1  ;;  %v1397_v1 = vld [vmem:[#allocation2 + $0x128] ss:$2 sm:$0xff] }
 0x139   :  { %10886 = vmatprep.mubr.msk.f32.mxu0 %vm67_vm0, %v13820_v8  ;;  %v1429_v8 = vld [vmem:[#allocation2 + $0x368] ss:$2 sm:$0xff] }
 0x13c   :  { %10887 = vmatmul.mubr.msk.f32.gmra.mrb[10].mxu0 %vm67_vm0, %v13827_v10  ;;  %v1437_v10 = vld [vmem:[#allocation2 + $0x3e8] ss:$2 sm:$0xff] }
 0x13d   :  { %10889 = vmatprep.mubr.msk.f32.mxu0 %vm67_vm0, %v13852_v16  ;;  %v9687_v16 = vld [vmem:[%s14775_s1 + $0x18] sm:$0xf] }
 0x140   :  { %10890 = vmatmul.mubr.msk.f32.gmra.mrb[12].mxu0 %vm67_vm0, %v13859_v18  ;;  %v1449_v18 = vld [vmem:[#allocation2 + $0x4a8] ss:$2 sm:$0xff] }
 0x141   :  { %10892 = vmatprep.mubr.msk.f32.mxu0 %vm67_vm0, %v13866_v19  ;;  %v2223_v19 = vld [vmem:[#allocation2 + $0x9] ss:$2 sm:$0xff] }
 0x144   :  { %10893 = vmatmul.mubr.msk.f32.gmra.mrb[14].mxu0 %vm67_vm0, %v637_v31  ;;  %v2245_v31 = vld [vmem:[#allocation2 + $0x169] ss:$2 sm:$0xff] }
 0x145   :  { %10897 = vmatprep.mubr.msk.f32.mxu0 %vm67_vm0, %v1379_v34  ;;  %v2249_v34 = vld [vmem:[#allocation2 + $0x1a9] ss:$2 sm:$0xff] }
 0x148   :  { %10898 = vmatmul.mubr.msk.f32.vlgmr.msra.gmra.mrb[0].mxu0 %vm67_vm0, %v13949_v36 }
 0x149   :  { %10922 = vmatpush3.msk.msra.mxu0 %vm689_vm2, %v9615_v46  ;;  %10900 = vmatprep.mubr.msk.f32.mxu0 %vm67_vm0, %v13951_v41  ;;  %v2237_v46 = vld [vmem:[#allocation2 + $0xe9] ss:$2 sm:$0xff] }
 0x14a   :  { %10947 = vmatprep.subr.msk.mxu0 %vm689_vm2, %v9633_v43 }
 0x14c   :  { %10901 = vmatmul.mubr.msk.f32.gmra.mrb[2].mxu0 %vm67_vm0, %v13961_v47 }
 0x14d   :  { %10903 = vmatprep.mubr.msk.f32.mxu0 %vm67_vm0, %v13963_v48 }
 0x150   :  { %10904 = vmatmul.mubr.msk.f32.gmra.mrb[4].mxu0 %vm67_vm0, %v13970_v49 }
 0x151   :  { %10906 = vmatprep.mubr.msk.f32.mxu0 %vm67_vm0, %v13972_v50 }
 0x154   :  { %10907 = vmatmul.mubr.msk.f32.gmra.mrb[6].mxu0 %vm67_vm0, %v1407_v51 }
 0x155   :  { %10909 = vmatprep.mubr.msk.f32.mxu0 %vm67_vm0, %v1415_v52  ;;  %v2289_v52 = vld [vmem:[#allocation2 + $0x469] ss:$2 sm:$0xff] }
 0x158   :  { %10910 = vmatmul.mubr.msk.f32.gmra.mrb[8].mxu0 %vm67_vm0, %v1419_v53 }
 0x159   :  { %10912 = vmatprep.mubr.msk.f32.mxu0 %vm67_vm0, %v1423_v54 }
 0x15c   :  { %10913 = vmatmul.mubr.msk.f32.gmra.mrb[10].mxu0 %vm67_vm0, %v1427_v55 }
 0x15d   :  { %10915 = vmatprep.mubr.msk.f32.mxu0 %vm67_vm0, %v1431_v56 }
 0x160   :  { %10916 = vmatmul.mubr.msk.f32.gmra.mrb[12].mxu0 %vm67_vm0, %v1435_v57 }
 0x161   :  { %10918 = vmatprep.mubr.msk.f32.mxu0 %vm67_vm0, %v1439_v58 }
 0x164   :  { %10919 = vmatmul.mubr.msk.f32.gmra.mrb[14].mxu0 %vm67_vm0, %v1443_v59 }
 0x165   :  { %10923 = vmatprep.mubr.msk.f32.mxu0 %vm67_vm0, %v1381_v60  ;;  %v14165_v60 = vld [vmem:[#allocation2 + $0x4a] ss:$2 sm:$0xff] }
 0x168   :  { %10924 = vmatmul.mubr.msk.f32.vlgmr.msra.gmra.mrb[0].mxu0 %vm67_vm0, %v1385_v61 }
 0x169   :  { %10948 = vmatpush3.msk.msra.mxu0 %vm689_vm2, %v9633_v43  ;;  %10926 = vmatprep.mubr.msk.f32.mxu0 %vm67_vm0, %v1389_v62  ;;  %v2265_v43 = vld [vmem:[#allocation2 + $0x2e9] ss:$2 sm:$0xff] }
 0x16a   :  { %10973 = vmatprep.subr.msk.mxu0 %vm689_vm2, %v9651_v63 }
 0x16c   :  { %10927 = vmatmul.mubr.msk.f32.gmra.mrb[2].mxu0 %vm67_vm0, %v1393_v0 }
 0x16d   :  { %10929 = vmatprep.mubr.msk.f32.mxu0 %vm67_vm0, %v1397_v1 }
 0x170   :  { %10930 = vmatmul.mubr.msk.f32.gmra.mrb[4].mxu0 %vm67_vm0, %v1401_v2 }
 0x171   :  { %10932 = vmatprep.mubr.msk.f32.mxu0 %vm67_vm0, %v1405_v3 }
 0x174   :  { %10933 = vmatmul.mubr.msk.f32.gmra.mrb[6].mxu0 %vm67_vm0, %v1409_v4 }
 0x175   :  { %10935 = vmatprep.mubr.msk.f32.mxu0 %vm67_vm0, %v1417_v5  ;;  %v3107_v5 = vld [vmem:[#allocation2 + $0x2ca] ss:$2 sm:$0xff] }
 0x178   :  { %10936 = vmatmul.mubr.msk.f32.gmra.mrb[8].mxu0 %vm67_vm0, %v1421_v6 }
 0x179   :  { %10938 = vmatprep.mubr.msk.f32.mxu0 %vm67_vm0, %v1425_v7 }
 0x17c   :  { %10939 = vmatmul.mubr.msk.f32.gmra.mrb[10].mxu0 %vm67_vm0, %v1429_v8 }
 0x17d   :  { %10941 = vmatprep.mubr.msk.f32.mxu0 %vm67_vm0, %v1433_v9 }
 0x180   :  { %10942 = vmatmul.mubr.msk.f32.gmra.mrb[12].mxu0 %vm67_vm0, %v1437_v10 }
 0x181   :  { %10944 = vmatprep.mubr.msk.f32.mxu0 %vm67_vm0, %v1441_v11 }
 0x184   :  { %10945 = vmatmul.mubr.msk.f32.gmra.mrb[14].mxu0 %vm67_vm0, %v1445_v12 }
 0x185   :  { %10949 = vmatprep.mubr.msk.f32.mxu0 %vm67_vm0, %v13949_v36  ;;  %v2253_v36 = vld [vmem:[#allocation2 + $0x1e9] ss:$2 sm:$0xff] }
 0x188   :  { %10950 = vmatmul.mubr.msk.f32.vlgmr.msra.gmra.mrb[0].mxu0 %vm67_vm0, %v13951_v41  ;;  %v2261_v41 = vld [vmem:[#allocation2 + $0x2a9] ss:$2 sm:$0xff] }
 0x189   :  { %10974 = vmatpush3.msk.msra.mxu0 %vm689_vm2, %v9651_v63  ;;  %10952 = vmatprep.mubr.msk.f32.mxu0 %vm67_vm0, %v13961_v47  ;;  %v2269_v47 = vld [vmem:[#allocation2 + $0x329] ss:$2 sm:$0xff]  ;;  %v14177_v63 = vld [vmem:[#allocation2 + $0xca] ss:$2 sm:$0xff] }
 0x18a   :  { %10999 = vmatprep.subr.msk.mxu0 %vm689_vm2, %v9669_v13 }
 0x18c   :  { %10953 = vmatmul.mubr.msk.f32.gmra.mrb[2].mxu0 %vm67_vm0, %v13963_v48  ;;  %v2273_v48 = vld [vmem:[#allocation2 + $0x369] ss:$2 sm:$0xff] }
 0x18d   :  { %10955 = vmatprep.mubr.msk.f32.mxu0 %vm67_vm0, %v13970_v49  ;;  %v2277_v49 = vld [vmem:[#allocation2 + $0x3a9] ss:$2 sm:$0xff] }
 0x190   :  { %10956 = vmatmul.mubr.msk.f32.gmra.mrb[4].mxu0 %vm67_vm0, %v13972_v50  ;;  %v2281_v50 = vld [vmem:[#allocation2 + $0x3e9] ss:$2 sm:$0xff] }
 0x191   :  { %10958 = vmatprep.mubr.msk.f32.mxu0 %vm67_vm0, %v1407_v51  ;;  %v2285_v51 = vld [vmem:[#allocation2 + $0x429] ss:$2 sm:$0xff] }
 0x194   :  { %10959 = vmatmul.mubr.msk.f32.gmra.mrb[6].mxu0 %vm67_vm0, %v1411_v14  ;;  %v3077_v14 = vld [vmem:[#allocation2 + $0xaa] ss:$2 sm:$0xff] }
 0x195   :  { %10961 = vmatprep.mubr.msk.f32.mxu0 %vm67_vm0, %v1419_v53  ;;  %v9741_v53 = vld [vmem:[%s14775_s1 + $0xc] sm:$0xf] }
 0x198   :  { %10962 = vmatmul.mubr.msk.f32.gmra.mrb[8].mxu0 %vm67_vm0, %v1423_v54  ;;  %v2255_v54 = vld [vmem:[#allocation2 + $0x209] ss:$2 sm:$0xff] }
 0x199   :  { %10964 = vmatprep.mubr.msk.f32.mxu0 %vm67_vm0, %v1427_v55  ;;  %v2291_v55 = vld [vmem:[#allocation2 + $0x489] ss:$2 sm:$0xff] }
 0x19c   :  { %10965 = vmatmul.mubr.msk.f32.gmra.mrb[10].mxu0 %vm67_vm0, %v1431_v56  ;;  %v9759_v56 = vld [vmem:[%s14775_s1 + $0x1c] sm:$0xf] }
 0x19d   :  { %10967 = vmatprep.mubr.msk.f32.mxu0 %vm67_vm0, %v1435_v57  ;;  %v2257_v57 = vld [vmem:[#allocation2 + $0x229] ss:$2 sm:$0xff] }
 0x1a0   :  { %10968 = vmatmul.mubr.msk.f32.gmra.mrb[12].mxu0 %vm67_vm0, %v1439_v58  ;;  %v2293_v58 = vld [vmem:[#allocation2 + $0x4a9] ss:$2 sm:$0xff] }
 0x1a1   :  { %10970 = vmatprep.mubr.msk.f32.mxu0 %vm67_vm0, %v1443_v59  ;;  %v3067_v59 = vld [vmem:[#allocation2 + $0xa] ss:$2 sm:$0xff] }
 0x1a4   :  { %10971 = vmatmul.mubr.msk.f32.gmra.mrb[14].mxu0 %vm67_vm0, %v1447_v15  ;;  %v9795_v15 = vld [vmem:[%s14775_s1 + $0x3c] sm:$0xf] }
 0x1a5   :  { %10975 = vmatprep.mubr.msk.f32.mxu0 %vm67_vm0, %v1385_v61  ;;  %v14167_v61 = vld [vmem:[#allocation2 + $0x8a] ss:$2 sm:$0xff] }
 0x1a8   :  { %10976 = vmatmul.mubr.msk.f32.vlgmr.msra.gmra.mrb[0].mxu0 %vm67_vm0, %v1389_v62  ;;  %v9777_v62 = vld [vmem:[%s14775_s1 + $0x2c] sm:$0xf] }
 0x1a9   :  { %11000 = vmatpush3.msk.msra.mxu0 %vm689_vm2, %v9669_v13  ;;  %10978 = vmatprep.mubr.msk.f32.mxu0 %vm67_vm0, %v1393_v0  ;;  %v14179_v0 = vld [vmem:[#allocation2 + $0x10a] ss:$2 sm:$0xff] }
 0x1aa   :  { %11025 = vmatprep.subr.msk.mxu0 %vm689_vm2, %v9687_v16  ;;  %v3073_v13 = vld [vmem:[#allocation2 + $0x6a] ss:$2 sm:$0xff] }
 0x1ac   :  { %10979 = vmatmul.mubr.msk.f32.gmra.mrb[2].mxu0 %vm67_vm0, %v1397_v1  ;;  %v3087_v1 = vld [vmem:[#allocation2 + $0x14a] ss:$2 sm:$0xff] }
 0x1ad   :  { %10981 = vmatprep.mubr.msk.f32.mxu0 %vm67_vm0, %v1401_v2  ;;  %v3091_v2 = vld [vmem:[#allocation2 + $0x18a] ss:$2 sm:$0xff] }
 0x1b0   :  { %10982 = vmatmul.mubr.msk.f32.gmra.mrb[4].mxu0 %vm67_vm0, %v1405_v3  ;;  %v3095_v3 = vld [vmem:[#allocation2 + $0x1ca] ss:$2 sm:$0xff] }
 0x1b1   :  { %10984 = vmatprep.mubr.msk.f32.mxu0 %vm67_vm0, %v1409_v4  ;;  %v3103_v4 = vld [vmem:[#allocation2 + $0x28a] ss:$2 sm:$0xff] }
 0x1b4   :  { %10985 = vmatmul.mubr.msk.f32.gmra.mrb[6].mxu0 %vm67_vm0, %v1413_v17  ;;  %v3085_v17 = vld [vmem:[#allocation2 + $0x12a] ss:$2 sm:$0xff] }
 0x1b5   :  { %10987 = vmatprep.mubr.msk.f32.mxu0 %vm67_vm0, %v1421_v6  ;;  %v3111_v6 = vld [vmem:[#allocation2 + $0x30a] ss:$2 sm:$0xff] }
 0x1b8   :  { %10988 = vmatmul.mubr.msk.f32.gmra.mrb[8].mxu0 %vm67_vm0, %v1425_v7  ;;  %v3115_v7 = vld [vmem:[#allocation2 + $0x34a] ss:$2 sm:$0xff] }
 0x1b9   :  { %10990 = vmatprep.mubr.msk.f32.mxu0 %vm67_vm0, %v1429_v8  ;;  %v3119_v8 = vld [vmem:[#allocation2 + $0x38a] ss:$2 sm:$0xff] }
 0x1bc   :  { %10991 = vmatmul.mubr.msk.f32.gmra.mrb[10].mxu0 %vm67_vm0, %v1433_v9  ;;  %v3123_v9 = vld [vmem:[#allocation2 + $0x3ca] ss:$2 sm:$0xff] }
 0x1bd   :  { %10993 = vmatprep.mubr.msk.f32.mxu0 %vm67_vm0, %v1437_v10  ;;  %v3127_v10 = vld [vmem:[#allocation2 + $0x40a] ss:$2 sm:$0xff] }
 0x1c0   :  { %10994 = vmatmul.mubr.msk.f32.gmra.mrb[12].mxu0 %vm67_vm0, %v1441_v11  ;;  %v3131_v11 = vld [vmem:[#allocation2 + $0x44a] ss:$2 sm:$0xff] }
 0x1c1   :  { %10996 = vmatprep.mubr.msk.f32.mxu0 %vm67_vm0, %v1445_v12  ;;  %v3069_v12 = vld [vmem:[#allocation2 + $0x2a] ss:$2 sm:$0xff] }
 0x1c4   :  { %10997 = vmatmul.mubr.msk.f32.gmra.mrb[14].mxu0 %vm67_vm0, %v1449_v18  ;;  %v3089_v18 = vld [vmem:[#allocation2 + $0x16a] ss:$2 sm:$0xff] }
 0x1c5   :  { %11001 = vmatprep.mubr.msk.f32.mxu0 %vm67_vm0, %v2223_v19  ;;  %v3093_v19 = vld [vmem:[#allocation2 + $0x1aa] ss:$2 sm:$0xff] }
 0x1c8   :  { %11002 = vmatmul.mubr.msk.f32.vlgmr.msra.gmra.mrb[0].mxu0 %vm67_vm0, %v14057_v20 }
 0x1c9   :  { %11026 = vmatpush3.msk.msra.mxu0 %vm689_vm2, %v9687_v16  ;;  %11004 = vmatprep.mubr.msk.f32.mxu0 %vm67_vm0, %v14059_v21  ;;  %v3081_v16 = vld [vmem:[#allocation2 + $0xea] ss:$2 sm:$0xff] }
 0x1ca   :  { %11051 = vmatprep.subr.msk.mxu0 %vm689_vm2, %v9705_v22 }
 0x1cc   :  { %11005 = vmatmul.mubr.msk.f32.gmra.mrb[2].mxu0 %vm67_vm0, %v14069_v23 }
 0x1cd   :  { %11007 = vmatprep.mubr.msk.f32.mxu0 %vm67_vm0, %v14071_v24 }
 0x1d0   :  { %11008 = vmatmul.mubr.msk.f32.gmra.mrb[4].mxu0 %vm67_vm0, %v14078_v25 }
 0x1d1   :  { %11010 = vmatprep.mubr.msk.f32.mxu0 %vm67_vm0, %v14080_v26 }
 0x1d4   :  { %11011 = vmatmul.mubr.msk.f32.gmra.mrb[6].mxu0 %vm67_vm0, %v2251_v27 }
 0x1d5   :  { %11013 = vmatprep.mubr.msk.f32.mxu0 %vm67_vm0, %v2259_v29  ;;  %v3133_v29 = vld [vmem:[#allocation2 + $0x46a] ss:$2 sm:$0xff] }
 0x1d8   :  { %11014 = vmatmul.mubr.msk.f32.gmra.mrb[8].mxu0 %vm67_vm0, %v2263_v30 }
 0x1d9   :  { %11016 = vmatprep.mubr.msk.f32.mxu0 %vm67_vm0, %v2267_v32 }
 0x1dc   :  { %11017 = vmatmul.mubr.msk.f32.gmra.mrb[10].mxu0 %vm67_vm0, %v2271_v33 }
 0x1dd   :  { %11019 = vmatprep.mubr.msk.f32.mxu0 %vm67_vm0, %v2275_v35 }
 0x1e0   :  { %11020 = vmatmul.mubr.msk.f32.gmra.mrb[12].mxu0 %vm67_vm0, %v2279_v37 }
 0x1e1   :  { %11022 = vmatprep.mubr.msk.f32.mxu0 %vm67_vm0, %v2283_v38 }
 0x1e4   :  { %11023 = vmatmul.mubr.msk.f32.gmra.mrb[14].mxu0 %vm67_vm0, %v2287_v39 }
 0x1e5   :  { %11027 = vmatprep.mubr.msk.f32.mxu0 %vm67_vm0, %v2225_v40  ;;  %v9816_v40 = vld [vmem:[%s14777_s3 + $0x90] sm:$0xff] }
 0x1e8   :  { %11028 = vmatmul.mubr.msk.f32.vlgmr.msra.gmra.mrb[0].mxu0 %vm67_vm0, %v2229_v42 }
 0x1e9   :  { %11052 = vmatpush3.msk.msra.mxu0 %vm689_vm2, %v9705_v22  ;;  %11030 = vmatprep.mubr.msk.f32.mxu0 %vm67_vm0, %v2233_v44  ;;  %v3109_v22 = vld [vmem:[#allocation2 + $0x2ea] ss:$2 sm:$0xff] }
 0x1ea   :  { %11077 = vmatprep.subr.msk.mxu0 %vm689_vm2, %v9723_v45 }
 0x1ec   :  { %11031 = vmatmul.mubr.msk.f32.gmra.mrb[2].mxu0 %vm67_vm0, %v2237_v46 }
 0x1ed   :  { %11033 = vmatprep.mubr.msk.f32.mxu0 %vm67_vm0, %v2241_v28 }
 0x1f0   :  { %11034 = vmatmul.mubr.msk.f32.gmra.mrb[4].mxu0 %vm67_vm0, %v2245_v31 }
 0x1f1   :  { %11036 = vmatprep.mubr.msk.f32.mxu0 %vm67_vm0, %v2249_v34 }
 0x1f4   :  { %11037 = vmatmul.mubr.msk.f32.gmra.mrb[6].mxu0 %vm67_vm0, %v2253_v36 }
 0x1f5   :  { %11039 = vmatprep.mubr.msk.f32.mxu0 %vm67_vm0, %v2261_v41 }
 0x1f8   :  { %11040 = vmatmul.mubr.msk.f32.gmra.mrb[8].mxu0 %vm67_vm0, %v2265_v43 }
 0x1f9   :  { %11042 = vmatprep.mubr.msk.f32.mxu0 %vm67_vm0, %v2269_v47 }
 0x1fc   :  { %11043 = vmatmul.mubr.msk.f32.gmra.mrb[10].mxu0 %vm67_vm0, %v2273_v48 }
 0x1fd   :  { %11045 = vmatprep.mubr.msk.f32.mxu0 %vm67_vm0, %v2277_v49 }
 0x200   :  { %11046 = vmatmul.mubr.msk.f32.gmra.mrb[12].mxu0 %vm67_vm0, %v2281_v50 }
 0x201   :  { %11048 = vmatprep.mubr.msk.f32.mxu0 %vm67_vm0, %v2285_v51 }
 0x204   :  { %11049 = vmatmul.mubr.msk.f32.gmra.mrb[14].mxu0 %vm67_vm0, %v2289_v52 }
 0x205   :  { %11053 = vmatprep.mubr.msk.f32.mxu0 %vm67_vm0, %v14057_v20  ;;  %v3097_v20 = vld [vmem:[#allocation2 + $0x1ea] ss:$2 sm:$0xff] }
 0x208   :  { %11054 = vmatmul.mubr.msk.f32.vlgmr.msra.gmra.mrb[0].mxu0 %vm67_vm0, %v14059_v21  ;;  %v3105_v21 = vld [vmem:[#allocation2 + $0x2aa] ss:$2 sm:$0xff] }
 0x209   :  { %11078 = vmatpush3.msk.msra.mxu0 %vm689_vm2, %v9723_v45  ;;  %11056 = vmatprep.mubr.msk.f32.mxu0 %vm67_vm0, %v14069_v23  ;;  %v3113_v23 = vld [vmem:[#allocation2 + $0x32a] ss:$2 sm:$0xff]  ;;  %v3990_v45 = vld [vmem:[%s14777_s3] sm:$0xff] }
 0x20a   :  { %11103 = vmatprep.subr.msk.mxu0 %vm689_vm2, %v9741_v53 }
 0x20c   :  { %11057 = vmatmul.mubr.msk.f32.gmra.mrb[2].mxu0 %vm67_vm0, %v14071_v24  ;;  %v3117_v24 = vld [vmem:[#allocation2 + $0x36a] ss:$2 sm:$0xff] }
 0x20d   :  { %11059 = vmatprep.mubr.msk.f32.mxu0 %vm67_vm0, %v14078_v25  ;;  %v3121_v25 = vld [vmem:[#allocation2 + $0x3aa] ss:$2 sm:$0xff] }
 0x210   :  { %11060 = vmatmul.mubr.msk.f32.gmra.mrb[4].mxu0 %vm67_vm0, %v14080_v26  ;;  %v3125_v26 = vld [vmem:[#allocation2 + $0x3ea] ss:$2 sm:$0xff] }
 0x211   :  { %11062 = vmatprep.mubr.msk.f32.mxu0 %vm67_vm0, %v2251_v27  ;;  %v3129_v27 = vld [vmem:[#allocation2 + $0x42a] ss:$2 sm:$0xff] }
 0x214   :  { %11063 = vmatmul.mubr.msk.f32.gmra.mrb[6].mxu0 %vm67_vm0, %v2255_v54 }
 0x215   :  { %11065 = vmatprep.mubr.msk.f32.mxu0 %vm67_vm0, %v2263_v30  ;;  %v3099_v30 = vld [vmem:[#allocation2 + $0x20a] ss:$2 sm:$0xff] }
 0x218   :  { %11066 = vmatmul.mubr.msk.f32.gmra.mrb[8].mxu0 %vm67_vm0, %v2267_v32  ;;  %v3135_v32 = vld [vmem:[#allocation2 + $0x48a] ss:$2 sm:$0xff] }
 0x219   :  { %11068 = vmatprep.mubr.msk.f32.mxu0 %vm67_vm0, %v2271_v33  ;;  %v3101_v33 = vld [vmem:[#allocation2 + $0x22a] ss:$2 sm:$0xff] }
 0x21c   :  { %11069 = vmatmul.mubr.msk.f32.gmra.mrb[10].mxu0 %vm67_vm0, %v2275_v35  ;;  %v3137_v35 = vld [vmem:[#allocation2 + $0x4aa] ss:$2 sm:$0xff] }
 0x21d   :  { %11071 = vmatprep.mubr.msk.f32.mxu0 %vm67_vm0, %v2279_v37  ;;  %v9814_v37 = vld [vmem:[%s14777_s3 + $0x80] sm:$0xff] }
 0x220   :  { %11072 = vmatmul.mubr.msk.f32.gmra.mrb[12].mxu0 %vm67_vm0, %v2283_v38  ;;  %v9815_v38 = vld [vmem:[%s14777_s3 + $0x88] sm:$0xff] }
 0x221   :  { %11074 = vmatprep.mubr.msk.f32.mxu0 %vm67_vm0, %v2287_v39  ;;  %v11927_v39 = vpack.c.bf16 %v9815_v38, %v9814_v37  ;;  %v3971_v37 = vld [vmem:[#allocation3 + $0x187] ss:$2 sm:$0xff] }
 0x223   :  { %11928 = vmatprep.subr.bf16.mxu1 %v11927_v39 }
 0x224   :  { %11075 = vmatmul.mubr.msk.f32.gmra.mrb[14].mxu0 %vm67_vm0, %v2291_v55  ;;  %11930 = vmatpush3.bf16.msra.mxu1 %v11927_v39 }
 0x225   :  { %11079 = vmatprep.mubr.msk.f32.mxu0 %vm67_vm0, %v2229_v42  ;;  %v9817_v42 = vld [vmem:[%s14777_s3 + $0x98] sm:$0xff] }
 0x228   :  { %11080 = vmatmul.mubr.msk.f32.vlgmr.msra.gmra.mrb[0].mxu0 %vm67_vm0, %v2233_v44  ;;  %v11931_v44 = vpack.c.bf16 %v9817_v42, %v9816_v40 }
 0x229   :  { %11104 = vmatpush3.msk.msra.mxu0 %vm689_vm2, %v9741_v53  ;;  %11082 = vmatprep.mubr.msk.f32.mxu0 %vm67_vm0, %v2237_v46  ;;  %v3991_v46 = vld [vmem:[%s14777_s3 + $0x8] sm:$0xff] }
 0x22a   :  { %11129 = vmatprep.subr.msk.mxu0 %vm689_vm2, %v9759_v56  ;;  %11932 = vmatprep.subr.bf16.mxu1 %v11931_v44 }
 0x22b   :  { %11934 = vmatpush3.bf16.msra.mxu1 %v11931_v44 }
 0x22c   :  { %11083 = vmatmul.mubr.msk.f32.gmra.mrb[2].mxu0 %vm67_vm0, %v2241_v28  ;;  %v11935_v28 = vpack.c.bf16 %v3991_v46, %v3990_v45  ;;  %v9848_v45 = vld [vmem:[%s14777_s3 + $0x190] sm:$0xff]  ;;  %v9849_v46 = vld [vmem:[%s14777_s3 + $0x198] sm:$0xff] }
 0x22d   :  { %11085 = vmatprep.mubr.msk.f32.mxu0 %vm67_vm0, %v2245_v31  ;;  %v14276_v31 = vld [vmem:[%s14776_s2] ss:$0 sm:$0xff] }
 0x22e   :  { %11936 = vmatprep.subr.bf16.mxu1 %v11935_v28 }
 0x230   :  { %11086 = vmatmul.mubr.msk.f32.gmra.mrb[4].mxu0 %vm67_vm0, %v2249_v34 }
 0x231   :  { %11088 = vmatprep.mubr.msk.f32.mxu0 %vm67_vm0, %v2253_v36 }
 0x234   :  { %11089 = vmatmul.mubr.msk.f32.gmra.mrb[6].mxu0 %vm67_vm0, %v2257_v57  ;;  %v3993_v57 = vld [vmem:[%s14777_s3 + $0x18] sm:$0xff] }
 0x235   :  { %11091 = vmatprep.mubr.msk.f32.mxu0 %vm67_vm0, %v2265_v43 }
 0x238   :  { %11092 = vmatmul.mubr.msk.f32.gmra.mrb[8].mxu0 %vm67_vm0, %v2269_v47 }
 0x239   :  { %11094 = vmatprep.mubr.msk.f32.mxu0 %vm67_vm0, %v2273_v48 }
 0x23c   :  { %11095 = vmatmul.mubr.msk.f32.gmra.mrb[10].mxu0 %vm67_vm0, %v2277_v49 }
 0x23d   :  { %11097 = vmatprep.mubr.msk.f32.mxu0 %vm67_vm0, %v2281_v50 }
 0x240   :  { %11098 = vmatmul.mubr.msk.f32.gmra.mrb[12].mxu0 %vm67_vm0, %v2285_v51 }
 0x241   :  { %11100 = vmatprep.mubr.msk.f32.mxu0 %vm67_vm0, %v2289_v52 }
 0x244   :  { %11101 = vmatmul.mubr.msk.f32.gmra.mrb[14].mxu0 %vm67_vm0, %v2293_v58 }
 0x245   :  { %11105 = vmatprep.mubr.msk.f32.mxu0 %vm67_vm0, %v3067_v59 }
 0x248   :  { %11106 = vmatmul.mubr.msk.f32.vlgmr.msra.gmra.mrb[0].mxu0 %vm67_vm0, %v14165_v60 }
 0x249   :  { %11130 = vmatpush3.msk.msra.mxu0 %vm689_vm2, %v9759_v56  ;;  %11108 = vmatprep.mubr.msk.f32.mxu0 %vm67_vm0, %v14167_v61  ;;  %v3992_v56 = vld [vmem:[%s14777_s3 + $0x10] sm:$0xff] }
 0x24a   :  { %11155 = vmatprep.subr.msk.mxu0 %vm689_vm2, %v9777_v62 }
 0x24c   :  { %11109 = vmatmul.mubr.msk.f32.gmra.mrb[2].mxu0 %vm67_vm0, %v14177_v63 }
 0x24d   :  { %11111 = vmatprep.mubr.msk.f32.mxu0 %vm67_vm0, %v14179_v0 }
 0x250   :  { %11112 = vmatmul.mubr.msk.f32.gmra.mrb[4].mxu0 %vm67_vm0, %v3087_v1 }
 0x251   :  { %11114 = vmatprep.mubr.msk.f32.mxu0 %vm67_vm0, %v3091_v2 }
 0x254   :  { %11115 = vmatmul.mubr.msk.f32.gmra.mrb[6].mxu0 %vm67_vm0, %v3095_v3 }
 0x255   :  { %11117 = vmatprep.mubr.msk.f32.mxu0 %vm67_vm0, %v3103_v4 }
 0x258   :  { %11118 = vmatmul.mubr.msk.f32.gmra.mrb[8].mxu0 %vm67_vm0, %v3107_v5 }
 0x259   :  { %11120 = vmatprep.mubr.msk.f32.mxu0 %vm67_vm0, %v3111_v6 }
 0x25c   :  { %11121 = vmatmul.mubr.msk.f32.gmra.mrb[10].mxu0 %vm67_vm0, %v3115_v7 }
 0x25d   :  { %11123 = vmatprep.mubr.msk.f32.mxu0 %vm67_vm0, %v3119_v8 }
 0x260   :  { %11124 = vmatmul.mubr.msk.f32.gmra.mrb[12].mxu0 %vm67_vm0, %v3123_v9 }
 0x261   :  { %11126 = vmatprep.mubr.msk.f32.mxu0 %vm67_vm0, %v3127_v10 }
 0x264   :  { %11127 = vmatmul.mubr.msk.f32.gmra.mrb[14].mxu0 %vm67_vm0, %v3131_v11 }
 0x265   :  { %11131 = vmatprep.mubr.msk.f32.mxu0 %vm67_vm0, %v3069_v12 }
 0x268   :  { %11132 = vmatmul.mubr.msk.f32.vlgmr.msra.gmra.mrb[0].mxu0 %vm67_vm0, %v3073_v13 }
 0x269   :  { %11156 = vmatpush3.msk.msra.mxu0 %vm689_vm2, %v9777_v62  ;;  %11134 = vmatprep.mubr.msk.f32.mxu0 %vm67_vm0, %v3077_v14  ;;  %v11939_v62 = vpack.c.bf16 %v3993_v57, %v3992_v56  ;;  %v9872_v56 = vld [vmem:[%s14777_s3 + $0xb0] sm:$0xff]  ;;  %v9873_v57 = vld [vmem:[%s14777_s3 + $0xb8] sm:$0xff] }
 0x26a   :  { %11181 = vmatprep.subr.msk.mxu0 %vm689_vm2, %v9795_v15 }
 0x26c   :  { %11135 = vmatmul.mubr.msk.f32.gmra.mrb[2].mxu0 %vm67_vm0, %v3081_v16 }
 0x26d   :  { %11137 = vmatprep.mubr.msk.f32.mxu0 %vm67_vm0, %v3085_v17 }
 0x270   :  { %11138 = vmatmul.mubr.msk.f32.gmra.mrb[4].mxu0 %vm67_vm0, %v3089_v18 }
 0x271   :  { %11140 = vmatprep.mubr.msk.f32.mxu0 %vm67_vm0, %v3093_v19 }
 0x274   :  { %11141 = vmatmul.mubr.msk.f32.gmra.mrb[6].mxu0 %vm67_vm0, %v3097_v20 }
 0x275   :  { %11143 = vmatprep.mubr.msk.f32.mxu0 %vm67_vm0, %v3105_v21 }
 0x278   :  { %11144 = vmatmul.mubr.msk.f32.gmra.mrb[8].mxu0 %vm67_vm0, %v3109_v22 }
 0x279   :  { %11146 = vmatprep.mubr.msk.f32.mxu0 %vm67_vm0, %v3113_v23 }
 0x27c   :  { %11147 = vmatmul.mubr.msk.f32.gmra.mrb[10].mxu0 %vm67_vm0, %v3117_v24 }
 0x27d   :  { %11149 = vmatprep.mubr.msk.f32.mxu0 %vm67_vm0, %v3121_v25 }
 0x280   :  { %11150 = vmatmul.mubr.msk.f32.gmra.mrb[12].mxu0 %vm67_vm0, %v3125_v26 }
 0x281   :  { %11152 = vmatprep.mubr.msk.f32.mxu0 %vm67_vm0, %v3129_v27 }
 0x284   :  { %11153 = vmatmul.mubr.msk.f32.gmra.mrb[14].mxu0 %vm67_vm0, %v3133_v29 }
 0x285   :  { %11157 = vmatprep.mubr.msk.f32.mxu0 %vm67_vm0, %v14165_v60 }
 0x288   :  { %11158 = vmatmul.mubr.msk.f32.vlgmr.msra.gmra.mrb[0].mxu0 %vm67_vm0, %v14167_v61 }
 0x289   :  { %11182 = vmatpush3.msk.msra.mxu0 %vm689_vm2, %v9795_v15  ;;  %11160 = vmatprep.mubr.msk.f32.mxu0 %vm67_vm0, %v14177_v63 }
 0x28c   :  { %11161 = vmatmul.mubr.msk.f32.gmra.mrb[2].mxu0 %vm67_vm0, %v14179_v0  ;;  %v9834_v0 = vld [vmem:[%s14777_s3 + $0x100] sm:$0xff] }
 0x28d   :  { %11163 = vmatprep.mubr.msk.f32.mxu0 %vm67_vm0, %v3087_v1  ;;  %v9835_v1 = vld [vmem:[%s14777_s3 + $0x108] sm:$0xff] }
 0x290   :  { %11164 = vmatmul.mubr.msk.f32.gmra.mrb[4].mxu0 %vm67_vm0, %v3091_v2 }
 0x291   :  { %11166 = vmatprep.mubr.msk.f32.mxu0 %vm67_vm0, %v3095_v3 }
 0x294   :  { %11167 = vmatmul.mubr.msk.f32.gmra.mrb[6].mxu0 %vm67_vm0, %v3099_v30 }
 0x295   :  { %11169 = vmatprep.mubr.msk.f32.mxu0 %vm67_vm0, %v3107_v5 }
 0x298   :  { %11170 = vmatmul.mubr.msk.f32.gmra.mrb[8].mxu0 %vm67_vm0, %v3111_v6  ;;  %v11943_v6 = vpack.c.bf16 %v9835_v1, %v9834_v0 }
 0x299   :  { %11172 = vmatprep.mubr.msk.f32.mxu0 %vm67_vm0, %v3115_v7 }
 0x29c   :  { %11173 = vmatmul.mubr.msk.f32.gmra.mrb[10].mxu0 %vm67_vm0, %v3119_v8 }
 0x29d   :  { %11175 = vmatprep.mubr.msk.f32.mxu0 %vm67_vm0, %v3123_v9 }
 0x2a0   :  { %11176 = vmatmul.mubr.msk.f32.gmra.mrb[12].mxu0 %vm67_vm0, %v3127_v10 }
 0x2a1   :  { %11178 = vmatprep.mubr.msk.f32.mxu0 %vm67_vm0, %v3131_v11 }
 0x2a4   :  { %11179 = vmatmul.mubr.msk.f32.gmra.mrb[14].mxu0 %vm67_vm0, %v3135_v32  ;;  %v9846_v32 = vld [vmem:[%s14777_s3 + $0x180] sm:$0xff] }
 0x2a5   :  { %11183 = vmatprep.mubr.msk.f32.mxu0 %vm67_vm0, %v3073_v13 }
 0x2a8   :  { %11184 = vmatmul.mubr.msk.f32.vlgmr.msra.gmra.mrb[0].mxu0 %vm67_vm0, %v3077_v14 }
 0x2a9   :  { %11186 = vmatprep.mubr.msk.f32.mxu0 %vm67_vm0, %v3081_v16 }
 0x2ac   :  { %11187 = vmatmul.mubr.msk.f32.gmra.mrb[2].mxu0 %vm67_vm0, %v3085_v17 }
 0x2ad   :  { %11189 = vmatprep.mubr.msk.f32.mxu0 %vm67_vm0, %v3089_v18 }
 0x2b0   :  { %11190 = vmatmul.mubr.msk.f32.gmra.mrb[4].mxu0 %vm67_vm0, %v3093_v19 }
 0x2b1   :  { %11192 = vmatprep.mubr.msk.f32.mxu0 %vm67_vm0, %v3097_v20 }
 0x2b4   :  { %11193 = vmatmul.mubr.msk.f32.gmra.mrb[6].mxu0 %vm67_vm0, %v3101_v33  ;;  %v9847_v33 = vld [vmem:[%s14777_s3 + $0x188] sm:$0xff] }
 0x2b5   :  { %11195 = vmatprep.mubr.msk.f32.mxu0 %vm67_vm0, %v3109_v22  ;;  %v11951_v38 = vpack.c.bf16 %v9847_v33, %v9846_v32  ;;  %v9918_v32 = vld [vmem:[%s14777_s3 + $0xc0] sm:$0xff]  ;;  %v9919_v33 = vld [vmem:[%s14777_s3 + $0xc8] sm:$0xff] }
 0x2b8   :  { %11196 = vmatmul.mubr.msk.f32.gmra.mrb[8].mxu0 %vm67_vm0, %v3113_v23 }
 0x2b9   :  { %11198 = vmatprep.mubr.msk.f32.mxu0 %vm67_vm0, %v3117_v24  ;;  %v3951_v24 = vld [vmem:[#allocation3 + $0x7] ss:$2 sm:$0xff] }
 0x2bc   :  { %11199 = vmatmul.mubr.msk.f32.gmra.mrb[10].mxu0 %vm67_vm0, %v3121_v25 }
 0x2bd   :  { %11201 = vmatprep.mubr.msk.f32.mxu0 %vm67_vm0, %v3125_v26  ;;  %v9836_v26 = vld [vmem:[%s14777_s3 + $0x110] sm:$0xff] }
 0x2c0   :  { %11202 = vmatmul.mubr.msk.f32.gmra.mrb[12].mxu0 %vm67_vm0, %v3129_v27  ;;  %v9837_v27 = vld [vmem:[%s14777_s3 + $0x118] sm:$0xff] }
 0x2c1   :  { %11204 = vmatprep.mubr.msk.f32.mxu0 %vm67_vm0, %v3133_v29  ;;  %v11947_v29 = vpack.c.bf16 %v9837_v27, %v9836_v26  ;;  %v9908_v27 = vld [vmem:[%s14777_s3 + $0x50] sm:$0xff] }
 0x2c4   :  { %11205 = vmatmul.mubr.msk.f32.gmra.mrb[14].mxu0 %vm67_vm0, %v3137_v35 }
 0x37b   :  { %v11185_v34 = vpop.f32.mrb[0].mxu0 }
 0x37c   :  { %v3918_v36 = vadd.f32 %v11185_v34, %v14276_v31  ;;  %v3815_v41 = vpop.f32.mrb[1].mxu0  ;;  %v9859_v34 = vld [vmem:[%s14777_s3 + $0x28] sm:$0xff] }
 0x37d   :  { %v3917_v43 = vadd.f32 %v14276_v31, %v3815_v41 }
 0x37e   :  { %3935 = vst.msk [vmem:[#allocation3 + $0x48] sm:$0xff] %vm228_vm1, %v3918_v36 }
 0x37f   :  { %3934 = vst.msk [vmem:[#allocation3 + $0x28] sm:$0xff] %vm228_vm1, %v3917_v43  ;;  %v11188_v47 = vpop.f32.mrb[2].mxu0 }
 0x380   :  { %v3920_v48 = vadd.f32 %v11188_v47, %v14276_v31  ;;  %v3825_v49 = vpop.f32.mrb[3].mxu0  ;;  %v9860_v47 = vld [vmem:[%s14777_s3 + $0x30] sm:$0xff] }
 0x381   :  { %v3919_v50 = vadd.f32 %v14276_v31, %v3825_v49 }
 0x382   :  { %3937 = vst.msk [vmem:[#allocation3 + $0x88] sm:$0xff] %vm228_vm1, %v3920_v48  ;;  %v9861_v48 = vld [vmem:[%s14777_s3 + $0x38] sm:$0xff] }
 0x383   :  { %3936 = vst.msk [vmem:[#allocation3 + $0x68] sm:$0xff] %vm228_vm1, %v3919_v50  ;;  %v11191_v51 = vpop.f32.mrb[4].mxu0  ;;  %v11963_v49 = vpack.c.bf16 %v9861_v48, %v9860_v47  ;;  %v9870_v50 = vld [vmem:[%s14777_s3 + $0xa0] sm:$0xff] }
 0x384   :  { %v3922_v52 = vadd.f32 %v11191_v51, %v14276_v31  ;;  %v3835_v53 = vpop.f32.mrb[5].mxu0  ;;  %v9871_v51 = vld [vmem:[%s14777_s3 + $0xa8] sm:$0xff] }
 0x385   :  { %v3921_v54 = vadd.f32 %v14276_v31, %v3835_v53  ;;  %v3955_v30 = vld [vmem:[#allocation3 + $0x47] ss:$2 sm:$0xff]  ;;  %v11967_v53 = vpack.c.bf16 %v9871_v51, %v9870_v50  ;;  %v9933_v50 = vld [vmem:[%s14777_s3 + $0x158] sm:$0xff] }
 0x386   :  { %3939 = vst.msk [vmem:[#allocation3 + $0xc8] sm:$0xff] %vm228_vm1, %v3922_v52  ;;  %v3953_v55 = vld [vmem:[#allocation3 + $0x27] ss:$2 sm:$0xff] }
 0x387   :  { %3938 = vst.msk [vmem:[#allocation3 + $0xa8] sm:$0xff] %vm228_vm1, %v3921_v54  ;;  %v11194_v58 = vpop.f32.mrb[6].mxu0  ;;  %11215 = vmatprep.mubr.msk.f32.mxu1 %vm228_vm1, %v3953_v55  ;;  %v3969_v52 = vld [vmem:[#allocation3 + $0x127] ss:$2 sm:$0xff]  ;;  %v4506_v55 = vld [vmem:[#allocation3 + $0x8] ss:$2 sm:$0xff] }
 0x388   :  { %v3924_v59 = vadd.f32 %v11194_v58, %v14276_v31  ;;  %v3845_v60 = vpop.f32.mrb[7].mxu0  ;;  %v3989_v54 = vld [vmem:[#allocation3 + $0x2a7] ss:$2 sm:$0xff]  ;;  %v11971_v58 = vpack.c.bf16 %v9873_v57, %v9872_v56 }
 0x389   :  { %v3923_v61 = vadd.f32 %v14276_v31, %v3845_v60  ;;  %v3959_v35 = vld [vmem:[#allocation3 + $0x87] ss:$2 sm:$0xff] }
 0x38a   :  { %3941 = vst.msk [vmem:[#allocation3 + $0x108] sm:$0xff] %vm228_vm1, %v3924_v59  ;;  %v14300_v63 = vld [vmem:[#allocation3 + $0x67] ss:$2 sm:$0xff]  ;;  %v4510_v59 = vld [vmem:[#allocation3 + $0x48] ss:$2 sm:$0xff] }
 0x38b   :  { %3940 = vst.msk [vmem:[#allocation3 + $0xe8] sm:$0xff] %vm228_vm1, %v3923_v61  ;;  %v11197_v2 = vpop.f32.mrb[8].mxu0  ;;  %11216 = vmatmul.mubr.msk.f32.vlgmr.msra.gmra.mrb[0].mxu1 %vm228_vm1, %v14300_v63  ;;  %v9882_v60 = vld [vmem:[%s14777_s3 + $0x120] sm:$0xff]  ;;  %v9883_v61 = vld [vmem:[%s14777_s3 + $0x128] sm:$0xff] }
 0x38c   :  { %v3926_v3 = vadd.f32 %v11197_v2, %v14276_v31  ;;  %v3855_v4 = vpop.f32.mrb[9].mxu0  ;;  %11938 = vmatpush3.bf16.msra.mxu1 %v11935_v28  ;;  %v11955_v28 = vpack.c.bf16 %v9849_v46, %v9848_v45  ;;  %v11975_v0 = vpack.c.bf16 %v9883_v61, %v9882_v60  ;;  %v5082_v45 = vld [vmem:[#allocation3 + $0x49] ss:$2 sm:$0xff]  ;;  %v9930_v46 = vld [vmem:[%s14777_s3 + $0x140] sm:$0xff] }
 0x38d   :  { %v3925_v5 = vadd.f32 %v14276_v31, %v3855_v4  ;;  %11940 = vmatprep.subr.bf16.mxu1 %v11939_v62  ;;  %v3963_v39 = vld [vmem:[#allocation3 + $0xc7] ss:$2 sm:$0xff]  ;;  %v4518_v1 = vld [vmem:[#allocation3 + $0xc8] ss:$2 sm:$0xff] }
 0x38e   :  { %3943 = vst.msk [vmem:[#allocation3 + $0x1c8] sm:$0xff] %vm228_vm1, %v3926_v3  ;;  %v14314_v7 = vld [vmem:[#allocation3 + $0xa7] ss:$2 sm:$0xff] }
 0x38f   :  { %3942 = vst.msk [vmem:[#allocation3 + $0x1a8] sm:$0xff] %vm228_vm1, %v3925_v5  ;;  %v11200_v8 = vpop.f32.mrb[10].mxu0  ;;  %11218 = vmatprep.mubr.msk.f32.mxu1 %vm228_vm1, %v14314_v7  ;;  %v9884_v5 = vld [vmem:[%s14777_s3 + $0x130] sm:$0xff] }
 0x390   :  { %v3928_v9 = vadd.f32 %v11200_v8, %v14276_v31  ;;  %v3865_v10 = vpop.f32.mrb[11].mxu0  ;;  %11942 = vmatpush3.bf16.msra.mxu1 %v11939_v62  ;;  %v4514_v62 = vld [vmem:[#allocation3 + $0x88] ss:$2 sm:$0xff]  ;;  %v5080_v51 = vld [vmem:[#allocation3 + $0x29] ss:$2 sm:$0xff] }
 0x391   :  { %v3927_v11 = vadd.f32 %v14276_v31, %v3865_v10  ;;  %11944 = vmatprep.subr.bf16.mxu1 %v11943_v6  ;;  %v3967_v41 = vld [vmem:[#allocation3 + $0x107] ss:$2 sm:$0xff] }
 0x392   :  { %3945 = vst.msk [vmem:[#allocation3 + $0x208] sm:$0xff] %vm228_vm1, %v3928_v9  ;;  %v14322_v12 = vld [vmem:[#allocation3 + $0xe7] ss:$2 sm:$0xff]  ;;  %v4512_v9 = vld [vmem:[#allocation3 + $0x68] ss:$2 sm:$0xff] }
 0x393   :  { %3944 = vst.msk [vmem:[#allocation3 + $0x1e8] sm:$0xff] %vm228_vm1, %v3927_v11  ;;  %v11203_v13 = vpop.f32.mrb[12].mxu0  ;;  %11219 = vmatmul.mubr.msk.f32.gmra.mrb[2].mxu1 %vm228_vm1, %v14322_v12  ;;  %v9894_v10 = vld [vmem:[%s14777_s3 + $0x1a0] sm:$0xff]  ;;  %v9895_v11 = vld [vmem:[%s14777_s3 + $0x1a8] sm:$0xff] }
 0x394   :  { %v3930_v14 = vadd.f32 %v11203_v13, %v14276_v31  ;;  %v3875_v15 = vpop.f32.mrb[13].mxu0  ;;  %v11983_v13 = vpack.c.bf16 %v9895_v11, %v9894_v10  ;;  %v5088_v56 = vld [vmem:[#allocation3 + $0xa9] ss:$2 sm:$0xff]  ;;  %v9966_v10 = vld [vmem:[%s14777_s3 + $0xe0] sm:$0xff] }
 0x395   :  { %v3929_v16 = vadd.f32 %v14276_v31, %v3875_v15  ;;  %v3975_v40 = vld [vmem:[#allocation3 + $0x1c7] ss:$2 sm:$0xff]  ;;  %v4530_v2 = vld [vmem:[#allocation3 + $0x1c8] ss:$2 sm:$0xff] }
 0x396   :  { %3947 = vst.msk [vmem:[#allocation3 + $0x248] sm:$0xff] %vm228_vm1, %v3930_v14  ;;  %v3973_v17 = vld [vmem:[#allocation3 + $0x1a7] ss:$2 sm:$0xff]  ;;  %v4520_v14 = vld [vmem:[#allocation3 + $0xe8] ss:$2 sm:$0xff] }
 0x397   :  { %3946 = vst.msk [vmem:[#allocation3 + $0x228] sm:$0xff] %vm228_vm1, %v3929_v16  ;;  %v11206_v18 = vpop.f32.mrb[14].mxu0  ;;  %11221 = vmatprep.mubr.msk.f32.mxu1 %vm228_vm1, %v3973_v17  ;;  %v4528_v15 = vld [vmem:[#allocation3 + $0x1a8] ss:$2 sm:$0xff] }
 0x398   :  { %v3932_v19 = vadd.f32 %v11206_v18, %v14276_v31  ;;  %v3885_v20 = vpop.f32.mrb[15].mxu0  ;;  %v9967_v11 = vld [vmem:[%s14777_s3 + $0xe8] sm:$0xff] }
 0x399   :  { %v3931_v21 = vadd.f32 %v14276_v31, %v3885_v20  ;;  %v3979_v42 = vld [vmem:[#allocation3 + $0x207] ss:$2 sm:$0xff]  ;;  %v4534_v3 = vld [vmem:[#allocation3 + $0x208] ss:$2 sm:$0xff]  ;;  %v9897_v20 = vld [vmem:[%s14777_s3 + $0x1b8] sm:$0xff] }
 0x39a   :  { %3949 = vst.msk [vmem:[#allocation3 + $0x288] sm:$0xff] %vm228_vm1, %v3932_v19  ;;  %v14335_v22 = vld [vmem:[#allocation3 + $0x1e7] ss:$2 sm:$0xff]  ;;  %v4532_v16 = vld [vmem:[#allocation3 + $0x1e8] ss:$2 sm:$0xff] }
 0x39b   :  { %3948 = vst.msk [vmem:[#allocation3 + $0x268] sm:$0xff] %vm228_vm1, %v3931_v21  ;;  %11222 = vmatmul.mubr.msk.f32.gmra.mrb[4].mxu1 %vm228_vm1, %v14335_v22  ;;  %v9858_v31 = vld [vmem:[%s14777_s3 + $0x20] sm:$0xff]  ;;  %v9896_v19 = vld [vmem:[%s14777_s3 + $0x1b0] sm:$0xff] }
 0x39c   :  { %v11959_v36 = vpack.c.bf16 %v9859_v34, %v9858_v31  ;;  %v11987_v21 = vpack.c.bf16 %v9897_v20, %v9896_v19  ;;  %v5086_v31 = vld [vmem:[#allocation3 + $0x89] ss:$2 sm:$0xff]  ;;  %v5654_v19 = vld [vmem:[#allocation3 + $0x4a] ss:$2 sm:$0xff]  ;;  %v9978_v20 = vld [vmem:[%s14777_s3 + $0x160] sm:$0xff] }
 0x39d   :  { %v3983_v44 = vld [vmem:[#allocation3 + $0x247] ss:$2 sm:$0xff]  ;;  %v4538_v4 = vld [vmem:[#allocation3 + $0x248] ss:$2 sm:$0xff] }
 0x39e   :  { %v14340_v23 = vld [vmem:[#allocation3 + $0x227] ss:$2 sm:$0xff]  ;;  %v4536_v17 = vld [vmem:[#allocation3 + $0x228] ss:$2 sm:$0xff] }
 0x39f   :  { %11224 = vmatprep.mubr.msk.f32.mxu1 %vm228_vm1, %v14340_v23  ;;  %v5098_v34 = vld [vmem:[#allocation3 + $0x189] ss:$2 sm:$0xff] }
 0x3a0   :  { %v5106_v47 = vld [vmem:[#allocation3 + $0x209] ss:$2 sm:$0xff] }
 0x3a1   :  { %v3987_v43 = vld [vmem:[#allocation3 + $0x287] ss:$2 sm:$0xff]  ;;  %v4542_v26 = vld [vmem:[#allocation3 + $0x288] ss:$2 sm:$0xff] }
 0x3a2   :  { %v14344_v25 = vld [vmem:[#allocation3 + $0x267] ss:$2 sm:$0xff]  ;;  %v4540_v18 = vld [vmem:[#allocation3 + $0x268] ss:$2 sm:$0xff] }
 0x3a3   :  { %11225 = vmatmul.mubr.msk.f32.gmra.mrb[6].mxu1 %vm228_vm1, %v14344_v25  ;;  %v5110_v48 = vld [vmem:[#allocation3 + $0x249] ss:$2 sm:$0xff] }
 0x3a4   :  { %11235 = vmatprep.mubr.msk.f32.mxu1 %vm228_vm1, %v3951_v24  ;;  %v5104_v60 = vld [vmem:[#allocation3 + $0x1e9] ss:$2 sm:$0xff] }
 0x3a5   :  { %v5108_v61 = vld [vmem:[#allocation3 + $0x229] ss:$2 sm:$0xff] }
 0x3a7   :  { %11236 = vmatmul.mubr.msk.f32.vlgmr.msra.gmra.mrb[0].mxu1 %vm228_vm1, %v3955_v30 }
 0x3a8   :  { %11946 = vmatpush3.bf16.msra.mxu1 %v11943_v6  ;;  %11238 = vmatprep.mubr.msk.f32.mxu1 %vm228_vm1, %v3959_v35  ;;  %v9885_v6 = vld [vmem:[%s14777_s3 + $0x138] sm:$0xff] }
 0x3a9   :  { %11948 = vmatprep.subr.bf16.mxu1 %v11947_v29  ;;  %v11979_v8 = vpack.c.bf16 %v9885_v6, %v9884_v5  ;;  %v5094_v5 = vld [vmem:[#allocation3 + $0x109] ss:$2 sm:$0xff] }
 0x3aa   :  { %v5114_v6 = vld [vmem:[#allocation3 + $0x289] ss:$2 sm:$0xff] }
 0x3ab   :  { %11239 = vmatmul.mubr.msk.f32.gmra.mrb[2].mxu1 %vm228_vm1, %v3963_v39 }
 0x3ac   :  { %11241 = vmatprep.mubr.msk.f32.mxu1 %vm228_vm1, %v3971_v37  ;;  %11950 = vmatpush3.bf16.msra.mxu1 %v11947_v29  ;;  %v9909_v29 = vld [vmem:[%s14777_s3 + $0x58] sm:$0xff]  ;;  %v11999_v37 = vpack.c.bf16 %v9919_v33, %v9918_v32 }
 0x3ad   :  { %11952 = vmatprep.subr.bf16.mxu1 %v11951_v38  ;;  %v9981_v32 = vld [vmem:[%s14777_s3 + $0x178] sm:$0xff] }
 0x3ae   :  { %v5652_v33 = vld [vmem:[#allocation3 + $0x2a] ss:$2 sm:$0xff] }
 0x3af   :  { %11242 = vmatmul.mubr.msk.f32.gmra.mrb[4].mxu1 %vm228_vm1, %v3975_v40 }
 0x3b0   :  { %11244 = vmatprep.mubr.msk.f32.mxu1 %vm228_vm1, %v3979_v42 }
 0x3b3   :  { %11245 = vmatmul.mubr.msk.f32.gmra.mrb[6].mxu1 %vm228_vm1, %v3983_v44 }
 0x3b4   :  { %11255 = vmatprep.mubr.msk.f32.mxu1 %vm228_vm1, %v3955_v30  ;;  %v11995_v30 = vpack.c.bf16 %v9909_v29, %v9908_v27  ;;  %v5678_v27 = vld [vmem:[#allocation3 + $0x20a] ss:$2 sm:$0xff] }
 0x3b5   :  { %v5682_v29 = vld [vmem:[#allocation3 + $0x24a] ss:$2 sm:$0xff] }
 0x3b7   :  { %11256 = vmatmul.mubr.msk.f32.vlgmr.msra.gmra.mrb[0].mxu1 %vm228_vm1, %v3959_v35  ;;  %v4524_v35 = vld [vmem:[#allocation3 + $0x128] ss:$2 sm:$0xff] }
 0x3b8   :  { %11954 = vmatpush3.bf16.msra.mxu1 %v11951_v38  ;;  %11258 = vmatprep.mubr.msk.f32.mxu1 %vm228_vm1, %v3963_v39  ;;  %v4544_v38 = vld [vmem:[#allocation3 + $0x2a8] ss:$2 sm:$0xff]  ;;  %v5078_v39 = vld [vmem:[#allocation3 + $0x9] ss:$2 sm:$0xff] }
 0x3b9   :  { %11956 = vmatprep.subr.bf16.mxu1 %v11955_v28 }
 0x3bb   :  { %11259 = vmatmul.mubr.msk.f32.gmra.mrb[2].mxu1 %vm228_vm1, %v3967_v41  ;;  %v5090_v41 = vld [vmem:[#allocation3 + $0xc9] ss:$2 sm:$0xff] }
 0x3bc   :  { %11261 = vmatprep.mubr.msk.f32.mxu1 %vm228_vm1, %v3975_v40  ;;  %11958 = vmatpush3.bf16.msra.mxu1 %v11955_v28  ;;  %v9920_v40 = vld [vmem:[%s14777_s3 + $0xd0] sm:$0xff]  ;;  %v9931_v28 = vld [vmem:[%s14777_s3 + $0x148] sm:$0xff] }
 0x3bd   :  { %11960 = vmatprep.subr.bf16.mxu1 %v11959_v36 }
 0x3bf   :  { %11262 = vmatmul.mubr.msk.f32.gmra.mrb[4].mxu1 %vm228_vm1, %v3979_v42  ;;  %v9921_v42 = vld [vmem:[%s14777_s3 + $0xd8] sm:$0xff] }
 0x3c0   :  { %11264 = vmatprep.mubr.msk.f32.mxu1 %vm228_vm1, %v3983_v44  ;;  %v12003_v44 = vpack.c.bf16 %v9921_v42, %v9920_v40  ;;  %v5660_v40 = vld [vmem:[#allocation3 + $0xaa] ss:$2 sm:$0xff] }
 0x3c3   :  { %11265 = vmatmul.mubr.msk.f32.gmra.mrb[6].mxu1 %vm228_vm1, %v3987_v43  ;;  %v5102_v43 = vld [vmem:[#allocation3 + $0x1c9] ss:$2 sm:$0xff] }
 0x3c4   :  { %11275 = vmatprep.mubr.msk.f32.mxu1 %vm228_vm1, %v14300_v63  ;;  %v4526_v63 = vld [vmem:[#allocation3 + $0x188] ss:$2 sm:$0xff] }
 0x3c7   :  { %11276 = vmatmul.mubr.msk.f32.vlgmr.msra.gmra.mrb[0].mxu1 %vm228_vm1, %v14314_v7  ;;  %v4508_v7 = vld [vmem:[#allocation3 + $0x28] ss:$2 sm:$0xff] }
 0x3c8   :  { %11962 = vmatpush3.bf16.msra.mxu1 %v11959_v36  ;;  %11278 = vmatprep.mubr.msk.f32.mxu1 %vm228_vm1, %v14322_v12  ;;  %v4516_v12 = vld [vmem:[#allocation3 + $0xa8] ss:$2 sm:$0xff]  ;;  %v12007_v36 = vpack.c.bf16 %v9931_v28, %v9930_v46 }
 0x3c9   :  { %11964 = vmatprep.subr.bf16.mxu1 %v11963_v49  ;;  %v5676_v46 = vld [vmem:[#allocation3 + $0x1ea] ss:$2 sm:$0xff] }
 0x3ca   :  { %v5680_v28 = vld [vmem:[#allocation3 + $0x22a] ss:$2 sm:$0xff] }
 0x3cb   :  { %11279 = vmatmul.mubr.msk.f32.gmra.mrb[2].mxu1 %vm228_vm1, %v3969_v52 }
 0x3cc   :  { %11281 = vmatprep.mubr.msk.f32.mxu1 %vm228_vm1, %v14335_v22  ;;  %11966 = vmatpush3.bf16.msra.mxu1 %v11963_v49  ;;  %v9906_v22 = vld [vmem:[%s14777_s3 + $0x40] sm:$0xff]  ;;  %v9932_v49 = vld [vmem:[%s14777_s3 + $0x150] sm:$0xff] }
 0x3cd   :  { %11968 = vmatprep.subr.bf16.mxu1 %v11967_v53  ;;  %v12011_v52 = vpack.c.bf16 %v9933_v50, %v9932_v49  ;;  %v5688_v49 = vld [vmem:[#allocation3 + $0x2aa] ss:$2 sm:$0xff]  ;;  %v6275_v50 = vld [vmem:[#allocation6 + $0x80] sm:$0xff] }
 0x3cf   :  { %11282 = vmatmul.mubr.msk.f32.gmra.mrb[4].mxu1 %vm228_vm1, %v14340_v23  ;;  %v9907_v23 = vld [vmem:[%s14777_s3 + $0x48] sm:$0xff] }
 0x3d0   :  { %11284 = vmatprep.mubr.msk.f32.mxu1 %vm228_vm1, %v14344_v25  ;;  %v11991_v24 = vpack.c.bf16 %v9907_v23, %v9906_v22  ;;  %v4522_v25 = vld [vmem:[#allocation3 + $0x108] ss:$2 sm:$0xff] }
 0x3d1   :  { %v5658_v22 = vld [vmem:[#allocation3 + $0x8a] ss:$2 sm:$0xff] }
 0x3d2   :  { %v5670_v23 = vld [vmem:[#allocation3 + $0x18a] ss:$2 sm:$0xff] }
 0x3d3   :  { %11285 = vmatmul.mubr.msk.f32.gmra.mrb[6].mxu1 %vm228_vm1, %v3989_v54  ;;  %v9942_v54 = vld [vmem:[%s14777_s3 + $0x1c0] sm:$0xff] }
 0x3d4   :  { %11295 = vmatprep.mubr.msk.f32.mxu1 %vm228_vm1, %v4506_v55  ;;  %v9943_v55 = vld [vmem:[%s14777_s3 + $0x1c8] sm:$0xff] }
 0x3d5   :  { %v12015_v57 = vpack.c.bf16 %v9943_v55, %v9942_v54  ;;  %v6278_v54 = vld [vmem:[#allocation6 + $0x98] sm:$0xff] }
 0x3d7   :  { %11296 = vmatmul.mubr.msk.f32.vlgmr.msra.gmra.mrb[0].mxu1 %vm228_vm1, %v4510_v59 }
 0x3d8   :  { %11970 = vmatpush3.bf16.msra.mxu1 %v11967_v53  ;;  %11298 = vmatprep.mubr.msk.f32.mxu1 %vm228_vm1, %v4514_v62  ;;  %v5084_v53 = vld [vmem:[#allocation3 + $0x69] ss:$2 sm:$0xff] }
 0x3d9   :  { %11972 = vmatprep.subr.bf16.mxu1 %v11971_v58 }
 0x3db   :  { %11299 = vmatmul.mubr.msk.f32.gmra.mrb[2].mxu1 %vm228_vm1, %v4518_v1 }
 0x3dc   :  { %11301 = vmatprep.mubr.msk.f32.mxu1 %vm228_vm1, %v4526_v63  ;;  %11974 = vmatpush3.bf16.msra.mxu1 %v11971_v58  ;;  %v5092_v58 = vld [vmem:[#allocation3 + $0xe9] ss:$2 sm:$0xff] }
 0x3dd   :  { %11976 = vmatprep.subr.bf16.mxu1 %v11975_v0  ;;  %v9944_v63 = vld [vmem:[%s14777_s3 + $0x1d0] sm:$0xff] }
 0x3df   :  { %11302 = vmatmul.mubr.msk.f32.gmra.mrb[4].mxu1 %vm228_vm1, %v4530_v2 }
 0x3e0   :  { %11304 = vmatprep.mubr.msk.f32.mxu1 %vm228_vm1, %v4534_v3 }
 0x3e3   :  { %11305 = vmatmul.mubr.msk.f32.gmra.mrb[6].mxu1 %vm228_vm1, %v4538_v4 }
 0x3e4   :  { %11315 = vmatprep.mubr.msk.f32.mxu1 %vm228_vm1, %v4508_v7  ;;  %v9956_v7 = vld [vmem:[%s14777_s3 + $0x70] sm:$0xff] }
 0x3e7   :  { %11316 = vmatmul.mubr.msk.f32.vlgmr.msra.gmra.mrb[0].mxu1 %vm228_vm1, %v4512_v9 }
 0x3e8   :  { %11978 = vmatpush3.bf16.msra.mxu1 %v11975_v0  ;;  %11318 = vmatprep.mubr.msk.f32.mxu1 %vm228_vm1, %v4516_v12  ;;  %v9945_v0 = vld [vmem:[%s14777_s3 + $0x1d8] sm:$0xff] }
 0x3e9   :  { %11980 = vmatprep.subr.bf16.mxu1 %v11979_v8 }
 0x3eb   :  { %11319 = vmatmul.mubr.msk.f32.gmra.mrb[2].mxu1 %vm228_vm1, %v4520_v14 }
 0x3ec   :  { %11321 = vmatprep.mubr.msk.f32.mxu1 %vm228_vm1, %v4528_v15  ;;  %11982 = vmatpush3.bf16.msra.mxu1 %v11979_v8  ;;  %v9957_v8 = vld [vmem:[%s14777_s3 + $0x78] sm:$0xff] }
 0x3ed   :  { %11984 = vmatprep.subr.bf16.mxu1 %v11983_v13  ;;  %v5650_v15 = vld [vmem:[#allocation3 + $0xa] ss:$2 sm:$0xff] }
 0x3ef   :  { %11322 = vmatmul.mubr.msk.f32.gmra.mrb[4].mxu1 %vm228_vm1, %v4532_v16 }
 0x3f0   :  { %11324 = vmatprep.mubr.msk.f32.mxu1 %vm228_vm1, %v4536_v17 }
 0x3f3   :  { %11325 = vmatmul.mubr.msk.f32.gmra.mrb[6].mxu1 %vm228_vm1, %v4540_v18 }
 0x3f4   :  { %11335 = vmatprep.mubr.msk.f32.mxu1 %vm228_vm1, %v4510_v59  ;;  %v5100_v59 = vld [vmem:[#allocation3 + $0x1a9] ss:$2 sm:$0xff] }
 0x3f7   :  { %11336 = vmatmul.mubr.msk.f32.vlgmr.msra.gmra.mrb[0].mxu1 %vm228_vm1, %v4514_v62  ;;  %v5112_v62 = vld [vmem:[#allocation3 + $0x269] ss:$2 sm:$0xff] }
 0x3f8   :  { %11986 = vmatpush3.bf16.msra.mxu1 %v11983_v13  ;;  %11338 = vmatprep.mubr.msk.f32.mxu1 %vm228_vm1, %v4518_v1  ;;  %v12019_v1 = vpack.c.bf16 %v9945_v0, %v9944_v63  ;;  %v12031_v13 = vpack.c.bf16 %v9967_v11, %v9966_v10  ;;  %v6273_v10 = vld [vmem:[#allocation6 + $0x18] sm:$0xff] }
 0x3f9   :  { %11988 = vmatprep.subr.bf16.mxu1 %v11987_v21 }
 0x3fb   :  { %11339 = vmatmul.mubr.msk.f32.gmra.mrb[2].mxu1 %vm228_vm1, %v4522_v25  ;;  %v5662_v25 = vld [vmem:[#allocation3 + $0xca] ss:$2 sm:$0xff] }
 0x3fc   :  { %11341 = vmatprep.mubr.msk.f32.mxu1 %vm228_vm1, %v4530_v2  ;;  %11990 = vmatpush3.bf16.msra.mxu1 %v11987_v21  ;;  %v9954_v2 = vld [vmem:[%s14777_s3 + $0x60] sm:$0xff]  ;;  %v9979_v21 = vld [vmem:[%s14777_s3 + $0x168] sm:$0xff] }
 0x3fd   :  { %11992 = vmatprep.subr.bf16.mxu1 %v11991_v24 }
 0x3ff   :  { %11342 = vmatmul.mubr.msk.f32.gmra.mrb[4].mxu1 %vm228_vm1, %v4534_v3  ;;  %v9955_v3 = vld [vmem:[%s14777_s3 + $0x68] sm:$0xff] }
 0x400   :  { %11344 = vmatprep.mubr.msk.f32.mxu1 %vm228_vm1, %v4538_v4  ;;  %v12023_v4 = vpack.c.bf16 %v9955_v3, %v9954_v2 }
 0x403   :  { %11345 = vmatmul.mubr.msk.f32.gmra.mrb[6].mxu1 %vm228_vm1, %v4542_v26  ;;  %v5674_v26 = vld [vmem:[#allocation3 + $0x1ca] ss:$2 sm:$0xff] }
 0x404   :  { %11355 = vmatprep.mubr.msk.f32.mxu1 %vm228_vm1, %v4512_v9  ;;  %v12027_v9 = vpack.c.bf16 %v9957_v8, %v9956_v7 }
 0x407   :  { %11356 = vmatmul.mubr.msk.f32.vlgmr.msra.gmra.mrb[0].mxu1 %vm228_vm1, %v4516_v12  ;;  %v5096_v12 = vld [vmem:[#allocation3 + $0x129] ss:$2 sm:$0xff] }
 0x408   :  { %11994 = vmatpush3.bf16.msra.mxu1 %v11991_v24  ;;  %11358 = vmatprep.mubr.msk.f32.mxu1 %vm228_vm1, %v4520_v14  ;;  %v5116_v14 = vld [vmem:[#allocation3 + $0x2a9] ss:$2 sm:$0xff]  ;;  %v12039_v24 = vpack.c.bf16 %v9979_v21, %v9978_v20 }
 0x409   :  { %11996 = vmatprep.subr.bf16.mxu1 %v11995_v30  ;;  %v6247_v21 = vld [vmem:[#allocation4 + $0x7] ss:$2 sm:$0xff] }
 0x40b   :  { %11359 = vmatmul.mubr.msk.f32.gmra.mrb[2].mxu1 %vm228_vm1, %v4524_v35 }
 0x40c   :  { %11361 = vmatprep.mubr.msk.f32.mxu1 %vm228_vm1, %v4532_v16  ;;  %11998 = vmatpush3.bf16.msra.mxu1 %v11995_v30  ;;  %v9968_v16 = vld [vmem:[%s14777_s3 + $0xf0] sm:$0xff] }
 0x40d   :  { %12000 = vmatprep.subr.bf16.mxu1 %v11999_v37  ;;  %v9980_v30 = vld [vmem:[%s14777_s3 + $0x170] sm:$0xff] }
 0x40e   :  { %v12043_v35 = vpack.c.bf16 %v9981_v32, %v9980_v30  ;;  %v6575_v30 = vld [vmem:[#allocation6 + $0x188] sm:$0xff] }
 0x40f   :  { %11362 = vmatmul.mubr.msk.f32.gmra.mrb[4].mxu1 %vm228_vm1, %v4536_v17  ;;  %v9969_v17 = vld [vmem:[%s14777_s3 + $0xf8] sm:$0xff] }
 0x410   :  { %11364 = vmatprep.mubr.msk.f32.mxu1 %vm228_vm1, %v4540_v18  ;;  %v12035_v18 = vpack.c.bf16 %v9969_v17, %v9968_v16  ;;  %v6474_v17 = vld [vmem:[#allocation6 + $0x100] sm:$0xff] }
 0x413   :  { %11365 = vmatmul.mubr.msk.f32.gmra.mrb[6].mxu1 %vm228_vm1, %v4544_v38  ;;  %v9990_v38 = vld [vmem:[%s14777_s3 + $0x1e0] sm:$0xff] }
 0x414   :  { %11375 = vmatprep.mubr.msk.f32.mxu1 %vm228_vm1, %v5078_v39  ;;  %v9991_v39 = vld [vmem:[%s14777_s3 + $0x1e8] sm:$0xff] }
 0x415   :  { %v12047_v42 = vpack.c.bf16 %v9991_v39, %v9990_v38 }
 0x417   :  { %11376 = vmatmul.mubr.msk.f32.vlgmr.msra.gmra.mrb[0].mxu1 %vm228_vm1, %v5082_v45 }
 0x418   :  { %12002 = vmatpush3.bf16.msra.mxu1 %v11999_v37  ;;  %11378 = vmatprep.mubr.msk.f32.mxu1 %vm228_vm1, %v5086_v31  ;;  %v5656_v37 = vld [vmem:[#allocation3 + $0x6a] ss:$2 sm:$0xff] }
 0x419   :  { %12004 = vmatprep.subr.bf16.mxu1 %v12003_v44 }
 0x41b   :  { %11379 = vmatmul.mubr.msk.f32.gmra.mrb[2].mxu1 %vm228_vm1, %v5090_v41 }
 0x41c   :  { %11381 = vmatprep.mubr.msk.f32.mxu1 %vm228_vm1, %v5098_v34  ;;  %12006 = vmatpush3.bf16.msra.mxu1 %v12003_v44  ;;  %v5664_v44 = vld [vmem:[#allocation3 + $0xea] ss:$2 sm:$0xff] }
 0x41d   :  { %12008 = vmatprep.subr.bf16.mxu1 %v12007_v36  ;;  %v9992_v34 = vld [vmem:[%s14777_s3 + $0x1f0] sm:$0xff] }
 0x41f   :  { %11382 = vmatmul.mubr.msk.f32.gmra.mrb[4].mxu1 %vm228_vm1, %v5102_v43 }
 0x420   :  { %11384 = vmatprep.mubr.msk.f32.mxu1 %vm228_vm1, %v5106_v47 }
 0x423   :  { %11385 = vmatmul.mubr.msk.f32.gmra.mrb[6].mxu1 %vm228_vm1, %v5110_v48 }
 0x424   :  { %11395 = vmatprep.mubr.msk.f32.mxu1 %vm228_vm1, %v5080_v51  ;;  %v6276_v51 = vld [vmem:[#allocation6 + $0x88] sm:$0xff] }
 0x427   :  { %11396 = vmatmul.mubr.msk.f32.vlgmr.msra.gmra.mrb[0].mxu1 %vm228_vm1, %v5084_v53 }
 0x428   :  { %12010 = vmatpush3.bf16.msra.mxu1 %v12007_v36  ;;  %11398 = vmatprep.mubr.msk.f32.mxu1 %vm228_vm1, %v5088_v56  ;;  %v9993_v36 = vld [vmem:[%s14777_s3 + $0x1f8] sm:$0xff] }
 0x429   :  { %12012 = vmatprep.subr.bf16.mxu1 %v12011_v52 }
 0x42b   :  { %11399 = vmatmul.mubr.msk.f32.gmra.mrb[2].mxu1 %vm228_vm1, %v5092_v58 }
 0x42c   :  { %11401 = vmatprep.mubr.msk.f32.mxu1 %vm228_vm1, %v5100_v59  ;;  %12014 = vmatpush3.bf16.msra.mxu1 %v12011_v52  ;;  %v12055_v52 = vpack.c.bf16 %v6276_v51, %v6275_v50  ;;  %v10002_v59 = vld [vmem:[%s14778_s4] ss:$0 sm:$0xff]  ;;  %v6807_v50 = vld [vmem:[#allocation6 + $0xb8] sm:$0xff]  ;;  %v6686_v51 = vld [vmem:[#allocation4 + $0x108] ss:$2 sm:$0xff] }
 0x42d   :  { %12016 = vmatprep.subr.bf16.mxu1 %v12015_v57 }
 0x42f   :  { %11402 = vmatmul.mubr.msk.f32.gmra.mrb[4].mxu1 %vm228_vm1, %v5104_v60 }
 0x430   :  { %11404 = vmatprep.mubr.msk.f32.mxu1 %vm228_vm1, %v5108_v61 }
 0x433   :  { %11405 = vmatmul.mubr.msk.f32.gmra.mrb[6].mxu1 %vm228_vm1, %v5112_v62 }
 0x434   :  { %11415 = vmatprep.mubr.msk.f32.mxu1 %vm228_vm1, %v5082_v45  ;;  %v5672_v45 = vld [vmem:[#allocation3 + $0x1aa] ss:$2 sm:$0xff] }
 0x437   :  { %11416 = vmatmul.mubr.msk.f32.vlgmr.msra.gmra.mrb[0].mxu1 %vm228_vm1, %v5086_v31  ;;  %v5684_v31 = vld [vmem:[#allocation3 + $0x26a] ss:$2 sm:$0xff] }
 0x438   :  { %12018 = vmatpush3.bf16.msra.mxu1 %v12015_v57  ;;  %11418 = vmatprep.mubr.msk.f32.mxu1 %vm228_vm1, %v5090_v41  ;;  %v12051_v41 = vpack.c.bf16 %v9993_v36, %v9992_v34  ;;  %v6271_v57 = vld [vmem:[#allocation6 + $0x8] sm:$0xff]  ;;  %v6804_v36 = vld [vmem:[#allocation6 + $0xa0] sm:$0xff] }
 0x439   :  { %12020 = vmatprep.subr.bf16.mxu1 %v12019_v1 }
 0x43b   :  { %11419 = vmatmul.mubr.msk.f32.gmra.mrb[2].mxu1 %vm228_vm1, %v5094_v5 }
 0x43c   :  { %11421 = vmatprep.mubr.msk.f32.mxu1 %vm228_vm1, %v5102_v43  ;;  %12022 = vmatpush3.bf16.msra.mxu1 %v12019_v1  ;;  %v5666_v43 = vld [vmem:[#allocation3 + $0x10a] ss:$2 sm:$0xff] }
 0x43d   :  { %12024 = vmatprep.subr.bf16.mxu1 %v12023_v4 }
 0x43f   :  { %11422 = vmatmul.mubr.msk.f32.gmra.mrb[4].mxu1 %vm228_vm1, %v5106_v47  ;;  %v5686_v47 = vld [vmem:[#allocation3 + $0x28a] ss:$2 sm:$0xff] }
 0x440   :  { %11424 = vmatprep.mubr.msk.f32.mxu1 %vm228_vm1, %v5110_v48  ;;  %v5668_v48 = vld [vmem:[#allocation3 + $0x12a] ss:$2 sm:$0xff] }
 0x443   :  { %11425 = vmatmul.mubr.msk.f32.gmra.mrb[6].mxu1 %vm228_vm1, %v5114_v6 }
 0x444   :  { %11435 = vmatprep.mubr.msk.f32.mxu1 %vm228_vm1, %v5084_v53  ;;  %v6277_v53 = vld [vmem:[#allocation6 + $0x90] sm:$0xff] }
 0x445   :  { %v12059_v55 = vpack.c.bf16 %v6278_v54, %v6277_v53  ;;  %v6910_v54 = vld [vmem:[#allocation6 + $0x120] sm:$0xff] }
 0x447   :  { %11436 = vmatmul.mubr.msk.f32.vlgmr.msra.gmra.mrb[0].mxu1 %vm228_vm1, %v5088_v56  ;;  %v6270_v56 = vld [vmem:[#allocation6] sm:$0xff] }
 0x448   :  { %12026 = vmatpush3.bf16.msra.mxu1 %v12023_v4  ;;  %11438 = vmatprep.mubr.msk.f32.mxu1 %vm228_vm1, %v5092_v58  ;;  %v12063_v58 = vpack.c.bf16 %v6271_v57, %v6270_v56 }
 0x449   :  { %12028 = vmatprep.subr.bf16.mxu1 %v12027_v9 }
 0x44b   :  { %11439 = vmatmul.mubr.msk.f32.gmra.mrb[2].mxu1 %vm228_vm1, %v5096_v12 }
 0x44c   :  { %11441 = vmatprep.mubr.msk.f32.mxu1 %vm228_vm1, %v5104_v60  ;;  %12030 = vmatpush3.bf16.msra.mxu1 %v12027_v9  ;;  %v6272_v9 = vld [vmem:[#allocation6 + $0x10] sm:$0xff] }
 0x44d   :  { %12032 = vmatprep.subr.bf16.mxu1 %v12031_v13 }
 0x44f   :  { %11442 = vmatmul.mubr.msk.f32.gmra.mrb[4].mxu1 %vm228_vm1, %v5108_v61 }
 0x450   :  { %11444 = vmatprep.mubr.msk.f32.mxu1 %vm228_vm1, %v5112_v62 }
 0x453   :  { %11445 = vmatmul.mubr.msk.f32.gmra.mrb[6].mxu1 %vm228_vm1, %v5116_v14 }
 0x454   :  { %11455 = vmatprep.mubr.msk.f32.mxu1 %vm228_vm1, %v5650_v15  ;;  %v12067_v15 = vpack.c.bf16 %v6273_v10, %v6272_v9  ;;  %v7135_v9 = vld [vmem:[#allocation6 + $0x48] sm:$0xff] }
 0x457   :  { %11456 = vmatmul.mubr.msk.f32.vlgmr.msra.gmra.mrb[0].mxu1 %vm228_vm1, %v5654_v19 }
 0x458   :  { %12034 = vmatpush3.bf16.msra.mxu1 %v12031_v13  ;;  %11458 = vmatprep.mubr.msk.f32.mxu1 %vm228_vm1, %v5658_v22 }
 0x459   :  { %12036 = vmatprep.subr.bf16.mxu1 %v12035_v18 }
 0x45b   :  { %11459 = vmatmul.mubr.msk.f32.gmra.mrb[2].mxu1 %vm228_vm1, %v5662_v25 }
 0x45c   :  { %11461 = vmatprep.mubr.msk.f32.mxu1 %vm228_vm1, %v5670_v23  ;;  %12038 = vmatpush3.bf16.msra.mxu1 %v12035_v18  ;;  %v6475_v18 = vld [vmem:[#allocation6 + $0x108] sm:$0xff]  ;;  %v6476_v23 = vld [vmem:[#allocation6 + $0x110] sm:$0xff] }
 0x45d   :  { %12040 = vmatprep.subr.bf16.mxu1 %v12039_v24 }
 0x45f   :  { %11462 = vmatmul.mubr.msk.f32.gmra.mrb[4].mxu1 %vm228_vm1, %v5674_v26 }
 0x460   :  { %11464 = vmatprep.mubr.msk.f32.mxu1 %vm228_vm1, %v5678_v27 }
 0x463   :  { %11465 = vmatmul.mubr.msk.f32.gmra.mrb[6].mxu1 %vm228_vm1, %v5682_v29 }
 0x464   :  { %11475 = vmatprep.mubr.msk.f32.mxu1 %vm228_vm1, %v5652_v33 }
 0x467   :  { %11476 = vmatmul.mubr.msk.f32.vlgmr.msra.gmra.mrb[0].mxu1 %vm228_vm1, %v5656_v37 }
 0x468   :  { %12042 = vmatpush3.bf16.msra.mxu1 %v12039_v24  ;;  %11478 = vmatprep.mubr.msk.f32.mxu1 %vm228_vm1, %v5660_v40  ;;  %v6477_v24 = vld [vmem:[#allocation6 + $0x118] sm:$0xff] }
 0x469   :  { %12044 = vmatprep.subr.bf16.mxu1 %v12043_v35 }
 0x46b   :  { %11479 = vmatmul.mubr.msk.f32.gmra.mrb[2].mxu1 %vm228_vm1, %v5664_v44 }
 0x46c   :  { %11481 = vmatprep.mubr.msk.f32.mxu1 %vm228_vm1, %v5672_v45  ;;  %12046 = vmatpush3.bf16.msra.mxu1 %v12043_v35  ;;  %v6576_v35 = vld [vmem:[#allocation6 + $0x190] sm:$0xff] }
 0x46d   :  { %12048 = vmatprep.subr.bf16.mxu1 %v12047_v42 }
 0x46f   :  { %11482 = vmatmul.mubr.msk.f32.gmra.mrb[4].mxu1 %vm228_vm1, %v5676_v46 }
 0x470   :  { %11484 = vmatprep.mubr.msk.f32.mxu1 %vm228_vm1, %v5680_v28 }
 0x473   :  { %11485 = vmatmul.mubr.msk.f32.gmra.mrb[6].mxu1 %vm228_vm1, %v5684_v31 }
 0x474   :  { %11495 = vmatprep.mubr.msk.f32.mxu1 %vm228_vm1, %v5654_v19  ;;  %v12071_v19 = vpack.c.bf16 %v6475_v18, %v6474_v17  ;;  %v7241_v17 = vld [vmem:[#allocation6 + $0xc8] sm:$0xff] }
 0x475   :  { %v6696_v18 = vld [vmem:[#allocation4 + $0x1a8] ss:$2 sm:$0xff] }
 0x477   :  { %11496 = vmatmul.mubr.msk.f32.vlgmr.msra.gmra.mrb[0].mxu1 %vm228_vm1, %v5658_v22 }
 0x478   :  { %12050 = vmatpush3.bf16.msra.mxu1 %v12047_v42  ;;  %11498 = vmatprep.mubr.msk.f32.mxu1 %vm228_vm1, %v5662_v25  ;;  %v6259_v25 = vld [vmem:[#allocation4 + $0x107] ss:$2 sm:$0xff] }
 0x479   :  { %12052 = vmatprep.subr.bf16.mxu1 %v12051_v41  ;;  %v6699_v42 = vld [vmem:[#allocation6 + $0x28] sm:$0xff] }
 0x47b   :  { %11499 = vmatmul.mubr.msk.f32.gmra.mrb[2].mxu1 %vm228_vm1, %v5666_v43  ;;  %v6269_v43 = vld [vmem:[#allocation4 + $0x1a7] ss:$2 sm:$0xff] }
 0x47c   :  { %11501 = vmatprep.mubr.msk.f32.mxu1 %vm228_vm1, %v5674_v26  ;;  %12054 = vmatpush3.bf16.msra.mxu1 %v12051_v41  ;;  %v12075_v26 = vpack.c.bf16 %v6477_v24, %v6476_v23  ;;  %v6805_v41 = vld [vmem:[#allocation6 + $0xa8] sm:$0xff] }
 0x47d   :  { %12056 = vmatprep.subr.bf16.mxu1 %v12055_v52  ;;  %v7122_v23 = vld [vmem:[#allocation4 + $0x109] ss:$2 sm:$0xff] }
 0x47f   :  { %11502 = vmatmul.mubr.msk.f32.gmra.mrb[4].mxu1 %vm228_vm1, %v5678_v27 }
 0x480   :  { %11504 = vmatprep.mubr.msk.f32.mxu1 %vm228_vm1, %v5682_v29  ;;  %v6574_v29 = vld [vmem:[#allocation6 + $0x180] sm:$0xff] }
 0x481   :  { %v12079_v32 = vpack.c.bf16 %v6575_v30, %v6574_v29 }
 0x483   :  { %11505 = vmatmul.mubr.msk.f32.gmra.mrb[6].mxu1 %vm228_vm1, %v5686_v47  ;;  %v6674_v47 = vld [vmem:[#allocation4 + $0x8] ss:$2 sm:$0xff] }
 0x484   :  { %11515 = vmatprep.mubr.msk.f32.mxu1 %vm228_vm1, %v5656_v37  ;;  %v6577_v37 = vld [vmem:[#allocation6 + $0x198] sm:$0xff] }
 0x485   :  { %v12083_v38 = vpack.c.bf16 %v6577_v37, %v6576_v35 }
 0x487   :  { %11516 = vmatmul.mubr.msk.f32.vlgmr.msra.gmra.mrb[0].mxu1 %vm228_vm1, %v5660_v40  ;;  %v6698_v40 = vld [vmem:[#allocation6 + $0x20] sm:$0xff] }
 0x488   :  { %11518 = vmatprep.mubr.msk.f32.mxu1 %vm228_vm1, %v5664_v44  ;;  %12058 = vmatpush3.bf16.msra.mxu1 %v12055_v52  ;;  %v12087_v44 = vpack.c.bf16 %v6699_v42, %v6698_v40  ;;  %v7447_v40 = vld [vmem:[#allocation6 + $0x1c8] sm:$0xff] }
 0x489   :  { %12060 = vmatprep.subr.bf16.mxu1 %v12059_v55 }
 0x48b   :  { %11519 = vmatmul.mubr.msk.f32.gmra.mrb[2].mxu1 %vm228_vm1, %v5668_v48  ;;  %v12095_v48 = vpack.c.bf16 %v6805_v41, %v6804_v36  ;;  %v7570_v36 = vld [vmem:[#allocation6 + $0x60] sm:$0xff]  ;;  %v7571_v41 = vld [vmem:[#allocation6 + $0x68] sm:$0xff] }
 0x48c   :  { %11521 = vmatprep.mubr.msk.f32.mxu1 %vm228_vm1, %v5676_v46  ;;  %12062 = vmatpush3.bf16.msra.mxu1 %v12059_v55  ;;  %v6700_v46 = vld [vmem:[#allocation6 + $0x30] sm:$0xff]  ;;  %v6911_v55 = vld [vmem:[#allocation6 + $0x128] sm:$0xff] }
 0x48d   :  { %12064 = vmatprep.subr.bf16.mxu1 %v12063_v58  ;;  %v12103_v56 = vpack.c.bf16 %v6911_v55, %v6910_v54  ;;  %v7132_v54 = vld [vmem:[#allocation4 + $0x1a9] ss:$2 sm:$0xff]  ;;  %v7546_v55 = vld [vmem:[#allocation4 + $0xa] ss:$2 sm:$0xff] }
 0x48f   :  { %11522 = vmatmul.mubr.msk.f32.gmra.mrb[4].mxu1 %vm228_vm1, %v5680_v28  ;;  %v6701_v28 = vld [vmem:[#allocation6 + $0x38] sm:$0xff] }
 0x490   :  { %11524 = vmatprep.mubr.msk.f32.mxu1 %vm228_vm1, %v5684_v31  ;;  %v6257_v31 = vld [vmem:[#allocation4 + $0xa7] ss:$2 sm:$0xff]  ;;  %v12091_v34 = vpack.c.bf16 %v6701_v28, %v6700_v46  ;;  %v7449_v28 = vld [vmem:[#allocation6 + $0x1d8] sm:$0xff] }
 0x491   :  { %v7448_v46 = vld [vmem:[#allocation6 + $0x1d0] sm:$0xff] }
 0x493   :  { %11525 = vmatmul.mubr.msk.f32.gmra.mrb[6].mxu1 %vm228_vm1, %v5688_v49  ;;  %v6806_v49 = vld [vmem:[#allocation6 + $0xb0] sm:$0xff] }
 0x494   :  { %v12099_v52 = vpack.c.bf16 %v6807_v50, %v6806_v49  ;;  %v7573_v49 = vld [vmem:[#allocation6 + $0x78] sm:$0xff]  ;;  %v7120_v50 = vld [vmem:[#allocation4 + $0xa9] ss:$2 sm:$0xff] }
 0x55a   :  { %v11517_v60 = vpop.f32.mrb[0].mxu1 }
 0x55b   :  { %v6229_v61 = vadd.f32 %v11517_v60, %v10002_v59  ;;  %v6174_v62 = vpop.f32.mrb[1].mxu1 }
 0x55c   :  { %v6228_v63 = vadd.f32 %v10002_v59, %v6174_v62 }
 0x55d   :  { %6239 = vst.msk [vmem:[#allocation4 + $0x48] sm:$0xf] %vm6237_vm3, %v6229_v61 }
 0x55e   :  { %6238 = vst.msk [vmem:[#allocation4 + $0x28] sm:$0xf] %vm6237_vm3, %v6228_v63  ;;  %v11520_v0 = vpop.f32.mrb[2].mxu1  ;;  %v7010_v63 = vld [vmem:[#allocation6 + $0x1a0] sm:$0xff] }
 0x55f   :  { %v6231_v1 = vadd.f32 %v11520_v0, %v10002_v59  ;;  %v6184_v2 = vpop.f32.mrb[3].mxu1  ;;  %v7011_v0 = vld [vmem:[#allocation6 + $0x1a8] sm:$0xff] }
 0x560   :  { %v6230_v3 = vadd.f32 %v10002_v59, %v6184_v2  ;;  %v12111_v2 = vpack.c.bf16 %v7011_v0, %v7010_v63  ;;  %v7783_v63 = vld [vmem:[#allocation6 + $0x168] sm:$0xff] }
 0x561   :  { %6241 = vst.msk [vmem:[#allocation4 + $0x88] sm:$0xf] %vm6237_vm3, %v6231_v1 }
 0x562   :  { %6240 = vst.msk [vmem:[#allocation4 + $0x68] sm:$0xf] %vm6237_vm3, %v6230_v3  ;;  %v11523_v4 = vpop.f32.mrb[4].mxu1 }
 0x563   :  { %v6233_v5 = vadd.f32 %v11523_v4, %v10002_v59  ;;  %v6194_v6 = vpop.f32.mrb[5].mxu1  ;;  %v7012_v4 = vld [vmem:[#allocation6 + $0x1b0] sm:$0xff] }
 0x564   :  { %v6232_v7 = vadd.f32 %v10002_v59, %v6194_v6  ;;  %v6251_v27 = vld [vmem:[#allocation4 + $0x47] ss:$2 sm:$0xff]  ;;  %v6678_v53 = vld [vmem:[#allocation4 + $0x48] ss:$2 sm:$0xff] }
 0x565   :  { %6243 = vst.msk [vmem:[#allocation4 + $0x148] sm:$0xf] %vm6237_vm3, %v6233_v5  ;;  %v6249_v8 = vld [vmem:[#allocation4 + $0x27] ss:$2 sm:$0xff]  ;;  %v6676_v60 = vld [vmem:[#allocation4 + $0x28] ss:$2 sm:$0xff] }
 0x566   :  { %6242 = vst.msk [vmem:[#allocation4 + $0x128] sm:$0xf] %vm6237_vm3, %v6232_v7  ;;  %v11526_v11 = vpop.f32.mrb[6].mxu1  ;;  %11535 = vmatprep.mubr.msk.f32.mxu1 %vm228_vm1, %v6249_v8  ;;  %v7013_v5 = vld [vmem:[#allocation6 + $0x1b8] sm:$0xff]  ;;  %v7134_v8 = vld [vmem:[#allocation6 + $0x40] sm:$0xff] }
 0x567   :  { %v6235_v12 = vadd.f32 %v11526_v11, %v10002_v59  ;;  %v6204_v13 = vpop.f32.mrb[7].mxu1  ;;  %v12115_v6 = vpack.c.bf16 %v7013_v5, %v7012_v4  ;;  %v12119_v10 = vpack.c.bf16 %v7135_v9, %v7134_v8  ;;  %v7112_v35 = vld [vmem:[#allocation4 + $0x29] ss:$2 sm:$0xff]  ;;  %v7548_v4 = vld [vmem:[#allocation4 + $0x2a] ss:$2 sm:$0xff] }
 0x568   :  { %v6234_v14 = vadd.f32 %v10002_v59, %v6204_v13  ;;  %v6255_v39 = vld [vmem:[#allocation4 + $0x87] ss:$2 sm:$0xff]  ;;  %v6913_v59 = vld [vmem:[#allocation6 + $0x138] sm:$0xff]  ;;  %v6682_v7 = vld [vmem:[#allocation4 + $0x88] ss:$2 sm:$0xff] }
 0x569   :  { %6245 = vst.msk [vmem:[#allocation4 + $0x188] sm:$0xf] %vm6237_vm3, %v6235_v12  ;;  %v6253_v16 = vld [vmem:[#allocation4 + $0x67] ss:$2 sm:$0xff]  ;;  %v6680_v62 = vld [vmem:[#allocation4 + $0x68] ss:$2 sm:$0xff] }
 0x56a   :  { %6244 = vst.msk [vmem:[#allocation4 + $0x168] sm:$0xf] %vm6237_vm3, %v6234_v14  ;;  %11536 = vmatmul.mubr.msk.f32.vlgmr.msra.gmra.mrb[8].mxu1 %vm228_vm1, %v6253_v16  ;;  %v7136_v12 = vld [vmem:[#allocation6 + $0x50] sm:$0xff]  ;;  %v7137_v13 = vld [vmem:[#allocation6 + $0x58] sm:$0xff]  ;;  %v7883_v8 = vld [vmem:[#allocation6 + $0x1e8] sm:$0xff] }
 0x56b   :  { %12066 = vmatpush3.bf16.msra.mxu1 %v12063_v58  ;;  %v6912_v58 = vld [vmem:[#allocation6 + $0x130] sm:$0xff] }
 0x56c   :  { %12068 = vmatprep.subr.bf16.mxu1 %v12067_v15  ;;  %v6263_v33 = vld [vmem:[#allocation4 + $0x147] ss:$2 sm:$0xff]  ;;  %v6690_v57 = vld [vmem:[#allocation4 + $0x148] ss:$2 sm:$0xff]  ;;  %v12107_v61 = vpack.c.bf16 %v6913_v59, %v6912_v58  ;;  %v7679_v58 = vld [vmem:[#allocation6 + $0xf8] sm:$0xff] }
 0x56d   :  { %v6261_v20 = vld [vmem:[#allocation4 + $0x127] ss:$2 sm:$0xff]  ;;  %v6688_v1 = vld [vmem:[#allocation4 + $0x128] ss:$2 sm:$0xff] }
 0x56e   :  { %11538 = vmatprep.mubr.msk.f32.mxu1 %vm228_vm1, %v6261_v20  ;;  %v6684_v14 = vld [vmem:[#allocation4 + $0xa8] ss:$2 sm:$0xff]  ;;  %v7126_v30 = vld [vmem:[#allocation4 + $0x149] ss:$2 sm:$0xff] }
 0x56f   :  { %12070 = vmatpush3.bf16.msra.mxu1 %v12067_v15  ;;  %v12123_v15 = vpack.c.bf16 %v7137_v13, %v7136_v12  ;;  %v7124_v42 = vld [vmem:[#allocation4 + $0x129] ss:$2 sm:$0xff]  ;;  %v7558_v59 = vld [vmem:[#allocation4 + $0x10a] ss:$2 sm:$0xff] }
 0x570   :  { %12072 = vmatprep.subr.bf16.mxu1 %v12071_v19  ;;  %v6267_v45 = vld [vmem:[#allocation4 + $0x187] ss:$2 sm:$0xff]  ;;  %v6694_v11 = vld [vmem:[#allocation4 + $0x188] ss:$2 sm:$0xff]  ;;  %v7885_v13 = vld [vmem:[#allocation6 + $0x1f8] sm:$0xff] }
 0x571   :  { %v6265_v22 = vld [vmem:[#allocation4 + $0x167] ss:$2 sm:$0xff]  ;;  %v6692_v3 = vld [vmem:[#allocation4 + $0x168] ss:$2 sm:$0xff] }
 0x572   :  { %11539 = vmatmul.mubr.msk.f32.gmra.mrb[10].mxu1 %vm228_vm1, %v6265_v22  ;;  %v7560_v9 = vld [vmem:[#allocation4 + $0x12a] ss:$2 sm:$0xff] }
 0x573   :  { %11549 = vmatprep.mubr.msk.f32.mxu1 %vm228_vm1, %v6247_v21  ;;  %v7242_v21 = vld [vmem:[#allocation6 + $0xd0] sm:$0xff] }
 0x574   :  { %v7884_v12 = vld [vmem:[#allocation6 + $0x1f0] sm:$0xff] }
 0x576   :  { %11550 = vmatmul.mubr.msk.f32.vlgmr.msra.gmra.mrb[8].mxu1 %vm228_vm1, %v6251_v27 }
 0x577   :  { %12074 = vmatpush3.bf16.msra.mxu1 %v12071_v19  ;;  %11552 = vmatprep.mubr.msk.f32.mxu1 %vm228_vm1, %v6259_v25  ;;  %v7110_v19 = vld [vmem:[#allocation4 + $0x9] ss:$2 sm:$0xff] }
 0x578   :  { %12076 = vmatprep.subr.bf16.mxu1 %v12075_v26  ;;  %v7114_v25 = vld [vmem:[#allocation4 + $0x49] ss:$2 sm:$0xff] }
 0x57a   :  { %11553 = vmatmul.mubr.msk.f32.gmra.mrb[10].mxu1 %vm228_vm1, %v6263_v33 }
 0x57b   :  { %12078 = vmatpush3.bf16.msra.mxu1 %v12075_v26  ;;  %11563 = vmatprep.mubr.msk.f32.mxu1 %vm228_vm1, %v6251_v27  ;;  %v7346_v26 = vld [vmem:[#allocation6 + $0x140] sm:$0xff]  ;;  %v7347_v27 = vld [vmem:[#allocation6 + $0x148] sm:$0xff] }
 0x57c   :  { %12080 = vmatprep.subr.bf16.mxu1 %v12079_v32  ;;  %v12135_v29 = vpack.c.bf16 %v7347_v27, %v7346_v26  ;;  %v8015_v26 = vld [vmem:[#allocation9 + $0x8] sm:$0xff] }
 0x57e   :  { %11564 = vmatmul.mubr.msk.f32.vlgmr.msra.gmra.mrb[8].mxu1 %vm228_vm1, %v6255_v39  ;;  %v7446_v39 = vld [vmem:[#allocation6 + $0x1c0] sm:$0xff] }
 0x57f   :  { %12082 = vmatpush3.bf16.msra.mxu1 %v12079_v32  ;;  %11566 = vmatprep.mubr.msk.f32.mxu1 %vm228_vm1, %v6263_v33  ;;  %v7348_v32 = vld [vmem:[#allocation6 + $0x150] sm:$0xff]  ;;  %v7349_v33 = vld [vmem:[#allocation6 + $0x158] sm:$0xff] }
 0x580   :  { %12084 = vmatprep.subr.bf16.mxu1 %v12083_v38  ;;  %v12139_v37 = vpack.c.bf16 %v7349_v33, %v7348_v32 }
 0x582   :  { %11567 = vmatmul.mubr.msk.f32.gmra.mrb[10].mxu1 %vm228_vm1, %v6267_v45  ;;  %v7128_v45 = vld [vmem:[#allocation4 + $0x169] ss:$2 sm:$0xff] }
 0x583   :  { %12086 = vmatpush3.bf16.msra.mxu1 %v12083_v38  ;;  %11577 = vmatprep.mubr.msk.f32.mxu1 %vm228_vm1, %v6253_v16  ;;  %v7240_v16 = vld [vmem:[#allocation6 + $0xc0] sm:$0xff]  ;;  %v7116_v38 = vld [vmem:[#allocation4 + $0x69] ss:$2 sm:$0xff] }
 0x584   :  { %12088 = vmatprep.subr.bf16.mxu1 %v12087_v44  ;;  %v12127_v20 = vpack.c.bf16 %v7241_v17, %v7240_v16  ;;  %v7566_v16 = vld [vmem:[#allocation4 + $0x18a] ss:$2 sm:$0xff] }
 0x585   :  { %v7556_v17 = vld [vmem:[#allocation4 + $0xaa] ss:$2 sm:$0xff] }
 0x586   :  { %11578 = vmatmul.mubr.msk.f32.vlgmr.msra.gmra.mrb[8].mxu1 %vm228_vm1, %v6257_v31  ;;  %v12147_v31 = vpack.c.bf16 %v7449_v28, %v7448_v46  ;;  %v7999_v28 = vld [vmem:[#allocation5 + $0x7] ss:$2 sm:$0xff] }
 0x587   :  { %12090 = vmatpush3.bf16.msra.mxu1 %v12087_v44  ;;  %11580 = vmatprep.mubr.msk.f32.mxu1 %vm228_vm1, %v6265_v22  ;;  %v7243_v22 = vld [vmem:[#allocation6 + $0xd8] sm:$0xff]  ;;  %v12143_v44 = vpack.c.bf16 %v7447_v40, %v7446_v39 }
 0x588   :  { %12092 = vmatprep.subr.bf16.mxu1 %v12091_v34  ;;  %v12131_v24 = vpack.c.bf16 %v7243_v22, %v7242_v21  ;;  %v8021_v21 = vld [vmem:[#allocation9 + $0x90] sm:$0xff] }
 0x58a   :  { %11581 = vmatmul.mubr.msk.f32.gmra.mrb[10].mxu1 %vm228_vm1, %v6269_v43  ;;  %v12151_v43 = vpack.c.bf16 %v7571_v41, %v7570_v36  ;;  %v8187_v36 = vld [vmem:[#allocation9 + $0x108] sm:$0xff] }
 0x58b   :  { %12094 = vmatpush3.bf16.msra.mxu1 %v12091_v34  ;;  %11591 = vmatprep.mubr.msk.f32.mxu1 %vm228_vm1, %v6674_v47  ;;  %v7118_v34 = vld [vmem:[#allocation4 + $0x89] ss:$2 sm:$0xff] }
 0x58c   :  { %12096 = vmatprep.subr.bf16.mxu1 %v12095_v48  ;;  %v7130_v47 = vld [vmem:[#allocation4 + $0x189] ss:$2 sm:$0xff] }
 0x58e   :  { %11592 = vmatmul.mubr.msk.f32.vlgmr.msra.gmra.mrb[8].mxu1 %vm228_vm1, %v6678_v53 }
 0x58f   :  { %12098 = vmatpush3.bf16.msra.mxu1 %v12095_v48  ;;  %11594 = vmatprep.mubr.msk.f32.mxu1 %vm228_vm1, %v6686_v51  ;;  %v7572_v48 = vld [vmem:[#allocation6 + $0x70] sm:$0xff] }
 0x590   :  { %12100 = vmatprep.subr.bf16.mxu1 %v12099_v52  ;;  %v12155_v51 = vpack.c.bf16 %v7573_v49, %v7572_v48  ;;  %v8007_v48 = vld [vmem:[#allocation5 + $0xc7] ss:$2 sm:$0xff] }
 0x592   :  { %11595 = vmatmul.mubr.msk.f32.gmra.mrb[10].mxu1 %vm228_vm1, %v6690_v57 }
 0x593   :  { %12102 = vmatpush3.bf16.msra.mxu1 %v12099_v52  ;;  %11605 = vmatprep.mubr.msk.f32.mxu1 %vm228_vm1, %v6676_v60  ;;  %v7676_v52 = vld [vmem:[#allocation6 + $0xe0] sm:$0xff] }
 0x594   :  { %12104 = vmatprep.subr.bf16.mxu1 %v12103_v56 }
 0x596   :  { %11606 = vmatmul.mubr.msk.f32.vlgmr.msra.gmra.mrb[8].mxu1 %vm228_vm1, %v6680_v62 }
 0x597   :  { %12106 = vmatpush3.bf16.msra.mxu1 %v12103_v56  ;;  %11608 = vmatprep.mubr.msk.f32.mxu1 %vm228_vm1, %v6688_v1  ;;  %v7562_v1 = vld [vmem:[#allocation4 + $0x14a] ss:$2 sm:$0xff] }
 0x598   :  { %12108 = vmatprep.subr.bf16.mxu1 %v12107_v61 }
 0x59a   :  { %11609 = vmatmul.mubr.msk.f32.gmra.mrb[10].mxu1 %vm228_vm1, %v6692_v3 }
 0x59b   :  { %12110 = vmatpush3.bf16.msra.mxu1 %v12107_v61  ;;  %11619 = vmatprep.mubr.msk.f32.mxu1 %vm228_vm1, %v6678_v53  ;;  %v7677_v53 = vld [vmem:[#allocation6 + $0xe8] sm:$0xff] }
 0x59c   :  { %12112 = vmatprep.subr.bf16.mxu1 %v12111_v2  ;;  %v12159_v56 = vpack.c.bf16 %v7677_v53, %v7676_v52  ;;  %v7550_v61 = vld [vmem:[#allocation4 + $0x4a] ss:$2 sm:$0xff] }
 0x59e   :  { %11620 = vmatmul.mubr.msk.f32.vlgmr.msra.gmra.mrb[8].mxu1 %vm228_vm1, %v6682_v7  ;;  %v7882_v7 = vld [vmem:[#allocation6 + $0x1e0] sm:$0xff] }
 0x59f   :  { %12114 = vmatpush3.bf16.msra.mxu1 %v12111_v2  ;;  %11622 = vmatprep.mubr.msk.f32.mxu1 %vm228_vm1, %v6690_v57  ;;  %v7678_v57 = vld [vmem:[#allocation6 + $0xf0] sm:$0xff] }
 0x5a0   :  { %12116 = vmatprep.subr.bf16.mxu1 %v12115_v6  ;;  %v12163_v60 = vpack.c.bf16 %v7679_v58, %v7678_v57  ;;  %v7784_v2 = vld [vmem:[#allocation6 + $0x170] sm:$0xff] }
 0x5a1   :  { %v8005_v57 = vld [vmem:[#allocation5 + $0x67] ss:$2 sm:$0xff] }
 0x5a2   :  { %11623 = vmatmul.mubr.msk.f32.gmra.mrb[10].mxu1 %vm228_vm1, %v6694_v11  ;;  %v7564_v11 = vld [vmem:[#allocation4 + $0x16a] ss:$2 sm:$0xff] }
 0x5a3   :  { %12118 = vmatpush3.bf16.msra.mxu1 %v12115_v6  ;;  %11633 = vmatprep.mubr.msk.f32.mxu1 %vm228_vm1, %v6680_v62  ;;  %v7782_v62 = vld [vmem:[#allocation6 + $0x160] sm:$0xff]  ;;  %v7552_v6 = vld [vmem:[#allocation4 + $0x6a] ss:$2 sm:$0xff] }
 0x5a4   :  { %12120 = vmatprep.subr.bf16.mxu1 %v12119_v10  ;;  %v12167_v0 = vpack.c.bf16 %v7783_v63, %v7782_v62  ;;  %v8380_v62 = vld [vmem:[#allocation9 + $0x30] sm:$0xff]  ;;  %v8381_v63 = vld [vmem:[#allocation9 + $0x38] sm:$0xff] }
 0x5a6   :  { %11634 = vmatmul.mubr.msk.f32.vlgmr.msra.gmra.mrb[8].mxu1 %vm228_vm1, %v6684_v14  ;;  %v12179_v14 = vpack.c.bf16 %v7885_v13, %v7884_v12 }
 0x5a7   :  { %12122 = vmatpush3.bf16.msra.mxu1 %v12119_v10  ;;  %11636 = vmatprep.mubr.msk.f32.mxu1 %vm228_vm1, %v6692_v3  ;;  %v7785_v3 = vld [vmem:[#allocation6 + $0x178] sm:$0xff]  ;;  %v12175_v10 = vpack.c.bf16 %v7883_v8, %v7882_v7  ;;  %v8370_v8 = vld [vmem:[#allocation5 + $0xc8] ss:$2 sm:$0xff] }
 0x5a8   :  { %12124 = vmatprep.subr.bf16.mxu1 %v12123_v15  ;;  %v12171_v5 = vpack.c.bf16 %v7785_v3, %v7784_v2  ;;  %v8362_v2 = vld [vmem:[#allocation5 + $0x8] ss:$2 sm:$0xff]  ;;  %v8466_v3 = vld [vmem:[#allocation9 + $0xa0] sm:$0xff]  ;;  %v8469_v7 = vld [vmem:[#allocation9 + $0xb8] sm:$0xff] }
 0x5aa   :  { %11637 = vmatmul.mubr.msk.f32.gmra.mrb[10].mxu1 %vm228_vm1, %v6696_v18  ;;  %v7568_v18 = vld [vmem:[#allocation4 + $0x1aa] ss:$2 sm:$0xff] }
 0x5ab   :  { %12126 = vmatpush3.bf16.msra.mxu1 %v12123_v15  ;;  %11647 = vmatprep.mubr.msk.f32.mxu1 %vm228_vm1, %v7110_v19  ;;  %v7554_v15 = vld [vmem:[#allocation4 + $0x8a] ss:$2 sm:$0xff]  ;;  %v8019_v19 = vld [vmem:[#allocation9 + $0x80] sm:$0xff] }
 0x5ac   :  { %12128 = vmatprep.subr.bf16.mxu1 %v12127_v20 }
 0x5ae   :  { %11648 = vmatmul.mubr.msk.f32.vlgmr.msra.gmra.mrb[8].mxu1 %vm228_vm1, %v7114_v25 }
 0x5af   :  { %12130 = vmatpush3.bf16.msra.mxu1 %v12127_v20  ;;  %11650 = vmatprep.mubr.msk.f32.mxu1 %vm228_vm1, %v7122_v23  ;;  %v8020_v20 = vld [vmem:[#allocation9 + $0x88] sm:$0xff]  ;;  %v8022_v23 = vld [vmem:[#allocation9 + $0x98] sm:$0xff] }
 0x5b0   :  { %12132 = vmatprep.subr.bf16.mxu1 %v12131_v24  ;;  %v12183_v22 = vpack.c.bf16 %v8020_v20, %v8019_v19  ;;  %v8643_v19 = vld [vmem:[#allocation9 + $0x1a8] sm:$0xff] }
 0x5b2   :  { %11651 = vmatmul.mubr.msk.f32.gmra.mrb[10].mxu1 %vm228_vm1, %v7126_v30 }
 0x5b3   :  { %12134 = vmatpush3.bf16.msra.mxu1 %v12131_v24  ;;  %11661 = vmatprep.mubr.msk.f32.mxu1 %vm228_vm1, %v7112_v35  ;;  %v12187_v24 = vpack.c.bf16 %v8022_v23, %v8021_v21  ;;  %v8645_v23 = vld [vmem:[#allocation9 + $0x1b8] sm:$0xff] }
 0x5b4   :  { %12136 = vmatprep.subr.bf16.mxu1 %v12135_v29 }
 0x5b6   :  { %11662 = vmatmul.mubr.msk.f32.vlgmr.msra.gmra.mrb[8].mxu1 %vm228_vm1, %v7116_v38 }
 0x5b7   :  { %12138 = vmatpush3.bf16.msra.mxu1 %v12135_v29  ;;  %11664 = vmatprep.mubr.msk.f32.mxu1 %vm228_vm1, %v7124_v42  ;;  %v10067_v29 = vld [vmem:[%s14780_s6] ss:$0 sm:$0xff] }
 0x5b8   :  { %12140 = vmatprep.subr.bf16.mxu1 %v12139_v37 }
 0x5ba   :  { %11665 = vmatmul.mubr.msk.f32.gmra.mrb[10].mxu1 %vm228_vm1, %v7128_v45 }
 0x5bb   :  { %12142 = vmatpush3.bf16.msra.mxu1 %v12139_v37  ;;  %11675 = vmatprep.mubr.msk.f32.mxu1 %vm228_vm1, %v7114_v25  ;;  %v8014_v25 = vld [vmem:[#allocation9] sm:$0xff] }
 0x5bc   :  { %12144 = vmatprep.subr.bf16.mxu1 %v12143_v44  ;;  %v12191_v27 = vpack.c.bf16 %v8015_v26, %v8014_v25  ;;  %v8368_v25 = vld [vmem:[#allocation5 + $0x68] ss:$2 sm:$0xff] }
 0x5be   :  { %11676 = vmatmul.mubr.msk.f32.vlgmr.msra.gmra.mrb[8].mxu1 %vm228_vm1, %v7118_v34  ;;  %v8186_v34 = vld [vmem:[#allocation9 + $0x100] sm:$0xff] }
 0x5bf   :  { %12146 = vmatpush3.bf16.msra.mxu1 %v12143_v44  ;;  %11678 = vmatprep.mubr.msk.f32.mxu1 %vm228_vm1, %v7126_v30  ;;  %v8016_v44 = vld [vmem:[#allocation9 + $0x10] sm:$0xff]  ;;  %v12199_v41 = vpack.c.bf16 %v8187_v36, %v8186_v34  ;;  %v8923_v34 = vld [vmem:[#allocation9 + $0x148] sm:$0xff] }
 0x5c0   :  { %12148 = vmatprep.subr.bf16.mxu1 %v12147_v31 }
 0x5c2   :  { %11679 = vmatmul.mubr.msk.f32.gmra.mrb[10].mxu1 %vm228_vm1, %v7130_v47  ;;  %v8189_v47 = vld [vmem:[#allocation9 + $0x118] sm:$0xff] }
 0x5c3   :  { %12150 = vmatpush3.bf16.msra.mxu1 %v12147_v31  ;;  %11689 = vmatprep.mubr.msk.f32.mxu1 %vm228_vm1, %v7116_v38 }
 0x5c4   :  { %12152 = vmatprep.subr.bf16.mxu1 %v12151_v43 }
 0x5c6   :  { %11690 = vmatmul.mubr.msk.f32.vlgmr.msra.gmra.mrb[8].mxu1 %vm228_vm1, %v7120_v50  ;;  %v8274_v50 = vld [vmem:[#allocation9 + $0x180] sm:$0xff] }
 0x5c7   :  { %12154 = vmatpush3.bf16.msra.mxu1 %v12151_v43  ;;  %11692 = vmatprep.mubr.msk.f32.mxu1 %vm228_vm1, %v7128_v45  ;;  %v8017_v45 = vld [vmem:[#allocation9 + $0x18] sm:$0xff]  ;;  %v8188_v43 = vld [vmem:[#allocation9 + $0x110] sm:$0xff] }
 0x5c8   :  { %12156 = vmatprep.subr.bf16.mxu1 %v12155_v51  ;;  %v12195_v46 = vpack.c.bf16 %v8017_v45, %v8016_v44  ;;  %v12203_v49 = vpack.c.bf16 %v8189_v47, %v8188_v43  ;;  %v8836_v44 = vld [vmem:[#allocation9 + $0xd0] sm:$0xff]  ;;  %v8837_v45 = vld [vmem:[#allocation9 + $0xd8] sm:$0xff] }
 0x5c9   :  { %v8924_v43 = vld [vmem:[#allocation9 + $0x150] sm:$0xff]  ;;  %v8925_v47 = vld [vmem:[#allocation9 + $0x158] sm:$0xff] }
 0x5ca   :  { %11693 = vmatmul.mubr.msk.f32.gmra.mrb[10].mxu1 %vm228_vm1, %v7132_v54  ;;  %v8276_v54 = vld [vmem:[#allocation9 + $0x190] sm:$0xff] }
 0x5cb   :  { %12158 = vmatpush3.bf16.msra.mxu1 %v12155_v51  ;;  %11703 = vmatprep.mubr.msk.f32.mxu1 %vm228_vm1, %v7546_v55  ;;  %v8275_v51 = vld [vmem:[#allocation9 + $0x188] sm:$0xff]  ;;  %v8277_v55 = vld [vmem:[#allocation9 + $0x198] sm:$0xff] }
 0x5cc   :  { %12160 = vmatprep.subr.bf16.mxu1 %v12159_v56  ;;  %v12207_v53 = vpack.c.bf16 %v8275_v51, %v8274_v50  ;;  %v9010_v50 = vld [vmem:[#allocation9 + $0x1c0] sm:$0xff]  ;;  %v9011_v51 = vld [vmem:[#allocation9 + $0x1c8] sm:$0xff] }
 0x5ce   :  { %11704 = vmatmul.mubr.msk.f32.vlgmr.msra.gmra.mrb[8].mxu1 %vm228_vm1, %v7550_v61 }
 0x5cf   :  { %12162 = vmatpush3.bf16.msra.mxu1 %v12159_v56  ;;  %11706 = vmatprep.mubr.msk.f32.mxu1 %vm228_vm1, %v7558_v59  ;;  %v12211_v56 = vpack.c.bf16 %v8277_v55, %v8276_v54  ;;  %v8378_v59 = vld [vmem:[#allocation9 + $0x20] sm:$0xff]  ;;  %v9012_v54 = vld [vmem:[#allocation9 + $0x1d0] sm:$0xff]  ;;  %v9013_v55 = vld [vmem:[#allocation9 + $0x1d8] sm:$0xff] }
 0x5d0   :  { %12164 = vmatprep.subr.bf16.mxu1 %v12163_v60 }
 0x5d2   :  { %11707 = vmatmul.mubr.msk.f32.gmra.mrb[10].mxu1 %vm228_vm1, %v7562_v1 }
 0x5d3   :  { %12166 = vmatpush3.bf16.msra.mxu1 %v12163_v60  ;;  %11717 = vmatprep.mubr.msk.f32.mxu1 %vm228_vm1, %v7548_v4  ;;  %v8379_v60 = vld [vmem:[#allocation9 + $0x28] sm:$0xff] }
 0x5d4   :  { %12168 = vmatprep.subr.bf16.mxu1 %v12167_v0  ;;  %v8467_v4 = vld [vmem:[#allocation9 + $0xa8] sm:$0xff] }
 0x5d6   :  { %11718 = vmatmul.mubr.msk.f32.vlgmr.msra.gmra.mrb[8].mxu1 %vm228_vm1, %v7552_v6 }
 0x5d7   :  { %12170 = vmatpush3.bf16.msra.mxu1 %v12167_v0  ;;  %11720 = vmatprep.mubr.msk.f32.mxu1 %vm228_vm1, %v7560_v9  ;;  %v8013_v0 = vld [vmem:[#allocation5 + $0x127] ss:$2 sm:$0xff] }
 0x5d8   :  { %12172 = vmatprep.subr.bf16.mxu1 %v12171_v5 }
 0x5da   :  { %11721 = vmatmul.mubr.msk.f32.gmra.mrb[10].mxu1 %vm228_vm1, %v7564_v11 }
 0x5db   :  { %12174 = vmatpush3.bf16.msra.mxu1 %v12171_v5  ;;  %11731 = vmatprep.mubr.msk.f32.mxu1 %vm228_vm1, %v7550_v61  ;;  %v12215_v61 = vpack.c.bf16 %v8379_v60, %v8378_v59  ;;  %v12223_v5 = vpack.c.bf16 %v8467_v4, %v8466_v3  ;;  %v9114_v59 = vld [vmem:[#allocation9 + $0x60] sm:$0xff]  ;;  %v9115_v60 = vld [vmem:[#allocation9 + $0x68] sm:$0xff] }
 0x5dc   :  { %12176 = vmatprep.subr.bf16.mxu1 %v12175_v10  ;;  %v9202_v3 = vld [vmem:[#allocation9 + $0xe0] sm:$0xff]  ;;  %v9203_v4 = vld [vmem:[#allocation9 + $0xe8] sm:$0xff] }
 0x5de   :  { %11732 = vmatmul.mubr.msk.f32.vlgmr.msra.gmra.mrb[8].mxu1 %vm228_vm1, %v7554_v15  ;;  %v8557_v15 = vld [vmem:[#allocation9 + $0x138] sm:$0xff] }
 0x5df   :  { %12178 = vmatpush3.bf16.msra.mxu1 %v12175_v10  ;;  %11734 = vmatprep.mubr.msk.f32.mxu1 %vm228_vm1, %v7562_v1  ;;  %v12219_v1 = vpack.c.bf16 %v8381_v63, %v8380_v62  ;;  %v8554_v10 = vld [vmem:[#allocation9 + $0x120] sm:$0xff]  ;;  %v9116_v62 = vld [vmem:[#allocation9 + $0x70] sm:$0xff]  ;;  %v9117_v63 = vld [vmem:[#allocation9 + $0x78] sm:$0xff] }
 0x5e0   :  { %12180 = vmatprep.subr.bf16.mxu1 %v12179_v14 }
 0x5e2   :  { %11735 = vmatmul.mubr.msk.f32.gmra.mrb[10].mxu1 %vm228_vm1, %v7566_v16 }
 0x5e3   :  { %12182 = vmatpush3.bf16.msra.mxu1 %v12179_v14  ;;  %11745 = vmatprep.mubr.msk.f32.mxu1 %vm228_vm1, %v7552_v6  ;;  %v8468_v6 = vld [vmem:[#allocation9 + $0xb0] sm:$0xff] }
 0x5e4   :  { %12184 = vmatprep.subr.bf16.mxu1 %v12183_v22  ;;  %v12227_v9 = vpack.c.bf16 %v8469_v7, %v8468_v6  ;;  %v8556_v14 = vld [vmem:[#allocation9 + $0x130] sm:$0xff]  ;;  %v9205_v7 = vld [vmem:[#allocation9 + $0xf8] sm:$0xff] }
 0x5e5   :  { %v12235_v16 = vpack.c.bf16 %v8557_v15, %v8556_v14  ;;  %v9204_v6 = vld [vmem:[#allocation9 + $0xf0] sm:$0xff]  ;;  %v9293_v15 = vld [vmem:[#allocation9 + $0x178] sm:$0xff] }
 0x5e6   :  { %11746 = vmatmul.mubr.msk.f32.vlgmr.msra.gmra.mrb[8].mxu1 %vm228_vm1, %v7556_v17  ;;  %v9292_v14 = vld [vmem:[#allocation9 + $0x170] sm:$0xff] }
 0x5e7   :  { %11748 = vmatprep.mubr.msk.f32.mxu1 %vm228_vm1, %v7564_v11  ;;  %12186 = vmatpush3.bf16.msra.mxu1 %v12183_v22  ;;  %v8555_v11 = vld [vmem:[#allocation9 + $0x128] sm:$0xff]  ;;  %v8644_v22 = vld [vmem:[#allocation9 + $0x1b0] sm:$0xff] }
 0x5e8   :  { %12188 = vmatprep.subr.bf16.mxu1 %v12187_v24  ;;  %v12231_v13 = vpack.c.bf16 %v8555_v11, %v8554_v10  ;;  %v9100_v10 = vld [vmem:[#allocation5 + $0x2a] ss:$2 sm:$0xff]  ;;  %v9290_v11 = vld [vmem:[#allocation9 + $0x160] sm:$0xff] }
 0x5ea   :  { %11749 = vmatmul.mubr.msk.f32.gmra.mrb[10].mxu1 %vm228_vm1, %v7568_v18  ;;  %v8642_v18 = vld [vmem:[#allocation9 + $0x1a0] sm:$0xff] }
 0x5eb   :  { %12190 = vmatpush3.bf16.msra.mxu1 %v12187_v24  ;;  %v12239_v21 = vpack.c.bf16 %v8643_v19, %v8642_v18  ;;  %v12243_v24 = vpack.c.bf16 %v8645_v23, %v8644_v22  ;;  %v9102_v18 = vld [vmem:[#allocation5 + $0x4a] ss:$2 sm:$0xff]  ;;  %v9378_v19 = vld [vmem:[#allocation9 + $0x1e0] sm:$0xff] }
 0x5ec   :  { %12192 = vmatprep.subr.bf16.mxu1 %v12191_v27  ;;  %v9380_v22 = vld [vmem:[#allocation9 + $0x1f0] sm:$0xff]  ;;  %v9381_v23 = vld [vmem:[#allocation9 + $0x1f8] sm:$0xff] }
 0x6b9   :  { %v11747_v30 = vpop.f32.mrb[8].mxu1 }
 0x6ba   :  { %v7989_v32 = vadd.f32 %v11747_v30, %v10067_v29  ;;  %v7958_v33 = vpop.f32.mrb[9].mxu1 }
 0x6bb   :  { %v7988_v35 = vadd.f32 %v10067_v29, %v7958_v33  ;;  %v8749_v33 = vld [vmem:[#allocation9 + $0x58] sm:$0xff] }
 0x6bc   :  { %7995 = vst.msk [vmem:[#allocation5 + $0x48] sm:$0x3] %vm7993_vm4, %v7989_v32  ;;  %v8748_v32 = vld [vmem:[#allocation9 + $0x50] sm:$0xff] }
 0x6bd   :  { %7994 = vst.msk [vmem:[#allocation5 + $0x28] sm:$0x3] %vm7993_vm4, %v7988_v35  ;;  %v11750_v37 = vpop.f32.mrb[10].mxu1  ;;  %v8376_v35 = vld [vmem:[#allocation5 + $0x128] ss:$2 sm:$0xff] }
 0x6be   :  { %v7991_v38 = vadd.f32 %v11750_v37, %v10067_v29  ;;  %v7968_v39 = vpop.f32.mrb[11].mxu1  ;;  %v12251_v37 = vpack.c.bf16 %v8749_v33, %v8748_v32 }
 0x6bf   :  { %v7990_v40 = vadd.f32 %v10067_v29, %v7968_v39  ;;  %v8747_v29 = vld [vmem:[#allocation9 + $0x48] sm:$0xff]  ;;  %v8834_v39 = vld [vmem:[#allocation9 + $0xc0] sm:$0xff] }
 0x6c0   :  { %7997 = vst.msk [vmem:[#allocation5 + $0x108] sm:$0x3] %vm7993_vm4, %v7991_v38  ;;  %v8730_v38 = vld [vmem:[#allocation5 + $0x9] ss:$2 sm:$0xff] }
 0x6c1   :  { %7996 = vst.msk [vmem:[#allocation5 + $0xe8] sm:$0x3] %vm7993_vm4, %v7990_v40  ;;  %v8835_v40 = vld [vmem:[#allocation9 + $0xc8] sm:$0xff] }
 0x6c3   :  { %v8003_v52 = vld [vmem:[#allocation5 + $0x47] ss:$2 sm:$0xff]  ;;  %v8366_v20 = vld [vmem:[#allocation5 + $0x48] ss:$2 sm:$0xff] }
 0x6c4   :  { %v8001_v42 = vld [vmem:[#allocation5 + $0x27] ss:$2 sm:$0xff]  ;;  %v8364_v12 = vld [vmem:[#allocation5 + $0x28] ss:$2 sm:$0xff] }
 0x6c5   :  { %11759 = vmatprep.mubr.msk.f32.mxu1 %vm228_vm1, %v8001_v42  ;;  %v12255_v42 = vpack.c.bf16 %v8835_v40, %v8834_v39  ;;  %v8732_v36 = vld [vmem:[#allocation5 + $0x29] ss:$2 sm:$0xff] }
 0x6c7   :  { %v8011_v58 = vld [vmem:[#allocation5 + $0x107] ss:$2 sm:$0xff]  ;;  %v8374_v26 = vld [vmem:[#allocation5 + $0x108] ss:$2 sm:$0xff] }
 0x6c8   :  { %v8009_v31 = vld [vmem:[#allocation5 + $0xe7] ss:$2 sm:$0xff]  ;;  %v8372_v17 = vld [vmem:[#allocation5 + $0xe8] ss:$2 sm:$0xff] }
 0x6c9   :  { %11760 = vmatmul.mubr.msk.f32.vlgmr.msra.gmra.mrb[12].mxu1 %vm228_vm1, %v8009_v31  ;;  %v8922_v31 = vld [vmem:[#allocation9 + $0x140] sm:$0xff] }
 0x6ca   :  { %12194 = vmatpush3.bf16.msra.mxu1 %v12191_v27  ;;  %11770 = vmatprep.mubr.msk.f32.mxu1 %vm228_vm1, %v7999_v28  ;;  %v8746_v27 = vld [vmem:[#allocation9 + $0x40] sm:$0xff]  ;;  %v12259_v28 = vpack.c.bf16 %v8837_v45, %v8836_v44 }
 0x6cb   :  { %12196 = vmatprep.subr.bf16.mxu1 %v12195_v46  ;;  %v12247_v30 = vpack.c.bf16 %v8747_v29, %v8746_v27  ;;  %v9112_v27 = vld [vmem:[#allocation5 + $0x12a] ss:$2 sm:$0xff]  ;;  %v10100_v29 = vld [vmem:[%s14782_s8] ss:$0 sm:$0xff] }
 0x6ce   :  { %12198 = vmatpush3.bf16.msra.mxu1 %v12195_v46  ;;  %v8738_v46 = vld [vmem:[#allocation5 + $0xc9] ss:$2 sm:$0xff] }
 0x6cf   :  { %12200 = vmatprep.subr.bf16.mxu1 %v12199_v41 }
 0x6d1   :  { %11771 = vmatmul.mubr.msk.f32.vlgmr.msra.gmra.mrb[12].mxu1 %vm228_vm1, %v8007_v48  ;;  %v12267_v48 = vpack.c.bf16 %v8925_v47, %v8924_v43  ;;  %v10102_v47 = vld [vmem:[%s14784_s10] ss:$0 sm:$0xff] }
 0x6d2   :  { %12202 = vmatpush3.bf16.msra.mxu1 %v12199_v41  ;;  %11781 = vmatprep.mubr.msk.f32.mxu1 %vm228_vm1, %v8003_v52  ;;  %v12263_v41 = vpack.c.bf16 %v8923_v34, %v8922_v31  ;;  %v8734_v52 = vld [vmem:[#allocation5 + $0x49] ss:$2 sm:$0xff] }
 0x6d3   :  { %12204 = vmatprep.subr.bf16.mxu1 %v12203_v49 }
 0x6d6   :  { %12206 = vmatpush3.bf16.msra.mxu1 %v12203_v49  ;;  %v8740_v49 = vld [vmem:[#allocation5 + $0xe9] ss:$2 sm:$0xff] }
 0x6d7   :  { %12208 = vmatprep.subr.bf16.mxu1 %v12207_v53 }
 0x6d9   :  { %11782 = vmatmul.mubr.msk.f32.vlgmr.msra.gmra.mrb[12].mxu1 %vm228_vm1, %v8011_v58  ;;  %v8742_v58 = vld [vmem:[#allocation5 + $0x109] ss:$2 sm:$0xff] }
 0x6da   :  { %12210 = vmatpush3.bf16.msra.mxu1 %v12207_v53  ;;  %11792 = vmatprep.mubr.msk.f32.mxu1 %vm228_vm1, %v8005_v57  ;;  %v12271_v53 = vpack.c.bf16 %v9011_v51, %v9010_v50  ;;  %v8736_v57 = vld [vmem:[#allocation5 + $0x69] ss:$2 sm:$0xff] }
 0x6db   :  { %12212 = vmatprep.subr.bf16.mxu1 %v12211_v56 }
 0x6de   :  { %12214 = vmatpush3.bf16.msra.mxu1 %v12211_v56  ;;  %v12275_v56 = vpack.c.bf16 %v9013_v55, %v9012_v54 }
 0x6df   :  { %12216 = vmatprep.subr.bf16.mxu1 %v12215_v61 }
 0x6e1   :  { %11793 = vmatmul.mubr.msk.f32.vlgmr.msra.gmra.mrb[12].mxu1 %vm228_vm1, %v8013_v0  ;;  %v8744_v0 = vld [vmem:[#allocation5 + $0x129] ss:$2 sm:$0xff] }
 0x6e2   :  { %12218 = vmatpush3.bf16.msra.mxu1 %v12215_v61  ;;  %11803 = vmatprep.mubr.msk.f32.mxu1 %vm228_vm1, %v8362_v2  ;;  %v12279_v61 = vpack.c.bf16 %v9115_v60, %v9114_v59  ;;  %v9098_v2 = vld [vmem:[#allocation5 + $0xa] ss:$2 sm:$0xff] }
 0x6e3   :  { %12220 = vmatprep.subr.bf16.mxu1 %v12219_v1 }
 0x6e6   :  { %12222 = vmatpush3.bf16.msra.mxu1 %v12219_v1  ;;  %v12283_v1 = vpack.c.bf16 %v9117_v63, %v9116_v62 }
 0x6e7   :  { %12224 = vmatprep.subr.bf16.mxu1 %v12223_v5 }
 0x6e9   :  { %11804 = vmatmul.mubr.msk.f32.vlgmr.msra.gmra.mrb[12].mxu1 %vm228_vm1, %v8370_v8  ;;  %v9106_v8 = vld [vmem:[#allocation5 + $0xca] ss:$2 sm:$0xff] }
 0x6ea   :  { %12226 = vmatpush3.bf16.msra.mxu1 %v12223_v5  ;;  %11814 = vmatprep.mubr.msk.f32.mxu1 %vm228_vm1, %v8364_v12  ;;  %v12287_v5 = vpack.c.bf16 %v9203_v4, %v9202_v3  ;;  %v9291_v12 = vld [vmem:[#allocation9 + $0x168] sm:$0xff] }
 0x6eb   :  { %12228 = vmatprep.subr.bf16.mxu1 %v12227_v9 }
 0x6ee   :  { %12230 = vmatpush3.bf16.msra.mxu1 %v12227_v9  ;;  %v12291_v9 = vpack.c.bf16 %v9205_v7, %v9204_v6 }
 0x6ef   :  { %12232 = vmatprep.subr.bf16.mxu1 %v12231_v13 }
 0x6f1   :  { %11815 = vmatmul.mubr.msk.f32.vlgmr.msra.gmra.mrb[12].mxu1 %vm228_vm1, %v8372_v17  ;;  %v12299_v17 = vpack.c.bf16 %v9293_v15, %v9292_v14 }
 0x6f2   :  { %12234 = vmatpush3.bf16.msra.mxu1 %v12231_v13  ;;  %11825 = vmatprep.mubr.msk.f32.mxu1 %vm228_vm1, %v8366_v20  ;;  %v12295_v13 = vpack.c.bf16 %v9291_v12, %v9290_v11  ;;  %v9379_v20 = vld [vmem:[#allocation9 + $0x1e8] sm:$0xff] }
 0x6f3   :  { %12236 = vmatprep.subr.bf16.mxu1 %v12235_v16 }
 0x6f6   :  { %12238 = vmatpush3.bf16.msra.mxu1 %v12235_v16  ;;  %v9108_v16 = vld [vmem:[#allocation5 + $0xea] ss:$2 sm:$0xff] }
 0x6f7   :  { %12240 = vmatprep.subr.bf16.mxu1 %v12239_v21 }
 0x6f9   :  { %11826 = vmatmul.mubr.msk.f32.vlgmr.msra.gmra.mrb[12].mxu1 %vm228_vm1, %v8374_v26  ;;  %v9104_v26 = vld [vmem:[#allocation5 + $0x6a] ss:$2 sm:$0xff] }
 0x6fa   :  { %12242 = vmatpush3.bf16.msra.mxu1 %v12239_v21  ;;  %11836 = vmatprep.mubr.msk.f32.mxu1 %vm228_vm1, %v8368_v25  ;;  %v12303_v21 = vpack.c.bf16 %v9379_v20, %v9378_v19  ;;  %v12307_v25 = vpack.c.bf16 %v9381_v23, %v9380_v22 }
 0x6fb   :  { %12244 = vmatprep.subr.bf16.mxu1 %v12243_v24 }
 0x6fe   :  { %12246 = vmatpush3.bf16.msra.mxu1 %v12243_v24  ;;  %v9110_v24 = vld [vmem:[#allocation5 + $0x10a] ss:$2 sm:$0xff] }
 0x6ff   :  { %12248 = vmatprep.subr.bf16.mxu1 %v12247_v30 }
 0x701   :  { %11837 = vmatmul.mubr.msk.f32.vlgmr.msra.gmra.mrb[12].mxu1 %vm228_vm1, %v8376_v35 }
 0x702   :  { %12250 = vmatpush3.bf16.msra.mxu1 %v12247_v30  ;;  %11847 = vmatprep.mubr.msk.f32.mxu1 %vm228_vm1, %v8730_v38 }
 0x703   :  { %12252 = vmatprep.subr.bf16.mxu1 %v12251_v37 }
 0x706   :  { %12254 = vmatpush3.bf16.msra.mxu1 %v12251_v37 }
 0x707   :  { %12256 = vmatprep.subr.bf16.mxu1 %v12255_v42 }
 0x709   :  { %11848 = vmatmul.mubr.msk.f32.vlgmr.msra.gmra.mrb[12].mxu1 %vm228_vm1, %v8738_v46 }
 0x70a   :  { %12258 = vmatpush3.bf16.msra.mxu1 %v12255_v42  ;;  %11858 = vmatprep.mubr.msk.f32.mxu1 %vm228_vm1, %v8732_v36 }
 0x70b   :  { %12260 = vmatprep.subr.bf16.mxu1 %v12259_v28 }
 0x70e   :  { %12262 = vmatpush3.bf16.msra.mxu1 %v12259_v28 }
 0x70f   :  { %12264 = vmatprep.subr.bf16.mxu1 %v12263_v41 }
 0x711   :  { %11859 = vmatmul.mubr.msk.f32.vlgmr.msra.gmra.mrb[12].mxu1 %vm228_vm1, %v8740_v49 }
 0x712   :  { %12266 = vmatpush3.bf16.msra.mxu1 %v12263_v41  ;;  %11869 = vmatprep.mubr.msk.f32.mxu1 %vm228_vm1, %v8734_v52  ;;  %v10101_v41 = vld [vmem:[%s14783_s9] ss:$0 sm:$0xff] }
 0x713   :  { %12268 = vmatprep.subr.bf16.mxu1 %v12267_v48 }
 0x716   :  { %12270 = vmatpush3.bf16.msra.mxu1 %v12267_v48 }
 0x717   :  { %12272 = vmatprep.subr.bf16.mxu1 %v12271_v53 }
 0x719   :  { %11870 = vmatmul.mubr.msk.f32.vlgmr.msra.gmra.mrb[12].mxu1 %vm228_vm1, %v8742_v58 }
 0x71a   :  { %12274 = vmatpush3.bf16.msra.mxu1 %v12271_v53  ;;  %11880 = vmatprep.mubr.msk.f32.mxu1 %vm228_vm1, %v8736_v57 }
 0x71b   :  { %12276 = vmatprep.subr.bf16.mxu1 %v12275_v56 }
 0x71e   :  { %12278 = vmatpush3.bf16.msra.mxu1 %v12275_v56 }
 0x71f   :  { %12280 = vmatprep.subr.bf16.mxu1 %v12279_v61 }
 0x721   :  { %11881 = vmatmul.mubr.msk.f32.vlgmr.msra.gmra.mrb[12].mxu1 %vm228_vm1, %v8744_v0 }
 0x722   :  { %12282 = vmatpush3.bf16.msra.mxu1 %v12279_v61  ;;  %11891 = vmatprep.mubr.msk.f32.mxu1 %vm228_vm1, %v9098_v2 }
 0x723   :  { %12284 = vmatprep.subr.bf16.mxu1 %v12283_v1 }
 0x726   :  { %12286 = vmatpush3.bf16.msra.mxu1 %v12283_v1 }
 0x727   :  { %12288 = vmatprep.subr.bf16.mxu1 %v12287_v5 }
 0x729   :  { %11892 = vmatmul.mubr.msk.f32.vlgmr.msra.gmra.mrb[12].mxu1 %vm228_vm1, %v9106_v8 }
 0x72a   :  { %12290 = vmatpush3.bf16.msra.mxu1 %v12287_v5  ;;  %11902 = vmatprep.mubr.msk.f32.mxu1 %vm228_vm1, %v9100_v10 }
 0x72b   :  { %12292 = vmatprep.subr.bf16.mxu1 %v12291_v9 }
 0x72e   :  { %12294 = vmatpush3.bf16.msra.mxu1 %v12291_v9 }
 0x72f   :  { %12296 = vmatprep.subr.bf16.mxu1 %v12295_v13 }
 0x731   :  { %11903 = vmatmul.mubr.msk.f32.vlgmr.msra.gmra.mrb[12].mxu1 %vm228_vm1, %v9108_v16 }
 0x732   :  { %12298 = vmatpush3.bf16.msra.mxu1 %v12295_v13  ;;  %11913 = vmatprep.mubr.msk.f32.mxu1 %vm228_vm1, %v9102_v18 }
 0x733   :  { %12300 = vmatprep.subr.bf16.mxu1 %v12299_v17 }
 0x736   :  { %12302 = vmatpush3.bf16.msra.mxu1 %v12299_v17 }
 0x737   :  { %12304 = vmatprep.subr.bf16.mxu1 %v12303_v21 }
 0x739   :  { %11914 = vmatmul.mubr.msk.f32.vlgmr.msra.gmra.mrb[12].mxu1 %vm228_vm1, %v9110_v24 }
 0x73a   :  { %12306 = vmatpush3.bf16.msra.mxu1 %v12303_v21  ;;  %11924 = vmatprep.mubr.msk.f32.mxu1 %vm228_vm1, %v9104_v26 }
 0x73b   :  { %12308 = vmatprep.subr.bf16.mxu1 %v12307_v25 }
 0x73e   :  { %12310 = vmatpush3.bf16.msra.mxu1 %v12307_v25 }
 0x741   :  { %11925 = vmatmul.mubr.msk.f32.vlgmr.msra.gmra.mrb[12].mxu1 %vm228_vm1, %v9112_v27 }
 0x814   :  { %v11926_v30 = vpop.f32.mrb[12].mxu1 }
 0x815   :  { %v9473_v32 = vadd.f32 %v11926_v30, %v10100_v29  ;;  %v9454_v33 = vpop.f32.mrb[13].mxu1 }
 0x816   :  { %v9472_v35 = vadd.f32 %v10100_v29, %v9454_v33 }
 0x817   :  { %v9475_v37 = vrot.slane %v9473_v32, 7 }
 0x819   :  { %v9478_v38 = vsel %vm9477_vm5, %v9472_v35, %v9475_v37 }
 0x81a   :  { %v9479_v39 = vsel %vm7993_vm4, %v9478_v38, 0.0 }
 0x81b   :  { %9480 = vadd.xlane.f32.xlu0 %v9479_v39 }
 0x8a8   :  { %v9481_v40 = vpop.xlane.xlu0 %9480 }
 0x8a9   :  { %v9483_v42 = vmul.f32 0.03125, %v9481_v40 }
 0x8ab   :  { %v9484_v44 = vsub.f32 %v9478_v38, %v9483_v42 }
 0x8ad   :  { %v9485_v45 = vmul.f32 %v9484_v44, %v9484_v44 }
 0x8af   :  { %v9486_v46 = vsel %vm7993_vm4, %v9485_v45, 0.0 }
 0x8b0   :  { %9487 = vadd.xlane.f32.xlu0 %v9486_v46 }
 0x93d   :  { %v9488_v28 = vpop.xlane.xlu0 %9487 }
 0x93e   :  { %v9489_v31 = vmul.f32 0.03125, %v9488_v28 }
 0x940   :  { %v9490_v34 = vadd.f32 1e-05, %v9489_v31 }
 0x942   :  { %12767 = vrsqrt.f32 %v9490_v34 }
 0x94c   :  { %v12768_v36 = vpop.eup %12767 }
 0x94d   :  { %v9492_v43 = vmul.f32 %v12768_v36, %v9484_v44 }
 0x94f   :  { %v9500_v48 = vmul.f32 %v10101_v41, %v9492_v43 }
 0x951   :  { %v9508_v49 = vadd.f32 %v10102_v47, %v9500_v48 }
 0x953   :  { %9509 = vst.msk [vmem:[#allocation11] sm:$0x3] %vm7993_vm4, %v9508_v49 }
 0x954   :  { %12824 = shalt.err (!%p12821_p6)
}
 0x955   :  { %s12825_s0 = scalar_lea.hbm %s14785_s11, 32 }
 0x956   :  { %p12826_p7 = scmp.ne.s32.totalorder %s14785_s11, %s12825_s0  ;;  %p12829_p8 = scmp.lt.u32.totalorder %s12825_s0, %s14785_s11 }
 0x958   :  { %p12831_p9 = pnand %p12829_p8, %p12826_p7 }
 0x95a   :  { %12834 = shalt.err (!%p12831_p9)
}
 0x95b   :  { %9519 = dma.vmem_to_hbm [thread:$0]  %s9517_s27, 32, %s14785_s11, [#allocation8]  }
 0x95c   :  { %12839 = dma.done.wait [#allocation8], 32  }
 0x95d   :  { %12840 = vsyncadd [#allocation8], 4294967264 }
 0x95e   :  { %9523 = vsyncpa [#allocation7], 1 }
 0x95f   :  { %9524 = vsyncpa [#allocation10], 1 }
 0x960   :  { %9525 = vsyncpa [#allocation8], 1 }

</bundles_post_ra>
